<compile_context>
chip_gen: v5e
topology: v5e:2x2
jax: 0.10.0
libtpu: 0.0.40
codegen_flags: <defaults>
</compile_context>

<pallas_src>
import functools
import math

import jax
import jax.numpy as jnp
from jax.experimental import pallas as pl
from jax.experimental.pallas import tpu as pltpu

MAX_LEN = 64
_NEG = -1e30          # finite "minus infinity": no NaNs for fully-masked rows
_LN_EPS = 1e-5

_PARALLEL = pltpu.CompilerParams(dimension_semantics=("parallel",))


# ----------------------------------------------------------------------------
# In-kernel helpers (f32 math; bf16 MXU operands)
# ----------------------------------------------------------------------------
def _bf16(x):
    return x.astype(jnp.bfloat16)


def _layernorm(x, g, b):
    mu = jnp.mean(x, axis=-1, keepdims=True)
    var = jnp.mean((x - mu) ** 2, axis=-1, keepdims=True)
    return (x - mu) * jax.lax.rsqrt(var + _LN_EPS) * g + b


def _ffn(x, w1, b1, w2, b2):
    hid = jnp.maximum(
        jnp.dot(_bf16(x), w1, preferred_element_type=jnp.float32) + b1, 0.0)
    return jnp.dot(_bf16(hid), w2, preferred_element_type=jnp.float32) + b2


def _mha_heads(xq, xkv, wq, bq, wk, bk, wv, bv, wo, bias, *, nhead):
    """Multi-head attention on (L, E) values with head-major weights.

    wq/wk/wv : (H, E, dh) bf16  -- per-head column blocks of the in-projection
    bq/bk/bv : (H, 1, dh) f32
    wo       : (H, dh, E) bf16  -- per-head row blocks of the out-projection
    bias     : (Lq, Lk)   f32   -- additive mask, built once by the caller
    Returns (Lq, E) f32 (caller adds the out-projection bias).

    Heads are a *leading batch dim* of every matmul: no per-head lane-offset
    slices, no masked stores, no in-kernel transposes; the (Lq, E) result is a
    single lane-dense slab (sum over the head axis of the per-head projections).
    """
    lq, e = xq.shape
    lk = xkv.shape[0]
    dh = e // nhead
    scale = 1.0 / math.sqrt(dh)

    xq_b = jnp.broadcast_to(_bf16(xq), (nhead, lq, e))
    xkv_b = xq_b if xkv is xq else jnp.broadcast_to(_bf16(xkv), (nhead, lk, e))

    q = jnp.einsum("hle,hed->hld", xq_b, wq,
                   preferred_element_type=jnp.float32) + bq
    k = jnp.einsum("hle,hed->hld", xkv_b, wk,
                   preferred_element_type=jnp.float32) + bk
    v = jnp.einsum("hle,hed->hld", xkv_b, wv,
                   preferred_element_type=jnp.float32) + bv

    s = jnp.einsum("hqd,hkd->hqk", _bf16(q), _bf16(k),
                   preferred_element_type=jnp.float32) * scale
    s = s + bias[None, :, :]                                    # one add, hoisted mask
    m = jnp.max(s, axis=-1, keepdims=True)
    p = jnp.exp(s - m)
    p = p * pl.reciprocal(jnp.sum(p, axis=-1, keepdims=True), approx=True)

    ctx = jnp.einsum("hqk,hkd->hqd", _bf16(p), _bf16(v),
                     preferred_element_type=jnp.float32)        # (H, Lq, dh)
    out = jnp.einsum("hqd,hde->hqe", _bf16(ctx), wo,
                     preferred_element_type=jnp.float32)        # (H, Lq, E)
    return jnp.sum(out, axis=0)                                 # == concat(heads) @ Wo


# ----------------------------------------------------------------------------
# Fused kernels (one pallas_call per transformer layer)
# ----------------------------------------------------------------------------
def _encoder_layer_kernel(x_ref, kpm_ref,
                          wq, bq, wk, bk, wv, bv, wo, bo, g1, be1,
                          w1, b1, w2, b2, g2, be2, gf, bf,
                          o_ref, *, nhead, final_ln):
    x = x_ref[0].astype(jnp.float32)                            # (Ls, E)
    l = x.shape[0]
    bias = jnp.broadcast_to(kpm_ref[0], (l, l))                 # key-padding bias, once

    attn = _mha_heads(x, x, wq[...], bq[...], wk[...], bk[...], wv[...], bv[...],
                      wo[...], bias, nhead=nhead) + bo[...]
    x = _layernorm(x + attn, g1[...], be1[...])
    x = _layernorm(x + _ffn(x, w1[...], b1[...], w2[...], b2[...]),
                   g2[...], be2[...])
    if final_ln:                                                # encoder-final LN fused
        x = _layernorm(x, gf[...], bf[...])
    o_ref[0] = x.astype(o_ref.dtype)


def _decoder_layer_kernel(y_ref, mem_ref, tkpm_ref, mkpm_ref,
                          swq, sbq, swk, sbk, swv, sbv, swo, sbo, g1, be1,
                          cwq, cbq, cwk, cbk, cwv, cbv, cwo, cbo, g2, be2,
                          w1, b1, w2, b2, g3, be3,
                          o_ref, *, nhead):
    y = y_ref[0].astype(jnp.float32)                            # (Lt, E)
    mem = mem_ref[0].astype(jnp.float32)                        # (Ls, E)
    lt = y.shape[0]
    ls = mem.shape[0]

    # masks built once (causal + tgt key padding; memory key padding)
    row = jax.lax.broadcasted_iota(jnp.int32, (lt, lt), 0)
    col = jax.lax.broadcasted_iota(jnp.int32, (lt, lt), 1)
    self_bias = (jnp.where(row >= col, 0.0, _NEG).astype(jnp.float32)
                 + jnp.broadcast_to(tkpm_ref[0], (lt, lt)))
    cross_bias = jnp.broadcast_to(mkpm_ref[0], (lt, ls))

    attn = _mha_heads(y, y, swq[...], sbq[...], swk[...], sbk[...], swv[...], sbv[...],
                      swo[...], self_bias, nhead=nhead) + sbo[...]
    y = _layernorm(y + attn, g1[...], be1[...])

    attn = _mha_heads(y, mem, cwq[...], cbq[...], cwk[...], cbk[...], cwv[...], cbv[...],
                      cwo[...], cross_bias, nhead=nhead) + cbo[...]
    y = _layernorm(y + attn, g2[...], be2[...])

    y = _layernorm(y + _ffn(y, w1[...], b1[...], w2[...], b2[...]),
                   g3[...], be3[...])
    o_ref[0] = y.astype(o_ref.dtype)


def _ln_generator_kernel(y_ref, g_ref, b_ref, w_ref, gb_ref, o_ref):
    # Final decoder LayerNorm + generator; writes logits directly seq-major
    # (Lt, N, Vpad) so no XLA transpose of the logits is needed afterwards.
    for b in range(y_ref.shape[0]):
        yn = _layernorm(y_ref[b].astype(jnp.float32), g_ref[...], b_ref[...])
        logits = jnp.dot(_bf16(yn), w_ref[...],
                         preferred_element_type=jnp.float32) + gb_ref[...]
        o_ref[:, b, :] = logits.astype(o_ref.dtype)


# ----------------------------------------------------------------------------
# pallas_call wrappers (grid over batch, weights as full resident blocks)
# ----------------------------------------------------------------------------
def _rep(shape):
    zeros = (0,) * len(shape)
    return pl.BlockSpec(shape, lambda i: zeros)


def _attn_specs(h, e, dh):
    return [_rep((h, e, dh)), _rep((h, 1, dh)),
            _rep((h, e, dh)), _rep((h, 1, dh)),
            _rep((h, e, dh)), _rep((h, 1, dh)),
            _rep((h, dh, e)), _rep((1, e)),
            _rep((1, e)), _rep((1, e))]


def encoder_layer(x, kpm, p, enc_g, enc_b, *, nhead, final_ln):
    n, l, e = x.shape
    h, dh = nhead, e // nhead
    f = p["w1"].shape[1]
    kernel = functools.partial(_encoder_layer_kernel, nhead=nhead, final_ln=final_ln)
    return pl.pallas_call(
        kernel,
        out_shape=jax.ShapeDtypeStruct((n, l, e), jnp.bfloat16),
        grid=(n,),
        in_specs=[
            pl.BlockSpec((1, l, e), lambda i: (i, 0, 0)),     # x (bf16 activations)
            pl.BlockSpec((1, 1, l), lambda i: (i, 0, 0)),     # key-padding bias
        ] + _attn_specs(h, e, dh) + [
            _rep((e, f)), _rep((1, f)),                       # FFN w1, b1
            _rep((f, e)), _rep((1, e)),                       # FFN w2, b2
            _rep((1, e)), _rep((1, e)),                       # ln2 gamma, beta
            _rep((1, e)), _rep((1, e)),                       # encoder-final LN (maybe unused)
        ],
        out_specs=pl.BlockSpec((1, l, e), lambda i: (i, 0, 0)),
        compiler_params=_PARALLEL,
    )(x, kpm,
      p["sa"]["wq"], p["sa"]["bq"], p["sa"]["wk"], p["sa"]["bk"],
      p["sa"]["wv"], p["sa"]["bv"], p["sa"]["wo"], p["sa"]["bo"],
      p["ln1_g"], p["ln1_b"],
      p["w1"], p["b1"], p["w2"], p["b2"], p["ln2_g"], p["ln2_b"],
      enc_g, enc_b)


def decoder_layer(y, memory, tgt_kpm, mem_kpm, p, *, nhead):
    n, lt, e = y.shape
    ls = memory.shape[1]
    h, dh = nhead, e // nhead
    f = p["w1"].shape[1]
    kernel = functools.partial(_decoder_layer_kernel, nhead=nhead)
    return pl.pallas_call(
        kernel,
        out_shape=jax.ShapeDtypeStruct((n, lt, e), jnp.bfloat16),
        grid=(n,),
        in_specs=[
            pl.BlockSpec((1, lt, e), lambda i: (i, 0, 0)),    # y
            pl.BlockSpec((1, ls, e), lambda i: (i, 0, 0)),    # encoder memory
            pl.BlockSpec((1, 1, lt), lambda i: (i, 0, 0)),    # tgt key-padding bias
            pl.BlockSpec((1, 1, ls), lambda i: (i, 0, 0)),    # memory key-padding bias
        ] + _attn_specs(h, e, dh) + _attn_specs(h, e, dh) + [
            _rep((e, f)), _rep((1, f)),
            _rep((f, e)), _rep((1, e)),
            _rep((1, e)), _rep((1, e)),
        ],
        out_specs=pl.BlockSpec((1, lt, e), lambda i: (i, 0, 0)),
        compiler_params=_PARALLEL,
    )(y, memory, tgt_kpm, mem_kpm,
      p["sa"]["wq"], p["sa"]["bq"], p["sa"]["wk"], p["sa"]["bk"],
      p["sa"]["wv"], p["sa"]["bv"], p["sa"]["wo"], p["sa"]["bo"],
      p["ln1_g"], p["ln1_b"],
      p["ca"]["wq"], p["ca"]["bq"], p["ca"]["wk"], p["ca"]["bk"],
      p["ca"]["wv"], p["ca"]["bv"], p["ca"]["wo"], p["ca"]["bo"],
      p["ln2_g"], p["ln2_b"],
      p["w1"], p["b1"], p["w2"], p["b2"], p["ln3_g"], p["ln3_b"])


def ln_generator(y, g, b, w, gb):
    # Whole problem in one block (batch folded in) -> seq-major (Lt, N, Vpad) logits.
    n, lt, e = y.shape
    vpad = w.shape[1]
    return pl.pallas_call(
        _ln_generator_kernel,
        out_shape=jax.ShapeDtypeStruct((lt, n, vpad), jnp.float32),
    )(y, g, b, w, gb)


# ----------------------------------------------------------------------------
# Transformer forward (plain-JAX glue: embedding gather, mask build, final slice)
# ----------------------------------------------------------------------------
def transformer_forward(params, src, tgt, *, nhead, tgt_vocab):
    ls, _ = src.shape
    lt, _ = tgt.shape

    src_bm = src.T                      # (N, Ls) token ids, batch-major
    tgt_bm = tgt.T                      # (N, Lt)

    # Embeddings + learned positional encodings (activations carried bf16).
    # TODO(synk): the embedding-table gather could be a manual DMA-gather Pallas kernel.
    src_x = (params["src_emb"][src_bm] + params["pos_emb"][:ls][None, :, :]
             ).astype(jnp.bfloat16)
    tgt_x = (params["tgt_emb"][tgt_bm] + params["pos_emb"][:lt][None, :, :]
             ).astype(jnp.bfloat16)

    # Key-padding masks as finite additive biases (N, 1, L); True==pad -> -1e30.
    src_kpm = jnp.where(src_bm == 0, _NEG, 0.0).astype(jnp.float32)[:, None, :]
    tgt_kpm = jnp.where(tgt_bm == 0, _NEG, 0.0).astype(jnp.float32)[:, None, :]

    x = src_x
    n_enc = len(params["encoder_layers"])
    for li, lp in enumerate(params["encoder_layers"]):
        x = encoder_layer(x, src_kpm, lp,
                          params["enc_norm_g"], params["enc_norm_b"],
                          nhead=nhead, final_ln=(li == n_enc - 1))
    memory = x                          # encoder-final LN already applied in-kernel

    y = tgt_x
    for lp in params["decoder_layers"]:
        y = decoder_layer(y, memory, tgt_kpm, src_kpm, lp, nhead=nhead)

    # Final decoder LN + generator, logits produced directly in (Lt, N, Vpad).
    logits = ln_generator(y, params["dec_norm_g"], params["dec_norm_b"],
                          params["gen_w"], params["gen_b"])
    return logits[:, :, :tgt_vocab]     # (Lt, N, V), seq-major like PyTorch


# ----------------------------------------------------------------------------
# Deterministic parameter init (xavier_uniform; head-major bf16 matmul weights)
# ----------------------------------------------------------------------------
def _xavier(key, shape):
    bound = math.sqrt(6.0 / (shape[0] + shape[1]))
    return jax.random.uniform(key, shape, jnp.float32, -bound, bound)


def init_params(key, src_vocab, tgt_vocab, emb_dim, nhead, num_layers, dim_ff):
    keys = iter(jax.random.split(key, 256))
    e, h = emb_dim, nhead
    dh = e // h
    wdt = jnp.bfloat16

    def zrow(k):
        return jnp.zeros((1, k), jnp.float32)

    def orow(k):
        return jnp.ones((1, k), jnp.float32)

    def attn():
        # head-major layout done here (wrap time): zero kernel cost
        def head_cols(w):                      # (E, E) -> (H, E, dh)
            return w.reshape(e, h, dh).transpose(1, 0, 2).astype(wdt)
        return dict(
            wq=head_cols(_xavier(next(keys), (e, e))),
            wk=head_cols(_xavier(next(keys), (e, e))),
            wv=head_cols(_xavier(next(keys), (e, e))),
            bq=jnp.zeros((h, 1, dh), jnp.float32),
            bk=jnp.zeros((h, 1, dh), jnp.float32),
            bv=jnp.zeros((h, 1, dh), jnp.float32),
            wo=_xavier(next(keys), (e, e)).reshape(h, dh, e).astype(wdt),
            bo=zrow(e),
        )

    def ffn():
        return dict(w1=_xavier(next(keys), (e, dim_ff)).astype(wdt), b1=zrow(dim_ff),
                    w2=_xavier(next(keys), (dim_ff, e)).astype(wdt), b2=zrow(e))

    def enc_layer():
        d = dict(sa=attn(), ln1_g=orow(e), ln1_b=zrow(e))
        d.update(ffn())
        d.update(ln2_g=orow(e), ln2_b=zrow(e))
        return d

    def dec_layer():
        d = dict(sa=attn(), ln1_g=orow(e), ln1_b=zrow(e),
                 ca=attn(), ln2_g=orow(e), ln2_b=zrow(e))
        d.update(ffn())
        d.update(ln3_g=orow(e), ln3_b=zrow(e))
        return d

    vpad = ((tgt_vocab + 127) // 128) * 128            # lane-dense generator width
    gen_w = _xavier(next(keys), (e, tgt_vocab))
    gen_w = jnp.pad(gen_w, ((0, 0), (0, vpad - tgt_vocab))).astype(wdt)

    return dict(
        src_emb=_xavier(next(keys), (src_vocab, e)),
        tgt_emb=_xavier(next(keys), (tgt_vocab, e)),
        pos_emb=_xavier(next(keys), (MAX_LEN + 2, e)),
        encoder_layers=[enc_layer() for _ in range(num_layers)],
        decoder_layers=[dec_layer() for _ in range(num_layers)],
        enc_norm_g=orow(e), enc_norm_b=zrow(e),
        dec_norm_g=orow(e), dec_norm_b=zrow(e),
        gen_w=gen_w, gen_b=jnp.zeros((1, vpad), jnp.float32),
    )


if __name__ == "__main__":
    SRC_VOCAB, TGT_VOCAB = 50, 60
    EMB, NHEAD, NLAYERS, DFF = 32, 4, 2, 64
    LS, LT, N = 8, 6, 2

    root = jax.random.PRNGKey(0)
    k_param, k_src, k_tgt = jax.random.split(root, 3)
    params = init_params(k_param, SRC_VOCAB, TGT_VOCAB, EMB, NHEAD, NLAYERS, DFF)

    # token ids (seq-major, like PyTorch batch_first=False): (L, N)
    src = jax.random.randint(k_src, (LS, N), 1, SRC_VOCAB, dtype=jnp.int32)
    tgt = jax.random.randint(k_tgt, (LT, N), 1, TGT_VOCAB, dtype=jnp.int32)
    # introduce some padding (token id 0) so the key-padding masks are exercised
    src = src.at[-1, 0].set(0)
    tgt = tgt.at[-1, 1].set(0)

    fwd = jax.jit(functools.partial(transformer_forward, nhead=NHEAD, tgt_vocab=TGT_VOCAB))
    logits = fwd(params, src, tgt)
    jax.block_until_ready(logits)
    assert logits.shape == (LT, N, TGT_VOCAB), logits.shape
    assert bool(jnp.all(jnp.isfinite(logits)))
    print("KERNEL_OK")
</pallas_src>

<mosaic_0001>
module attributes {stable_mosaic.version = 11 : i64} {
  func.func @_encoder_layer_kernel(%arg0: i32, %arg1: memref<1x8x32xbf16, #tpu.memory_space<vmem>>, %arg2: memref<1x1x8xf32, #tpu.memory_space<vmem>>, %arg3: memref<4x32x8xbf16, #tpu.memory_space<vmem>>, %arg4: memref<4x1x8xf32, #tpu.memory_space<vmem>>, %arg5: memref<4x32x8xbf16, #tpu.memory_space<vmem>>, %arg6: memref<4x1x8xf32, #tpu.memory_space<vmem>>, %arg7: memref<4x32x8xbf16, #tpu.memory_space<vmem>>, %arg8: memref<4x1x8xf32, #tpu.memory_space<vmem>>, %arg9: memref<4x8x32xbf16, #tpu.memory_space<vmem>>, %arg10: memref<1x32xf32, #tpu.memory_space<vmem>>, %arg11: memref<1x32xf32, #tpu.memory_space<vmem>>, %arg12: memref<1x32xf32, #tpu.memory_space<vmem>>, %arg13: memref<32x64xbf16, #tpu.memory_space<vmem>>, %arg14: memref<1x64xf32, #tpu.memory_space<vmem>>, %arg15: memref<64x32xbf16, #tpu.memory_space<vmem>>, %arg16: memref<1x32xf32, #tpu.memory_space<vmem>>, %arg17: memref<1x32xf32, #tpu.memory_space<vmem>>, %arg18: memref<1x32xf32, #tpu.memory_space<vmem>>, %arg19: memref<1x32xf32, #tpu.memory_space<vmem>>, %arg20: memref<1x32xf32, #tpu.memory_space<vmem>>, %arg21: memref<1x8x32xbf16, #tpu.memory_space<vmem>>) attributes {dimension_semantics = [#tpu.dimension_semantics<parallel>], iteration_bounds = array<i64: 2>, scalar_prefetch = 0 : i64, scratch_operands = 0 : i64, tpu.core_type = #tpu.core_type<tc>, window_params = [{transform_indices = @transform_0, window_bounds = array<i64: 1, 8, 32>}, {transform_indices = @transform_1, window_bounds = array<i64: 1, 1, 8>}, {pipeline_mode = #tpu.pipeline_mode<synchronous>, transform_indices = @transform_2, window_bounds = array<i64: 4, 32, 8>}, {pipeline_mode = #tpu.pipeline_mode<synchronous>, transform_indices = @transform_3, window_bounds = array<i64: 4, 1, 8>}, {pipeline_mode = #tpu.pipeline_mode<synchronous>, transform_indices = @transform_4, window_bounds = array<i64: 4, 32, 8>}, {pipeline_mode = #tpu.pipeline_mode<synchronous>, transform_indices = @transform_5, window_bounds = array<i64: 4, 1, 8>}, {pipeline_mode = #tpu.pipeline_mode<synchronous>, transform_indices = @transform_6, window_bounds = array<i64: 4, 32, 8>}, {pipeline_mode = #tpu.pipeline_mode<synchronous>, transform_indices = @transform_7, window_bounds = array<i64: 4, 1, 8>}, {pipeline_mode = #tpu.pipeline_mode<synchronous>, transform_indices = @transform_8, window_bounds = array<i64: 4, 8, 32>}, {pipeline_mode = #tpu.pipeline_mode<synchronous>, transform_indices = @transform_9, window_bounds = array<i64: 1, 32>}, {pipeline_mode = #tpu.pipeline_mode<synchronous>, transform_indices = @transform_10, window_bounds = array<i64: 1, 32>}, {pipeline_mode = #tpu.pipeline_mode<synchronous>, transform_indices = @transform_11, window_bounds = array<i64: 1, 32>}, {pipeline_mode = #tpu.pipeline_mode<synchronous>, transform_indices = @transform_12, window_bounds = array<i64: 32, 64>}, {pipeline_mode = #tpu.pipeline_mode<synchronous>, transform_indices = @transform_13, window_bounds = array<i64: 1, 64>}, {pipeline_mode = #tpu.pipeline_mode<synchronous>, transform_indices = @transform_14, window_bounds = array<i64: 64, 32>}, {pipeline_mode = #tpu.pipeline_mode<synchronous>, transform_indices = @transform_15, window_bounds = array<i64: 1, 32>}, {pipeline_mode = #tpu.pipeline_mode<synchronous>, transform_indices = @transform_16, window_bounds = array<i64: 1, 32>}, {pipeline_mode = #tpu.pipeline_mode<synchronous>, transform_indices = @transform_17, window_bounds = array<i64: 1, 32>}, {pipeline_mode = #tpu.pipeline_mode<synchronous>, transform_indices = @transform_18, window_bounds = array<i64: 1, 32>}, {pipeline_mode = #tpu.pipeline_mode<synchronous>, transform_indices = @transform_19, window_bounds = array<i64: 1, 32>}, {transform_indices = @transform_20, window_bounds = array<i64: 1, 8, 32>}]} {
    %c0 = arith.constant 0 : index
    %c0_0 = arith.constant 0 : index
    %c0_1 = arith.constant 0 : index
    %0 = vector.load %arg1[%c0, %c0_0, %c0_1] : memref<1x8x32xbf16, #tpu.memory_space<vmem>>, vector<1x8x32xbf16>
    %1 = vector.shape_cast %0 : vector<1x8x32xbf16> to vector<8x32xbf16>
    %2 = arith.extf %1 : vector<8x32xbf16> to vector<8x32xf32>
    %c0_2 = arith.constant 0 : index
    %c0_3 = arith.constant 0 : index
    %c0_4 = arith.constant 0 : index
    %3 = vector.load %arg2[%c0_2, %c0_3, %c0_4] : memref<1x1x8xf32, #tpu.memory_space<vmem>>, vector<1x1x8xf32>
    %4 = vector.shape_cast %3 : vector<1x1x8xf32> to vector<1x8xf32>
    %5 = vector.shape_cast %4 : vector<1x8xf32> to vector<1x8xf32>
    %6 = vector.broadcast %5 : vector<1x8xf32> to vector<8x8xf32>
    %c0_5 = arith.constant 0 : index
    %c0_6 = arith.constant 0 : index
    %c0_7 = arith.constant 0 : index
    %7 = vector.load %arg3[%c0_5, %c0_6, %c0_7] : memref<4x32x8xbf16, #tpu.memory_space<vmem>>, vector<4x32x8xbf16>
    %c0_8 = arith.constant 0 : index
    %c0_9 = arith.constant 0 : index
    %c0_10 = arith.constant 0 : index
    %8 = vector.load %arg4[%c0_8, %c0_9, %c0_10] : memref<4x1x8xf32, #tpu.memory_space<vmem>>, vector<4x1x8xf32>
    %c0_11 = arith.constant 0 : index
    %c0_12 = arith.constant 0 : index
    %c0_13 = arith.constant 0 : index
    %9 = vector.load %arg5[%c0_11, %c0_12, %c0_13] : memref<4x32x8xbf16, #tpu.memory_space<vmem>>, vector<4x32x8xbf16>
    %c0_14 = arith.constant 0 : index
    %c0_15 = arith.constant 0 : index
    %c0_16 = arith.constant 0 : index
    %10 = vector.load %arg6[%c0_14, %c0_15, %c0_16] : memref<4x1x8xf32, #tpu.memory_space<vmem>>, vector<4x1x8xf32>
    %c0_17 = arith.constant 0 : index
    %c0_18 = arith.constant 0 : index
    %c0_19 = arith.constant 0 : index
    %11 = vector.load %arg7[%c0_17, %c0_18, %c0_19] : memref<4x32x8xbf16, #tpu.memory_space<vmem>>, vector<4x32x8xbf16>
    %c0_20 = arith.constant 0 : index
    %c0_21 = arith.constant 0 : index
    %c0_22 = arith.constant 0 : index
    %12 = vector.load %arg8[%c0_20, %c0_21, %c0_22] : memref<4x1x8xf32, #tpu.memory_space<vmem>>, vector<4x1x8xf32>
    %c0_23 = arith.constant 0 : index
    %c0_24 = arith.constant 0 : index
    %c0_25 = arith.constant 0 : index
    %13 = vector.load %arg9[%c0_23, %c0_24, %c0_25] : memref<4x8x32xbf16, #tpu.memory_space<vmem>>, vector<4x8x32xbf16>
    %14 = arith.truncf %2 : vector<8x32xf32> to vector<8x32xbf16>
    %15 = vector.shape_cast %14 : vector<8x32xbf16> to vector<1x8x32xbf16>
    %16 = vector.broadcast %15 : vector<1x8x32xbf16> to vector<4x8x32xbf16>
    "tpu.trace_start"() <{level = 10 : i32, message = "hle,hed->hld"}> : () -> ()
    %cst = arith.constant dense<0.000000e+00> : vector<4x8x8xf32>
    %17 = tpu.matmul %16, %7, %cst {dimension_numbers = #tpu.dot_dimension_numbers<[2], [1], [1], [2], [0, 0, 0, 1, 1, 2], [0], [0]>} : vector<4x8x32xbf16>, vector<4x32x8xbf16>, vector<4x8x8xf32> -> vector<4x8x8xf32>
    "tpu.trace_stop"() : () -> ()
    %18 = vector.broadcast %8 : vector<4x1x8xf32> to vector<4x8x8xf32>
    %19 = arith.addf %17, %18 : vector<4x8x8xf32>
    "tpu.trace_start"() <{level = 10 : i32, message = "hle,hed->hld"}> : () -> ()
    %cst_26 = arith.constant dense<0.000000e+00> : vector<4x8x8xf32>
    %20 = tpu.matmul %16, %9, %cst_26 {dimension_numbers = #tpu.dot_dimension_numbers<[2], [1], [1], [2], [0, 0, 0, 1, 1, 2], [0], [0]>} : vector<4x8x32xbf16>, vector<4x32x8xbf16>, vector<4x8x8xf32> -> vector<4x8x8xf32>
    "tpu.trace_stop"() : () -> ()
    %21 = vector.broadcast %10 : vector<4x1x8xf32> to vector<4x8x8xf32>
    %22 = arith.addf %20, %21 : vector<4x8x8xf32>
    "tpu.trace_start"() <{level = 10 : i32, message = "hle,hed->hld"}> : () -> ()
    %cst_27 = arith.constant dense<0.000000e+00> : vector<4x8x8xf32>
    %23 = tpu.matmul %16, %11, %cst_27 {dimension_numbers = #tpu.dot_dimension_numbers<[2], [1], [1], [2], [0, 0, 0, 1, 1, 2], [0], [0]>} : vector<4x8x32xbf16>, vector<4x32x8xbf16>, vector<4x8x8xf32> -> vector<4x8x8xf32>
    "tpu.trace_stop"() : () -> ()
    %24 = vector.broadcast %12 : vector<4x1x8xf32> to vector<4x8x8xf32>
    %25 = arith.addf %23, %24 : vector<4x8x8xf32>
    %26 = arith.truncf %19 : vector<4x8x8xf32> to vector<4x8x8xbf16>
    %27 = arith.truncf %22 : vector<4x8x8xf32> to vector<4x8x8xbf16>
    "tpu.trace_start"() <{level = 10 : i32, message = "hqd,hkd->hqk"}> : () -> ()
    %cst_28 = arith.constant dense<0.000000e+00> : vector<4x8x8xf32>
    %28 = tpu.matmul %26, %27, %cst_28 {dimension_numbers = #tpu.dot_dimension_numbers<[2], [2], [1], [1], [0, 0, 0, 1, 1, 1], [0], [0]>} : vector<4x8x8xbf16>, vector<4x8x8xbf16>, vector<4x8x8xf32> -> vector<4x8x8xf32>
    "tpu.trace_stop"() : () -> ()
    %cst_29 = arith.constant 0.353553385 : f32
    %29 = vector.broadcast %cst_29 : f32 to vector<4x8x8xf32>
    %30 = arith.mulf %28, %29 : vector<4x8x8xf32>
    %31 = vector.shape_cast %6 : vector<8x8xf32> to vector<1x8x8xf32>
    %32 = vector.broadcast %31 : vector<1x8x8xf32> to vector<4x8x8xf32>
    %33 = arith.addf %30, %32 : vector<4x8x8xf32>
    %cst_30 = arith.constant dense<0xFF800000> : vector<4x8xf32>
    %34 = vector.multi_reduction <maximumf>, %33, %cst_30 [2] : vector<4x8x8xf32> to vector<4x8xf32>
    %35 = vector.shape_cast %34 : vector<4x8xf32> to vector<4x8x1xf32>
    %36 = vector.broadcast %35 : vector<4x8x1xf32> to vector<4x8x8xf32>
    %37 = arith.subf %33, %36 : vector<4x8x8xf32>
    %38 = math.exp %37 : vector<4x8x8xf32>
    %cst_31 = arith.constant dense<0.000000e+00> : vector<4x8xf32>
    %39 = vector.multi_reduction <add>, %38, %cst_31 [2] : vector<4x8x8xf32> to vector<4x8xf32>
    %40 = vector.shape_cast %39 : vector<4x8xf32> to vector<4x8x1xf32>
    %41 = tpu.reciprocal %40 {approx = true} : vector<4x8x1xf32> -> vector<4x8x1xf32>
    %42 = vector.broadcast %41 : vector<4x8x1xf32> to vector<4x8x8xf32>
    %43 = arith.mulf %38, %42 : vector<4x8x8xf32>
    %44 = arith.truncf %43 : vector<4x8x8xf32> to vector<4x8x8xbf16>
    %45 = arith.truncf %25 : vector<4x8x8xf32> to vector<4x8x8xbf16>
    "tpu.trace_start"() <{level = 10 : i32, message = "hqk,hkd->hqd"}> : () -> ()
    %cst_32 = arith.constant dense<0.000000e+00> : vector<4x8x8xf32>
    %46 = tpu.matmul %44, %45, %cst_32 {dimension_numbers = #tpu.dot_dimension_numbers<[2], [1], [1], [2], [0, 0, 0, 1, 1, 2], [0], [0]>} : vector<4x8x8xbf16>, vector<4x8x8xbf16>, vector<4x8x8xf32> -> vector<4x8x8xf32>
    "tpu.trace_stop"() : () -> ()
    %47 = arith.truncf %46 : vector<4x8x8xf32> to vector<4x8x8xbf16>
    "tpu.trace_start"() <{level = 10 : i32, message = "hqd,hde->hqe"}> : () -> ()
    %cst_33 = arith.constant dense<0.000000e+00> : vector<4x8x32xf32>
    %48 = tpu.matmul %47, %13, %cst_33 {dimension_numbers = #tpu.dot_dimension_numbers<[2], [1], [1], [2], [0, 0, 0, 1, 1, 2], [0], [0]>} : vector<4x8x8xbf16>, vector<4x8x32xbf16>, vector<4x8x32xf32> -> vector<4x8x32xf32>
    "tpu.trace_stop"() : () -> ()
    %cst_34 = arith.constant dense<0.000000e+00> : vector<8x32xf32>
    %49 = vector.multi_reduction <add>, %48, %cst_34 [0] : vector<4x8x32xf32> to vector<8x32xf32>
    %c0_35 = arith.constant 0 : index
    %c0_36 = arith.constant 0 : index
    %50 = vector.load %arg10[%c0_35, %c0_36] : memref<1x32xf32, #tpu.memory_space<vmem>>, vector<1x32xf32>
    %51 = vector.broadcast %50 : vector<1x32xf32> to vector<8x32xf32>
    %52 = arith.addf %49, %51 : vector<8x32xf32>
    %53 = arith.addf %2, %52 : vector<8x32xf32>
    %c0_37 = arith.constant 0 : index
    %c0_38 = arith.constant 0 : index
    %54 = vector.load %arg11[%c0_37, %c0_38] : memref<1x32xf32, #tpu.memory_space<vmem>>, vector<1x32xf32>
    %c0_39 = arith.constant 0 : index
    %c0_40 = arith.constant 0 : index
    %55 = vector.load %arg12[%c0_39, %c0_40] : memref<1x32xf32, #tpu.memory_space<vmem>>, vector<1x32xf32>
    %cst_41 = arith.constant dense<0.000000e+00> : vector<8xf32>
    %56 = vector.multi_reduction <add>, %53, %cst_41 [1] : vector<8x32xf32> to vector<8xf32>
    %57 = vector.shape_cast %56 : vector<8xf32> to vector<8x1xf32>
    %cst_42 = arith.constant 3.200000e+01 : f32
    %58 = vector.broadcast %cst_42 : f32 to vector<8x1xf32>
    %59 = arith.divf %57, %58 : vector<8x1xf32>
    %60 = vector.broadcast %59 : vector<8x1xf32> to vector<8x32xf32>
    %61 = arith.subf %53, %60 : vector<8x32xf32>
    %62 = arith.mulf %61, %61 : vector<8x32xf32>
    %cst_43 = arith.constant dense<0.000000e+00> : vector<8xf32>
    %63 = vector.multi_reduction <add>, %62, %cst_43 [1] : vector<8x32xf32> to vector<8xf32>
    %64 = vector.shape_cast %63 : vector<8xf32> to vector<8x1xf32>
    %cst_44 = arith.constant 3.200000e+01 : f32
    %65 = vector.broadcast %cst_44 : f32 to vector<8x1xf32>
    %66 = arith.divf %64, %65 : vector<8x1xf32>
    %67 = vector.broadcast %59 : vector<8x1xf32> to vector<8x32xf32>
    %68 = arith.subf %53, %67 : vector<8x32xf32>
    %cst_45 = arith.constant 9.99999974E-6 : f32
    %69 = vector.broadcast %cst_45 : f32 to vector<8x1xf32>
    %70 = arith.addf %66, %69 : vector<8x1xf32>
    %71 = math.rsqrt %70 : vector<8x1xf32>
    %72 = vector.broadcast %71 : vector<8x1xf32> to vector<8x32xf32>
    %73 = arith.mulf %68, %72 : vector<8x32xf32>
    %74 = vector.broadcast %54 : vector<1x32xf32> to vector<8x32xf32>
    %75 = arith.mulf %73, %74 : vector<8x32xf32>
    %76 = vector.broadcast %55 : vector<1x32xf32> to vector<8x32xf32>
    %77 = arith.addf %75, %76 : vector<8x32xf32>
    %c0_46 = arith.constant 0 : index
    %c0_47 = arith.constant 0 : index
    %78 = vector.load %arg13[%c0_46, %c0_47] : memref<32x64xbf16, #tpu.memory_space<vmem>>, vector<32x64xbf16>
    %c0_48 = arith.constant 0 : index
    %c0_49 = arith.constant 0 : index
    %79 = vector.load %arg14[%c0_48, %c0_49] : memref<1x64xf32, #tpu.memory_space<vmem>>, vector<1x64xf32>
    %c0_50 = arith.constant 0 : index
    %c0_51 = arith.constant 0 : index
    %80 = vector.load %arg15[%c0_50, %c0_51] : memref<64x32xbf16, #tpu.memory_space<vmem>>, vector<64x32xbf16>
    %c0_52 = arith.constant 0 : index
    %c0_53 = arith.constant 0 : index
    %81 = vector.load %arg16[%c0_52, %c0_53] : memref<1x32xf32, #tpu.memory_space<vmem>>, vector<1x32xf32>
    %82 = arith.truncf %77 : vector<8x32xf32> to vector<8x32xbf16>
    %cst_54 = arith.constant dense<0.000000e+00> : vector<8x64xf32>
    %83 = tpu.matmul %82, %78, %cst_54 {dimension_numbers = #tpu.dot_dimension_numbers<[1], [0], [0], [1], [0, 0, 1, 1], [], []>} : vector<8x32xbf16>, vector<32x64xbf16>, vector<8x64xf32> -> vector<8x64xf32>
    %84 = vector.broadcast %79 : vector<1x64xf32> to vector<8x64xf32>
    %85 = arith.addf %83, %84 : vector<8x64xf32>
    %cst_55 = arith.constant 0.000000e+00 : f32
    %86 = vector.broadcast %cst_55 : f32 to vector<8x64xf32>
    %87 = arith.maximumf %85, %86 : vector<8x64xf32>
    %88 = arith.truncf %87 : vector<8x64xf32> to vector<8x64xbf16>
    %cst_56 = arith.constant dense<0.000000e+00> : vector<8x32xf32>
    %89 = tpu.matmul %88, %80, %cst_56 {dimension_numbers = #tpu.dot_dimension_numbers<[1], [0], [0], [1], [0, 0, 1, 1], [], []>} : vector<8x64xbf16>, vector<64x32xbf16>, vector<8x32xf32> -> vector<8x32xf32>
    %90 = vector.broadcast %81 : vector<1x32xf32> to vector<8x32xf32>
    %91 = arith.addf %89, %90 : vector<8x32xf32>
    %92 = arith.addf %77, %91 : vector<8x32xf32>
    %c0_57 = arith.constant 0 : index
    %c0_58 = arith.constant 0 : index
    %93 = vector.load %arg17[%c0_57, %c0_58] : memref<1x32xf32, #tpu.memory_space<vmem>>, vector<1x32xf32>
    %c0_59 = arith.constant 0 : index
    %c0_60 = arith.constant 0 : index
    %94 = vector.load %arg18[%c0_59, %c0_60] : memref<1x32xf32, #tpu.memory_space<vmem>>, vector<1x32xf32>
    %cst_61 = arith.constant dense<0.000000e+00> : vector<8xf32>
    %95 = vector.multi_reduction <add>, %92, %cst_61 [1] : vector<8x32xf32> to vector<8xf32>
    %96 = vector.shape_cast %95 : vector<8xf32> to vector<8x1xf32>
    %cst_62 = arith.constant 3.200000e+01 : f32
    %97 = vector.broadcast %cst_62 : f32 to vector<8x1xf32>
    %98 = arith.divf %96, %97 : vector<8x1xf32>
    %99 = vector.broadcast %98 : vector<8x1xf32> to vector<8x32xf32>
    %100 = arith.subf %92, %99 : vector<8x32xf32>
    %101 = arith.mulf %100, %100 : vector<8x32xf32>
    %cst_63 = arith.constant dense<0.000000e+00> : vector<8xf32>
    %102 = vector.multi_reduction <add>, %101, %cst_63 [1] : vector<8x32xf32> to vector<8xf32>
    %103 = vector.shape_cast %102 : vector<8xf32> to vector<8x1xf32>
    %cst_64 = arith.constant 3.200000e+01 : f32
    %104 = vector.broadcast %cst_64 : f32 to vector<8x1xf32>
    %105 = arith.divf %103, %104 : vector<8x1xf32>
    %106 = vector.broadcast %98 : vector<8x1xf32> to vector<8x32xf32>
    %107 = arith.subf %92, %106 : vector<8x32xf32>
    %cst_65 = arith.constant 9.99999974E-6 : f32
    %108 = vector.broadcast %cst_65 : f32 to vector<8x1xf32>
    %109 = arith.addf %105, %108 : vector<8x1xf32>
    %110 = math.rsqrt %109 : vector<8x1xf32>
    %111 = vector.broadcast %110 : vector<8x1xf32> to vector<8x32xf32>
    %112 = arith.mulf %107, %111 : vector<8x32xf32>
    %113 = vector.broadcast %93 : vector<1x32xf32> to vector<8x32xf32>
    %114 = arith.mulf %112, %113 : vector<8x32xf32>
    %115 = vector.broadcast %94 : vector<1x32xf32> to vector<8x32xf32>
    %116 = arith.addf %114, %115 : vector<8x32xf32>
    %117 = arith.truncf %116 : vector<8x32xf32> to vector<8x32xbf16>
    %c0_66 = arith.constant 0 : index
    %c0_67 = arith.constant 0 : index
    %c0_68 = arith.constant 0 : index
    %118 = vector.load %arg21[%c0_66, %c0_67, %c0_68] : memref<1x8x32xbf16, #tpu.memory_space<vmem>>, vector<1x8x32xbf16>
    %119 = vector.shape_cast %118 : vector<1x8x32xbf16> to vector<8x32xbf16>
    %120 = vector.shape_cast %117 : vector<8x32xbf16> to vector<1x8x32xbf16>
    tpu.vector_store %arg21[%c0_66, %c0_67, %c0_68], %120 {strides = array<i32>} : memref<1x8x32xbf16, #tpu.memory_space<vmem>>, vector<1x8x32xbf16>,
    return
  }
  func.func @transform_0(%arg0: i32) -> (i32, i32, i32) {
    %c0_i32 = arith.constant 0 : i32
    %c0_i32_0 = arith.constant 0 : i32
    %c0_i32_1 = arith.constant 0 : i32
    return %arg0, %c0_i32, %c0_i32_0 : i32, i32, i32
  }
  func.func @transform_1(%arg0: i32) -> (i32, i32, i32) {
    %c0_i32 = arith.constant 0 : i32
    %c0_i32_0 = arith.constant 0 : i32
    %c0_i32_1 = arith.constant 0 : i32
    return %arg0, %c0_i32, %c0_i32_0 : i32, i32, i32
  }
  func.func @transform_2(%arg0: i32) -> (i32, i32, i32) {
    %c0_i32 = arith.constant 0 : i32
    %c0_i32_0 = arith.constant 0 : i32
    %c0_i32_1 = arith.constant 0 : i32
    %c0_i32_2 = arith.constant 0 : i32
    return %c0_i32, %c0_i32_0, %c0_i32_1 : i32, i32, i32
  }
  func.func @transform_3(%arg0: i32) -> (i32, i32, i32) {
    %c0_i32 = arith.constant 0 : i32
    %c0_i32_0 = arith.constant 0 : i32
    %c0_i32_1 = arith.constant 0 : i32
    %c0_i32_2 = arith.constant 0 : i32
    return %c0_i32, %c0_i32_0, %c0_i32_1 : i32, i32, i32
  }
  func.func @transform_4(%arg0: i32) -> (i32, i32, i32) {
    %c0_i32 = arith.constant 0 : i32
    %c0_i32_0 = arith.constant 0 : i32
    %c0_i32_1 = arith.constant 0 : i32
    %c0_i32_2 = arith.constant 0 : i32
    return %c0_i32, %c0_i32_0, %c0_i32_1 : i32, i32, i32
  }
  func.func @transform_5(%arg0: i32) -> (i32, i32, i32) {
    %c0_i32 = arith.constant 0 : i32
    %c0_i32_0 = arith.constant 0 : i32
    %c0_i32_1 = arith.constant 0 : i32
    %c0_i32_2 = arith.constant 0 : i32
    return %c0_i32, %c0_i32_0, %c0_i32_1 : i32, i32, i32
  }
  func.func @transform_6(%arg0: i32) -> (i32, i32, i32) {
    %c0_i32 = arith.constant 0 : i32
    %c0_i32_0 = arith.constant 0 : i32
    %c0_i32_1 = arith.constant 0 : i32
    %c0_i32_2 = arith.constant 0 : i32
    return %c0_i32, %c0_i32_0, %c0_i32_1 : i32, i32, i32
  }
  func.func @transform_7(%arg0: i32) -> (i32, i32, i32) {
    %c0_i32 = arith.constant 0 : i32
    %c0_i32_0 = arith.constant 0 : i32
    %c0_i32_1 = arith.constant 0 : i32
    %c0_i32_2 = arith.constant 0 : i32
    return %c0_i32, %c0_i32_0, %c0_i32_1 : i32, i32, i32
  }
  func.func @transform_8(%arg0: i32) -> (i32, i32, i32) {
    %c0_i32 = arith.constant 0 : i32
    %c0_i32_0 = arith.constant 0 : i32
    %c0_i32_1 = arith.constant 0 : i32
    %c0_i32_2 = arith.constant 0 : i32
    return %c0_i32, %c0_i32_0, %c0_i32_1 : i32, i32, i32
  }
  func.func @transform_9(%arg0: i32) -> (i32, i32) {
    %c0_i32 = arith.constant 0 : i32
    %c0_i32_0 = arith.constant 0 : i32
    %c0_i32_1 = arith.constant 0 : i32
    return %c0_i32, %c0_i32_0 : i32, i32
  }
  func.func @transform_10(%arg0: i32) -> (i32, i32) {
    %c0_i32 = arith.constant 0 : i32
    %c0_i32_0 = arith.constant 0 : i32
    %c0_i32_1 = arith.constant 0 : i32
    return %c0_i32, %c0_i32_0 : i32, i32
  }
  func.func @transform_11(%arg0: i32) -> (i32, i32) {
    %c0_i32 = arith.constant 0 : i32
    %c0_i32_0 = arith.constant 0 : i32
    %c0_i32_1 = arith.constant 0 : i32
    return %c0_i32, %c0_i32_0 : i32, i32
  }
  func.func @transform_12(%arg0: i32) -> (i32, i32) {
    %c0_i32 = arith.constant 0 : i32
    %c0_i32_0 = arith.constant 0 : i32
    %c0_i32_1 = arith.constant 0 : i32
    return %c0_i32, %c0_i32_0 : i32, i32
  }
  func.func @transform_13(%arg0: i32) -> (i32, i32) {
    %c0_i32 = arith.constant 0 : i32
    %c0_i32_0 = arith.constant 0 : i32
    %c0_i32_1 = arith.constant 0 : i32
    return %c0_i32, %c0_i32_0 : i32, i32
  }
  func.func @transform_14(%arg0: i32) -> (i32, i32) {
    %c0_i32 = arith.constant 0 : i32
    %c0_i32_0 = arith.constant 0 : i32
    %c0_i32_1 = arith.constant 0 : i32
    return %c0_i32, %c0_i32_0 : i32, i32
  }
  func.func @transform_15(%arg0: i32) -> (i32, i32) {
    %c0_i32 = arith.constant 0 : i32
    %c0_i32_0 = arith.constant 0 : i32
    %c0_i32_1 = arith.constant 0 : i32
    return %c0_i32, %c0_i32_0 : i32, i32
  }
  func.func @transform_16(%arg0: i32) -> (i32, i32) {
    %c0_i32 = arith.constant 0 : i32
    %c0_i32_0 = arith.constant 0 : i32
    %c0_i32_1 = arith.constant 0 : i32
    return %c0_i32, %c0_i32_0 : i32, i32
  }
  func.func @transform_17(%arg0: i32) -> (i32, i32) {
    %c0_i32 = arith.constant 0 : i32
    %c0_i32_0 = arith.constant 0 : i32
    %c0_i32_1 = arith.constant 0 : i32
    return %c0_i32, %c0_i32_0 : i32, i32
  }
  func.func @transform_18(%arg0: i32) -> (i32, i32) {
    %c0_i32 = arith.constant 0 : i32
    %c0_i32_0 = arith.constant 0 : i32
    %c0_i32_1 = arith.constant 0 : i32
    return %c0_i32, %c0_i32_0 : i32, i32
  }
  func.func @transform_19(%arg0: i32) -> (i32, i32) {
    %c0_i32 = arith.constant 0 : i32
    %c0_i32_0 = arith.constant 0 : i32
    %c0_i32_1 = arith.constant 0 : i32
    return %c0_i32, %c0_i32_0 : i32, i32
  }
  func.func @transform_20(%arg0: i32) -> (i32, i32, i32) {
    %c0_i32 = arith.constant 0 : i32
    %c0_i32_0 = arith.constant 0 : i32
    %c0_i32_1 = arith.constant 0 : i32
    return %arg0, %c0_i32, %c0_i32_0 : i32, i32, i32
  }
}

module attributes {stable_mosaic.version = 11 : i64} {
  func.func @_encoder_layer_kernel(%arg0: i32, %arg1: memref<1x8x32xbf16, #tpu.memory_space<vmem>>, %arg2: memref<1x1x8xf32, #tpu.memory_space<vmem>>, %arg3: memref<4x32x8xbf16, #tpu.memory_space<vmem>>, %arg4: memref<4x1x8xf32, #tpu.memory_space<vmem>>, %arg5: memref<4x32x8xbf16, #tpu.memory_space<vmem>>, %arg6: memref<4x1x8xf32, #tpu.memory_space<vmem>>, %arg7: memref<4x32x8xbf16, #tpu.memory_space<vmem>>, %arg8: memref<4x1x8xf32, #tpu.memory_space<vmem>>, %arg9: memref<4x8x32xbf16, #tpu.memory_space<vmem>>, %arg10: memref<1x32xf32, #tpu.memory_space<vmem>>, %arg11: memref<1x32xf32, #tpu.memory_space<vmem>>, %arg12: memref<1x32xf32, #tpu.memory_space<vmem>>, %arg13: memref<32x64xbf16, #tpu.memory_space<vmem>>, %arg14: memref<1x64xf32, #tpu.memory_space<vmem>>, %arg15: memref<64x32xbf16, #tpu.memory_space<vmem>>, %arg16: memref<1x32xf32, #tpu.memory_space<vmem>>, %arg17: memref<1x32xf32, #tpu.memory_space<vmem>>, %arg18: memref<1x32xf32, #tpu.memory_space<vmem>>, %arg19: memref<1x32xf32, #tpu.memory_space<vmem>>, %arg20: memref<1x32xf32, #tpu.memory_space<vmem>>, %arg21: memref<1x8x32xbf16, #tpu.memory_space<vmem>>) attributes {dimension_semantics = [#tpu.dimension_semantics<parallel>], iteration_bounds = array<i64: 2>, scalar_prefetch = 0 : i64, scratch_operands = 0 : i64, tpu.core_type = #tpu.core_type<tc>, window_params = [{transform_indices = @transform_0, window_bounds = array<i64: 1, 8, 32>}, {transform_indices = @transform_1, window_bounds = array<i64: 1, 1, 8>}, {pipeline_mode = #tpu.pipeline_mode<synchronous>, transform_indices = @transform_2, window_bounds = array<i64: 4, 32, 8>}, {pipeline_mode = #tpu.pipeline_mode<synchronous>, transform_indices = @transform_3, window_bounds = array<i64: 4, 1, 8>}, {pipeline_mode = #tpu.pipeline_mode<synchronous>, transform_indices = @transform_4, window_bounds = array<i64: 4, 32, 8>}, {pipeline_mode = #tpu.pipeline_mode<synchronous>, transform_indices = @transform_5, window_bounds = array<i64: 4, 1, 8>}, {pipeline_mode = #tpu.pipeline_mode<synchronous>, transform_indices = @transform_6, window_bounds = array<i64: 4, 32, 8>}, {pipeline_mode = #tpu.pipeline_mode<synchronous>, transform_indices = @transform_7, window_bounds = array<i64: 4, 1, 8>}, {pipeline_mode = #tpu.pipeline_mode<synchronous>, transform_indices = @transform_8, window_bounds = array<i64: 4, 8, 32>}, {pipeline_mode = #tpu.pipeline_mode<synchronous>, transform_indices = @transform_9, window_bounds = array<i64: 1, 32>}, {pipeline_mode = #tpu.pipeline_mode<synchronous>, transform_indices = @transform_10, window_bounds = array<i64: 1, 32>}, {pipeline_mode = #tpu.pipeline_mode<synchronous>, transform_indices = @transform_11, window_bounds = array<i64: 1, 32>}, {pipeline_mode = #tpu.pipeline_mode<synchronous>, transform_indices = @transform_12, window_bounds = array<i64: 32, 64>}, {pipeline_mode = #tpu.pipeline_mode<synchronous>, transform_indices = @transform_13, window_bounds = array<i64: 1, 64>}, {pipeline_mode = #tpu.pipeline_mode<synchronous>, transform_indices = @transform_14, window_bounds = array<i64: 64, 32>}, {pipeline_mode = #tpu.pipeline_mode<synchronous>, transform_indices = @transform_15, window_bounds = array<i64: 1, 32>}, {pipeline_mode = #tpu.pipeline_mode<synchronous>, transform_indices = @transform_16, window_bounds = array<i64: 1, 32>}, {pipeline_mode = #tpu.pipeline_mode<synchronous>, transform_indices = @transform_17, window_bounds = array<i64: 1, 32>}, {pipeline_mode = #tpu.pipeline_mode<synchronous>, transform_indices = @transform_18, window_bounds = array<i64: 1, 32>}, {pipeline_mode = #tpu.pipeline_mode<synchronous>, transform_indices = @transform_19, window_bounds = array<i64: 1, 32>}, {transform_indices = @transform_20, window_bounds = array<i64: 1, 8, 32>}]} {
    %c0 = arith.constant 0 : index
    %c0_0 = arith.constant 0 : index
    %c0_1 = arith.constant 0 : index
    %0 = vector.load %arg1[%c0, %c0_0, %c0_1] : memref<1x8x32xbf16, #tpu.memory_space<vmem>>, vector<1x8x32xbf16>
    %1 = vector.shape_cast %0 : vector<1x8x32xbf16> to vector<8x32xbf16>
    %2 = arith.extf %1 : vector<8x32xbf16> to vector<8x32xf32>
    %c0_2 = arith.constant 0 : index
    %c0_3 = arith.constant 0 : index
    %c0_4 = arith.constant 0 : index
    %3 = vector.load %arg2[%c0_2, %c0_3, %c0_4] : memref<1x1x8xf32, #tpu.memory_space<vmem>>, vector<1x1x8xf32>
    %4 = vector.shape_cast %3 : vector<1x1x8xf32> to vector<1x8xf32>
    %5 = vector.shape_cast %4 : vector<1x8xf32> to vector<1x8xf32>
    %6 = vector.broadcast %5 : vector<1x8xf32> to vector<8x8xf32>
    %c0_5 = arith.constant 0 : index
    %c0_6 = arith.constant 0 : index
    %c0_7 = arith.constant 0 : index
    %7 = vector.load %arg3[%c0_5, %c0_6, %c0_7] : memref<4x32x8xbf16, #tpu.memory_space<vmem>>, vector<4x32x8xbf16>
    %c0_8 = arith.constant 0 : index
    %c0_9 = arith.constant 0 : index
    %c0_10 = arith.constant 0 : index
    %8 = vector.load %arg4[%c0_8, %c0_9, %c0_10] : memref<4x1x8xf32, #tpu.memory_space<vmem>>, vector<4x1x8xf32>
    %c0_11 = arith.constant 0 : index
    %c0_12 = arith.constant 0 : index
    %c0_13 = arith.constant 0 : index
    %9 = vector.load %arg5[%c0_11, %c0_12, %c0_13] : memref<4x32x8xbf16, #tpu.memory_space<vmem>>, vector<4x32x8xbf16>
    %c0_14 = arith.constant 0 : index
    %c0_15 = arith.constant 0 : index
    %c0_16 = arith.constant 0 : index
    %10 = vector.load %arg6[%c0_14, %c0_15, %c0_16] : memref<4x1x8xf32, #tpu.memory_space<vmem>>, vector<4x1x8xf32>
    %c0_17 = arith.constant 0 : index
    %c0_18 = arith.constant 0 : index
    %c0_19 = arith.constant 0 : index
    %11 = vector.load %arg7[%c0_17, %c0_18, %c0_19] : memref<4x32x8xbf16, #tpu.memory_space<vmem>>, vector<4x32x8xbf16>
    %c0_20 = arith.constant 0 : index
    %c0_21 = arith.constant 0 : index
    %c0_22 = arith.constant 0 : index
    %12 = vector.load %arg8[%c0_20, %c0_21, %c0_22] : memref<4x1x8xf32, #tpu.memory_space<vmem>>, vector<4x1x8xf32>
    %c0_23 = arith.constant 0 : index
    %c0_24 = arith.constant 0 : index
    %c0_25 = arith.constant 0 : index
    %13 = vector.load %arg9[%c0_23, %c0_24, %c0_25] : memref<4x8x32xbf16, #tpu.memory_space<vmem>>, vector<4x8x32xbf16>
    %14 = arith.truncf %2 : vector<8x32xf32> to vector<8x32xbf16>
    %15 = vector.shape_cast %14 : vector<8x32xbf16> to vector<1x8x32xbf16>
    %16 = vector.broadcast %15 : vector<1x8x32xbf16> to vector<4x8x32xbf16>
    "tpu.trace_start"() <{level = 10 : i32, message = "hle,hed->hld"}> : () -> ()
    %cst = arith.constant dense<0.000000e+00> : vector<4x8x8xf32>
    %17 = tpu.matmul %16, %7, %cst {dimension_numbers = #tpu.dot_dimension_numbers<[2], [1], [1], [2], [0, 0, 0, 1, 1, 2], [0], [0]>} : vector<4x8x32xbf16>, vector<4x32x8xbf16>, vector<4x8x8xf32> -> vector<4x8x8xf32>
    "tpu.trace_stop"() : () -> ()
    %18 = vector.broadcast %8 : vector<4x1x8xf32> to vector<4x8x8xf32>
    %19 = arith.addf %17, %18 : vector<4x8x8xf32>
    "tpu.trace_start"() <{level = 10 : i32, message = "hle,hed->hld"}> : () -> ()
    %cst_26 = arith.constant dense<0.000000e+00> : vector<4x8x8xf32>
    %20 = tpu.matmul %16, %9, %cst_26 {dimension_numbers = #tpu.dot_dimension_numbers<[2], [1], [1], [2], [0, 0, 0, 1, 1, 2], [0], [0]>} : vector<4x8x32xbf16>, vector<4x32x8xbf16>, vector<4x8x8xf32> -> vector<4x8x8xf32>
    "tpu.trace_stop"() : () -> ()
    %21 = vector.broadcast %10 : vector<4x1x8xf32> to vector<4x8x8xf32>
    %22 = arith.addf %20, %21 : vector<4x8x8xf32>
    "tpu.trace_start"() <{level = 10 : i32, message = "hle,hed->hld"}> : () -> ()
    %cst_27 = arith.constant dense<0.000000e+00> : vector<4x8x8xf32>
    %23 = tpu.matmul %16, %11, %cst_27 {dimension_numbers = #tpu.dot_dimension_numbers<[2], [1], [1], [2], [0, 0, 0, 1, 1, 2], [0], [0]>} : vector<4x8x32xbf16>, vector<4x32x8xbf16>, vector<4x8x8xf32> -> vector<4x8x8xf32>
    "tpu.trace_stop"() : () -> ()
    %24 = vector.broadcast %12 : vector<4x1x8xf32> to vector<4x8x8xf32>
    %25 = arith.addf %23, %24 : vector<4x8x8xf32>
    %26 = arith.truncf %19 : vector<4x8x8xf32> to vector<4x8x8xbf16>
    %27 = arith.truncf %22 : vector<4x8x8xf32> to vector<4x8x8xbf16>
    "tpu.trace_start"() <{level = 10 : i32, message = "hqd,hkd->hqk"}> : () -> ()
    %cst_28 = arith.constant dense<0.000000e+00> : vector<4x8x8xf32>
    %28 = tpu.matmul %26, %27, %cst_28 {dimension_numbers = #tpu.dot_dimension_numbers<[2], [2], [1], [1], [0, 0, 0, 1, 1, 1], [0], [0]>} : vector<4x8x8xbf16>, vector<4x8x8xbf16>, vector<4x8x8xf32> -> vector<4x8x8xf32>
    "tpu.trace_stop"() : () -> ()
    %cst_29 = arith.constant 0.353553385 : f32
    %29 = vector.broadcast %cst_29 : f32 to vector<4x8x8xf32>
    %30 = arith.mulf %28, %29 : vector<4x8x8xf32>
    %31 = vector.shape_cast %6 : vector<8x8xf32> to vector<1x8x8xf32>
    %32 = vector.broadcast %31 : vector<1x8x8xf32> to vector<4x8x8xf32>
    %33 = arith.addf %30, %32 : vector<4x8x8xf32>
    %cst_30 = arith.constant dense<0xFF800000> : vector<4x8xf32>
    %34 = vector.multi_reduction <maximumf>, %33, %cst_30 [2] : vector<4x8x8xf32> to vector<4x8xf32>
    %35 = vector.shape_cast %34 : vector<4x8xf32> to vector<4x8x1xf32>
    %36 = vector.broadcast %35 : vector<4x8x1xf32> to vector<4x8x8xf32>
    %37 = arith.subf %33, %36 : vector<4x8x8xf32>
    %38 = math.exp %37 : vector<4x8x8xf32>
    %cst_31 = arith.constant dense<0.000000e+00> : vector<4x8xf32>
    %39 = vector.multi_reduction <add>, %38, %cst_31 [2] : vector<4x8x8xf32> to vector<4x8xf32>
    %40 = vector.shape_cast %39 : vector<4x8xf32> to vector<4x8x1xf32>
    %41 = tpu.reciprocal %40 {approx = true} : vector<4x8x1xf32> -> vector<4x8x1xf32>
    %42 = vector.broadcast %41 : vector<4x8x1xf32> to vector<4x8x8xf32>
    %43 = arith.mulf %38, %42 : vector<4x8x8xf32>
    %44 = arith.truncf %43 : vector<4x8x8xf32> to vector<4x8x8xbf16>
    %45 = arith.truncf %25 : vector<4x8x8xf32> to vector<4x8x8xbf16>
    "tpu.trace_start"() <{level = 10 : i32, message = "hqk,hkd->hqd"}> : () -> ()
    %cst_32 = arith.constant dense<0.000000e+00> : vector<4x8x8xf32>
    %46 = tpu.matmul %44, %45, %cst_32 {dimension_numbers = #tpu.dot_dimension_numbers<[2], [1], [1], [2], [0, 0, 0, 1, 1, 2], [0], [0]>} : vector<4x8x8xbf16>, vector<4x8x8xbf16>, vector<4x8x8xf32> -> vector<4x8x8xf32>
    "tpu.trace_stop"() : () -> ()
    %47 = arith.truncf %46 : vector<4x8x8xf32> to vector<4x8x8xbf16>
    "tpu.trace_start"() <{level = 10 : i32, message = "hqd,hde->hqe"}> : () -> ()
    %cst_33 = arith.constant dense<0.000000e+00> : vector<4x8x32xf32>
    %48 = tpu.matmul %47, %13, %cst_33 {dimension_numbers = #tpu.dot_dimension_numbers<[2], [1], [1], [2], [0, 0, 0, 1, 1, 2], [0], [0]>} : vector<4x8x8xbf16>, vector<4x8x32xbf16>, vector<4x8x32xf32> -> vector<4x8x32xf32>
    "tpu.trace_stop"() : () -> ()
    %cst_34 = arith.constant dense<0.000000e+00> : vector<8x32xf32>
    %49 = vector.multi_reduction <add>, %48, %cst_34 [0] : vector<4x8x32xf32> to vector<8x32xf32>
    %c0_35 = arith.constant 0 : index
    %c0_36 = arith.constant 0 : index
    %50 = vector.load %arg10[%c0_35, %c0_36] : memref<1x32xf32, #tpu.memory_space<vmem>>, vector<1x32xf32>
    %51 = vector.broadcast %50 : vector<1x32xf32> to vector<8x32xf32>
    %52 = arith.addf %49, %51 : vector<8x32xf32>
    %53 = arith.addf %2, %52 : vector<8x32xf32>
    %c0_37 = arith.constant 0 : index
    %c0_38 = arith.constant 0 : index
    %54 = vector.load %arg11[%c0_37, %c0_38] : memref<1x32xf32, #tpu.memory_space<vmem>>, vector<1x32xf32>
    %c0_39 = arith.constant 0 : index
    %c0_40 = arith.constant 0 : index
    %55 = vector.load %arg12[%c0_39, %c0_40] : memref<1x32xf32, #tpu.memory_space<vmem>>, vector<1x32xf32>
    %cst_41 = arith.constant dense<0.000000e+00> : vector<8xf32>
    %56 = vector.multi_reduction <add>, %53, %cst_41 [1] : vector<8x32xf32> to vector<8xf32>
    %57 = vector.shape_cast %56 : vector<8xf32> to vector<8x1xf32>
    %cst_42 = arith.constant 3.200000e+01 : f32
    %58 = vector.broadcast %cst_42 : f32 to vector<8x1xf32>
    %59 = arith.divf %57, %58 : vector<8x1xf32>
    %60 = vector.broadcast %59 : vector<8x1xf32> to vector<8x32xf32>
    %61 = arith.subf %53, %60 : vector<8x32xf32>
    %62 = arith.mulf %61, %61 : vector<8x32xf32>
    %cst_43 = arith.constant dense<0.000000e+00> : vector<8xf32>
    %63 = vector.multi_reduction <add>, %62, %cst_43 [1] : vector<8x32xf32> to vector<8xf32>
    %64 = vector.shape_cast %63 : vector<8xf32> to vector<8x1xf32>
    %cst_44 = arith.constant 3.200000e+01 : f32
    %65 = vector.broadcast %cst_44 : f32 to vector<8x1xf32>
    %66 = arith.divf %64, %65 : vector<8x1xf32>
    %67 = vector.broadcast %59 : vector<8x1xf32> to vector<8x32xf32>
    %68 = arith.subf %53, %67 : vector<8x32xf32>
    %cst_45 = arith.constant 9.99999974E-6 : f32
    %69 = vector.broadcast %cst_45 : f32 to vector<8x1xf32>
    %70 = arith.addf %66, %69 : vector<8x1xf32>
    %71 = math.rsqrt %70 : vector<8x1xf32>
    %72 = vector.broadcast %71 : vector<8x1xf32> to vector<8x32xf32>
    %73 = arith.mulf %68, %72 : vector<8x32xf32>
    %74 = vector.broadcast %54 : vector<1x32xf32> to vector<8x32xf32>
    %75 = arith.mulf %73, %74 : vector<8x32xf32>
    %76 = vector.broadcast %55 : vector<1x32xf32> to vector<8x32xf32>
    %77 = arith.addf %75, %76 : vector<8x32xf32>
    %c0_46 = arith.constant 0 : index
    %c0_47 = arith.constant 0 : index
    %78 = vector.load %arg13[%c0_46, %c0_47] : memref<32x64xbf16, #tpu.memory_space<vmem>>, vector<32x64xbf16>
    %c0_48 = arith.constant 0 : index
    %c0_49 = arith.constant 0 : index
    %79 = vector.load %arg14[%c0_48, %c0_49] : memref<1x64xf32, #tpu.memory_space<vmem>>, vector<1x64xf32>
    %c0_50 = arith.constant 0 : index
    %c0_51 = arith.constant 0 : index
    %80 = vector.load %arg15[%c0_50, %c0_51] : memref<64x32xbf16, #tpu.memory_space<vmem>>, vector<64x32xbf16>
    %c0_52 = arith.constant 0 : index
    %c0_53 = arith.constant 0 : index
    %81 = vector.load %arg16[%c0_52, %c0_53] : memref<1x32xf32, #tpu.memory_space<vmem>>, vector<1x32xf32>
    %82 = arith.truncf %77 : vector<8x32xf32> to vector<8x32xbf16>
    %cst_54 = arith.constant dense<0.000000e+00> : vector<8x64xf32>
    %83 = tpu.matmul %82, %78, %cst_54 {dimension_numbers = #tpu.dot_dimension_numbers<[1], [0], [0], [1], [0, 0, 1, 1], [], []>} : vector<8x32xbf16>, vector<32x64xbf16>, vector<8x64xf32> -> vector<8x64xf32>
    %84 = vector.broadcast %79 : vector<1x64xf32> to vector<8x64xf32>
    %85 = arith.addf %83, %84 : vector<8x64xf32>
    %cst_55 = arith.constant 0.000000e+00 : f32
    %86 = vector.broadcast %cst_55 : f32 to vector<8x64xf32>
    %87 = arith.maximumf %85, %86 : vector<8x64xf32>
    %88 = arith.truncf %87 : vector<8x64xf32> to vector<8x64xbf16>
    %cst_56 = arith.constant dense<0.000000e+00> : vector<8x32xf32>
    %89 = tpu.matmul %88, %80, %cst_56 {dimension_numbers = #tpu.dot_dimension_numbers<[1], [0], [0], [1], [0, 0, 1, 1], [], []>} : vector<8x64xbf16>, vector<64x32xbf16>, vector<8x32xf32> -> vector<8x32xf32>
    %90 = vector.broadcast %81 : vector<1x32xf32> to vector<8x32xf32>
    %91 = arith.addf %89, %90 : vector<8x32xf32>
    %92 = arith.addf %77, %91 : vector<8x32xf32>
    %c0_57 = arith.constant 0 : index
    %c0_58 = arith.constant 0 : index
    %93 = vector.load %arg17[%c0_57, %c0_58] : memref<1x32xf32, #tpu.memory_space<vmem>>, vector<1x32xf32>
    %c0_59 = arith.constant 0 : index
    %c0_60 = arith.constant 0 : index
    %94 = vector.load %arg18[%c0_59, %c0_60] : memref<1x32xf32, #tpu.memory_space<vmem>>, vector<1x32xf32>
    %cst_61 = arith.constant dense<0.000000e+00> : vector<8xf32>
    %95 = vector.multi_reduction <add>, %92, %cst_61 [1] : vector<8x32xf32> to vector<8xf32>
    %96 = vector.shape_cast %95 : vector<8xf32> to vector<8x1xf32>
    %cst_62 = arith.constant 3.200000e+01 : f32
    %97 = vector.broadcast %cst_62 : f32 to vector<8x1xf32>
    %98 = arith.divf %96, %97 : vector<8x1xf32>
    %99 = vector.broadcast %98 : vector<8x1xf32> to vector<8x32xf32>
    %100 = arith.subf %92, %99 : vector<8x32xf32>
    %101 = arith.mulf %100, %100 : vector<8x32xf32>
    %cst_63 = arith.constant dense<0.000000e+00> : vector<8xf32>
    %102 = vector.multi_reduction <add>, %101, %cst_63 [1] : vector<8x32xf32> to vector<8xf32>
    %103 = vector.shape_cast %102 : vector<8xf32> to vector<8x1xf32>
    %cst_64 = arith.constant 3.200000e+01 : f32
    %104 = vector.broadcast %cst_64 : f32 to vector<8x1xf32>
    %105 = arith.divf %103, %104 : vector<8x1xf32>
    %106 = vector.broadcast %98 : vector<8x1xf32> to vector<8x32xf32>
    %107 = arith.subf %92, %106 : vector<8x32xf32>
    %cst_65 = arith.constant 9.99999974E-6 : f32
    %108 = vector.broadcast %cst_65 : f32 to vector<8x1xf32>
    %109 = arith.addf %105, %108 : vector<8x1xf32>
    %110 = math.rsqrt %109 : vector<8x1xf32>
    %111 = vector.broadcast %110 : vector<8x1xf32> to vector<8x32xf32>
    %112 = arith.mulf %107, %111 : vector<8x32xf32>
    %113 = vector.broadcast %93 : vector<1x32xf32> to vector<8x32xf32>
    %114 = arith.mulf %112, %113 : vector<8x32xf32>
    %115 = vector.broadcast %94 : vector<1x32xf32> to vector<8x32xf32>
    %116 = arith.addf %114, %115 : vector<8x32xf32>
    %c0_66 = arith.constant 0 : index
    %c0_67 = arith.constant 0 : index
    %117 = vector.load %arg19[%c0_66, %c0_67] : memref<1x32xf32, #tpu.memory_space<vmem>>, vector<1x32xf32>
    %c0_68 = arith.constant 0 : index
    %c0_69 = arith.constant 0 : index
    %118 = vector.load %arg20[%c0_68, %c0_69] : memref<1x32xf32, #tpu.memory_space<vmem>>, vector<1x32xf32>
    %cst_70 = arith.constant dense<0.000000e+00> : vector<8xf32>
    %119 = vector.multi_reduction <add>, %116, %cst_70 [1] : vector<8x32xf32> to vector<8xf32>
    %120 = vector.shape_cast %119 : vector<8xf32> to vector<8x1xf32>
    %cst_71 = arith.constant 3.200000e+01 : f32
    %121 = vector.broadcast %cst_71 : f32 to vector<8x1xf32>
    %122 = arith.divf %120, %121 : vector<8x1xf32>
    %123 = vector.broadcast %122 : vector<8x1xf32> to vector<8x32xf32>
    %124 = arith.subf %116, %123 : vector<8x32xf32>
    %125 = arith.mulf %124, %124 : vector<8x32xf32>
    %cst_72 = arith.constant dense<0.000000e+00> : vector<8xf32>
    %126 = vector.multi_reduction <add>, %125, %cst_72 [1] : vector<8x32xf32> to vector<8xf32>
    %127 = vector.shape_cast %126 : vector<8xf32> to vector<8x1xf32>
    %cst_73 = arith.constant 3.200000e+01 : f32
    %128 = vector.broadcast %cst_73 : f32 to vector<8x1xf32>
    %129 = arith.divf %127, %128 : vector<8x1xf32>
    %130 = vector.broadcast %122 : vector<8x1xf32> to vector<8x32xf32>
    %131 = arith.subf %116, %130 : vector<8x32xf32>
    %cst_74 = arith.constant 9.99999974E-6 : f32
    %132 = vector.broadcast %cst_74 : f32 to vector<8x1xf32>
    %133 = arith.addf %129, %132 : vector<8x1xf32>
    %134 = math.rsqrt %133 : vector<8x1xf32>
    %135 = vector.broadcast %134 : vector<8x1xf32> to vector<8x32xf32>
    %136 = arith.mulf %131, %135 : vector<8x32xf32>
    %137 = vector.broadcast %117 : vector<1x32xf32> to vector<8x32xf32>
    %138 = arith.mulf %136, %137 : vector<8x32xf32>
    %139 = vector.broadcast %118 : vector<1x32xf32> to vector<8x32xf32>
    %140 = arith.addf %138, %139 : vector<8x32xf32>
    %141 = arith.truncf %140 : vector<8x32xf32> to vector<8x32xbf16>
    %c0_75 = arith.constant 0 : index
    %c0_76 = arith.constant 0 : index
    %c0_77 = arith.constant 0 : index
    %142 = vector.load %arg21[%c0_75, %c0_76, %c0_77] : memref<1x8x32xbf16, #tpu.memory_space<vmem>>, vector<1x8x32xbf16>
    %143 = vector.shape_cast %142 : vector<1x8x32xbf16> to vector<8x32xbf16>
    %144 = vector.shape_cast %141 : vector<8x32xbf16> to vector<1x8x32xbf16>
    tpu.vector_store %arg21[%c0_75, %c0_76, %c0_77], %144 {strides = array<i32>} : memref<1x8x32xbf16, #tpu.memory_space<vmem>>, vector<1x8x32xbf16>,
    return
  }
  func.func @transform_0(%arg0: i32) -> (i32, i32, i32) {
    %c0_i32 = arith.constant 0 : i32
    %c0_i32_0 = arith.constant 0 : i32
    %c0_i32_1 = arith.constant 0 : i32
    return %arg0, %c0_i32, %c0_i32_0 : i32, i32, i32
  }
  func.func @transform_1(%arg0: i32) -> (i32, i32, i32) {
    %c0_i32 = arith.constant 0 : i32
    %c0_i32_0 = arith.constant 0 : i32
    %c0_i32_1 = arith.constant 0 : i32
    return %arg0, %c0_i32, %c0_i32_0 : i32, i32, i32
  }
  func.func @transform_2(%arg0: i32) -> (i32, i32, i32) {
    %c0_i32 = arith.constant 0 : i32
    %c0_i32_0 = arith.constant 0 : i32
    %c0_i32_1 = arith.constant 0 : i32
    %c0_i32_2 = arith.constant 0 : i32
    return %c0_i32, %c0_i32_0, %c0_i32_1 : i32, i32, i32
  }
  func.func @transform_3(%arg0: i32) -> (i32, i32, i32) {
    %c0_i32 = arith.constant 0 : i32
    %c0_i32_0 = arith.constant 0 : i32
    %c0_i32_1 = arith.constant 0 : i32
    %c0_i32_2 = arith.constant 0 : i32
    return %c0_i32, %c0_i32_0, %c0_i32_1 : i32, i32, i32
  }
  func.func @transform_4(%arg0: i32) -> (i32, i32, i32) {
    %c0_i32 = arith.constant 0 : i32
    %c0_i32_0 = arith.constant 0 : i32
    %c0_i32_1 = arith.constant 0 : i32
    %c0_i32_2 = arith.constant 0 : i32
    return %c0_i32, %c0_i32_0, %c0_i32_1 : i32, i32, i32
  }
  func.func @transform_5(%arg0: i32) -> (i32, i32, i32) {
    %c0_i32 = arith.constant 0 : i32
    %c0_i32_0 = arith.constant 0 : i32
    %c0_i32_1 = arith.constant 0 : i32
    %c0_i32_2 = arith.constant 0 : i32
    return %c0_i32, %c0_i32_0, %c0_i32_1 : i32, i32, i32
  }
  func.func @transform_6(%arg0: i32) -> (i32, i32, i32) {
    %c0_i32 = arith.constant 0 : i32
    %c0_i32_0 = arith.constant 0 : i32
    %c0_i32_1 = arith.constant 0 : i32
    %c0_i32_2 = arith.constant 0 : i32
    return %c0_i32, %c0_i32_0, %c0_i32_1 : i32, i32, i32
  }
  func.func @transform_7(%arg0: i32) -> (i32, i32, i32) {
    %c0_i32 = arith.constant 0 : i32
    %c0_i32_0 = arith.constant 0 : i32
    %c0_i32_1 = arith.constant 0 : i32
    %c0_i32_2 = arith.constant 0 : i32
    return %c0_i32, %c0_i32_0, %c0_i32_1 : i32, i32, i32
  }
  func.func @transform_8(%arg0: i32) -> (i32, i32, i32) {
    %c0_i32 = arith.constant 0 : i32
    %c0_i32_0 = arith.constant 0 : i32
    %c0_i32_1 = arith.constant 0 : i32
    %c0_i32_2 = arith.constant 0 : i32
    return %c0_i32, %c0_i32_0, %c0_i32_1 : i32, i32, i32
  }
  func.func @transform_9(%arg0: i32) -> (i32, i32) {
    %c0_i32 = arith.constant 0 : i32
    %c0_i32_0 = arith.constant 0 : i32
    %c0_i32_1 = arith.constant 0 : i32
    return %c0_i32, %c0_i32_0 : i32, i32
  }
  func.func @transform_10(%arg0: i32) -> (i32, i32) {
    %c0_i32 = arith.constant 0 : i32
    %c0_i32_0 = arith.constant 0 : i32
    %c0_i32_1 = arith.constant 0 : i32
    return %c0_i32, %c0_i32_0 : i32, i32
  }
  func.func @transform_11(%arg0: i32) -> (i32, i32) {
    %c0_i32 = arith.constant 0 : i32
    %c0_i32_0 = arith.constant 0 : i32
    %c0_i32_1 = arith.constant 0 : i32
    return %c0_i32, %c0_i32_0 : i32, i32
  }
  func.func @transform_12(%arg0: i32) -> (i32, i32) {
    %c0_i32 = arith.constant 0 : i32
    %c0_i32_0 = arith.constant 0 : i32
    %c0_i32_1 = arith.constant 0 : i32
    return %c0_i32, %c0_i32_0 : i32, i32
  }
  func.func @transform_13(%arg0: i32) -> (i32, i32) {
    %c0_i32 = arith.constant 0 : i32
    %c0_i32_0 = arith.constant 0 : i32
    %c0_i32_1 = arith.constant 0 : i32
    return %c0_i32, %c0_i32_0 : i32, i32
  }
  func.func @transform_14(%arg0: i32) -> (i32, i32) {
    %c0_i32 = arith.constant 0 : i32
    %c0_i32_0 = arith.constant 0 : i32
    %c0_i32_1 = arith.constant 0 : i32
    return %c0_i32, %c0_i32_0 : i32, i32
  }
  func.func @transform_15(%arg0: i32) -> (i32, i32) {
    %c0_i32 = arith.constant 0 : i32
    %c0_i32_0 = arith.constant 0 : i32
    %c0_i32_1 = arith.constant 0 : i32
    return %c0_i32, %c0_i32_0 : i32, i32
  }
  func.func @transform_16(%arg0: i32) -> (i32, i32) {
    %c0_i32 = arith.constant 0 : i32
    %c0_i32_0 = arith.constant 0 : i32
    %c0_i32_1 = arith.constant 0 : i32
    return %c0_i32, %c0_i32_0 : i32, i32
  }
  func.func @transform_17(%arg0: i32) -> (i32, i32) {
    %c0_i32 = arith.constant 0 : i32
    %c0_i32_0 = arith.constant 0 : i32
    %c0_i32_1 = arith.constant 0 : i32
    return %c0_i32, %c0_i32_0 : i32, i32
  }
  func.func @transform_18(%arg0: i32) -> (i32, i32) {
    %c0_i32 = arith.constant 0 : i32
    %c0_i32_0 = arith.constant 0 : i32
    %c0_i32_1 = arith.constant 0 : i32
    return %c0_i32, %c0_i32_0 : i32, i32
  }
  func.func @transform_19(%arg0: i32) -> (i32, i32) {
    %c0_i32 = arith.constant 0 : i32
    %c0_i32_0 = arith.constant 0 : i32
    %c0_i32_1 = arith.constant 0 : i32
    return %c0_i32, %c0_i32_0 : i32, i32
  }
  func.func @transform_20(%arg0: i32) -> (i32, i32, i32) {
    %c0_i32 = arith.constant 0 : i32
    %c0_i32_0 = arith.constant 0 : i32
    %c0_i32_1 = arith.constant 0 : i32
    return %arg0, %c0_i32, %c0_i32_0 : i32, i32, i32
  }
}

module attributes {stable_mosaic.version = 11 : i64} {
  func.func @_ln_generator_kernel(%arg0: memref<2x6x32xbf16, #tpu.memory_space<vmem>>, %arg1: memref<1x32xf32, #tpu.memory_space<vmem>>, %arg2: memref<1x32xf32, #tpu.memory_space<vmem>>, %arg3: memref<32x128xbf16, #tpu.memory_space<vmem>>, %arg4: memref<1x128xf32, #tpu.memory_space<vmem>>, %arg5: memref<6x2x128xf32, #tpu.memory_space<vmem>>) attributes {dimension_semantics = [], scalar_prefetch = 0 : i64, scratch_operands = 0 : i64, tpu.core_type = #tpu.core_type<tc>} {
    %c0 = arith.constant 0 : index
    %c0_0 = arith.constant 0 : index
    %c0_1 = arith.constant 0 : index
    %0 = vector.load %arg0[%c0, %c0_0, %c0_1] : memref<2x6x32xbf16, #tpu.memory_space<vmem>>, vector<1x6x32xbf16>
    %1 = vector.shape_cast %0 : vector<1x6x32xbf16> to vector<6x32xbf16>
    %2 = arith.extf %1 : vector<6x32xbf16> to vector<6x32xf32>
    %c0_2 = arith.constant 0 : index
    %c0_3 = arith.constant 0 : index
    %3 = vector.load %arg1[%c0_2, %c0_3] : memref<1x32xf32, #tpu.memory_space<vmem>>, vector<1x32xf32>
    %c0_4 = arith.constant 0 : index
    %c0_5 = arith.constant 0 : index
    %4 = vector.load %arg2[%c0_4, %c0_5] : memref<1x32xf32, #tpu.memory_space<vmem>>, vector<1x32xf32>
    %cst = arith.constant dense<0.000000e+00> : vector<6xf32>
    %5 = vector.multi_reduction <add>, %2, %cst [1] : vector<6x32xf32> to vector<6xf32>
    %6 = vector.shape_cast %5 : vector<6xf32> to vector<6x1xf32>
    %cst_6 = arith.constant 3.200000e+01 : f32
    %7 = vector.broadcast %cst_6 : f32 to vector<6x1xf32>
    %8 = arith.divf %6, %7 : vector<6x1xf32>
    %9 = vector.broadcast %8 : vector<6x1xf32> to vector<6x32xf32>
    %10 = arith.subf %2, %9 : vector<6x32xf32>
    %11 = arith.mulf %10, %10 : vector<6x32xf32>
    %cst_7 = arith.constant dense<0.000000e+00> : vector<6xf32>
    %12 = vector.multi_reduction <add>, %11, %cst_7 [1] : vector<6x32xf32> to vector<6xf32>
    %13 = vector.shape_cast %12 : vector<6xf32> to vector<6x1xf32>
    %cst_8 = arith.constant 3.200000e+01 : f32
    %14 = vector.broadcast %cst_8 : f32 to vector<6x1xf32>
    %15 = arith.divf %13, %14 : vector<6x1xf32>
    %16 = vector.broadcast %8 : vector<6x1xf32> to vector<6x32xf32>
    %17 = arith.subf %2, %16 : vector<6x32xf32>
    %cst_9 = arith.constant 9.99999974E-6 : f32
    %18 = vector.broadcast %cst_9 : f32 to vector<6x1xf32>
    %19 = arith.addf %15, %18 : vector<6x1xf32>
    %20 = math.rsqrt %19 : vector<6x1xf32>
    %21 = vector.broadcast %20 : vector<6x1xf32> to vector<6x32xf32>
    %22 = arith.mulf %17, %21 : vector<6x32xf32>
    %23 = vector.broadcast %3 : vector<1x32xf32> to vector<6x32xf32>
    %24 = arith.mulf %22, %23 : vector<6x32xf32>
    %25 = vector.broadcast %4 : vector<1x32xf32> to vector<6x32xf32>
    %26 = arith.addf %24, %25 : vector<6x32xf32>
    %27 = arith.truncf %26 : vector<6x32xf32> to vector<6x32xbf16>
    %c0_10 = arith.constant 0 : index
    %c0_11 = arith.constant 0 : index
    %28 = vector.load %arg3[%c0_10, %c0_11] : memref<32x128xbf16, #tpu.memory_space<vmem>>, vector<32x128xbf16>
    %cst_12 = arith.constant dense<0.000000e+00> : vector<6x128xf32>
    %29 = tpu.matmul %27, %28, %cst_12 {dimension_numbers = #tpu.dot_dimension_numbers<[1], [0], [0], [1], [0, 0, 1, 1], [], []>} : vector<6x32xbf16>, vector<32x128xbf16>, vector<6x128xf32> -> vector<6x128xf32>
    %c0_13 = arith.constant 0 : index
    %c0_14 = arith.constant 0 : index
    %30 = vector.load %arg4[%c0_13, %c0_14] : memref<1x128xf32, #tpu.memory_space<vmem>>, vector<1x128xf32>
    %31 = vector.broadcast %30 : vector<1x128xf32> to vector<6x128xf32>
    %32 = arith.addf %29, %31 : vector<6x128xf32>
    %c0_15 = arith.constant 0 : index
    %c0_16 = arith.constant 0 : index
    %c0_17 = arith.constant 0 : index
    %33 = vector.load %arg5[%c0_15, %c0_16, %c0_17] : memref<6x2x128xf32, #tpu.memory_space<vmem>>, vector<6x1x128xf32>
    %34 = vector.shape_cast %33 : vector<6x1x128xf32> to vector<6x128xf32>
    %35 = vector.shape_cast %32 : vector<6x128xf32> to vector<6x1x128xf32>
    tpu.vector_store %arg5[%c0_15, %c0_16, %c0_17], %35 {strides = array<i32>} : memref<6x2x128xf32, #tpu.memory_space<vmem>>, vector<6x1x128xf32>,
    %c1 = arith.constant 1 : index
    %c0_18 = arith.constant 0 : index
    %c0_19 = arith.constant 0 : index
    %36 = vector.load %arg0[%c1, %c0_18, %c0_19] : memref<2x6x32xbf16, #tpu.memory_space<vmem>>, vector<1x6x32xbf16>
    %37 = vector.shape_cast %36 : vector<1x6x32xbf16> to vector<6x32xbf16>
    %38 = arith.extf %37 : vector<6x32xbf16> to vector<6x32xf32>
    %c0_20 = arith.constant 0 : index
    %c0_21 = arith.constant 0 : index
    %39 = vector.load %arg1[%c0_20, %c0_21] : memref<1x32xf32, #tpu.memory_space<vmem>>, vector<1x32xf32>
    %c0_22 = arith.constant 0 : index
    %c0_23 = arith.constant 0 : index
    %40 = vector.load %arg2[%c0_22, %c0_23] : memref<1x32xf32, #tpu.memory_space<vmem>>, vector<1x32xf32>
    %cst_24 = arith.constant dense<0.000000e+00> : vector<6xf32>
    %41 = vector.multi_reduction <add>, %38, %cst_24 [1] : vector<6x32xf32> to vector<6xf32>
    %42 = vector.shape_cast %41 : vector<6xf32> to vector<6x1xf32>
    %cst_25 = arith.constant 3.200000e+01 : f32
    %43 = vector.broadcast %cst_25 : f32 to vector<6x1xf32>
    %44 = arith.divf %42, %43 : vector<6x1xf32>
    %45 = vector.broadcast %44 : vector<6x1xf32> to vector<6x32xf32>
    %46 = arith.subf %38, %45 : vector<6x32xf32>
    %47 = arith.mulf %46, %46 : vector<6x32xf32>
    %cst_26 = arith.constant dense<0.000000e+00> : vector<6xf32>
    %48 = vector.multi_reduction <add>, %47, %cst_26 [1] : vector<6x32xf32> to vector<6xf32>
    %49 = vector.shape_cast %48 : vector<6xf32> to vector<6x1xf32>
    %cst_27 = arith.constant 3.200000e+01 : f32
    %50 = vector.broadcast %cst_27 : f32 to vector<6x1xf32>
    %51 = arith.divf %49, %50 : vector<6x1xf32>
    %52 = vector.broadcast %44 : vector<6x1xf32> to vector<6x32xf32>
    %53 = arith.subf %38, %52 : vector<6x32xf32>
    %cst_28 = arith.constant 9.99999974E-6 : f32
    %54 = vector.broadcast %cst_28 : f32 to vector<6x1xf32>
    %55 = arith.addf %51, %54 : vector<6x1xf32>
    %56 = math.rsqrt %55 : vector<6x1xf32>
    %57 = vector.broadcast %56 : vector<6x1xf32> to vector<6x32xf32>
    %58 = arith.mulf %53, %57 : vector<6x32xf32>
    %59 = vector.broadcast %39 : vector<1x32xf32> to vector<6x32xf32>
    %60 = arith.mulf %58, %59 : vector<6x32xf32>
    %61 = vector.broadcast %40 : vector<1x32xf32> to vector<6x32xf32>
    %62 = arith.addf %60, %61 : vector<6x32xf32>
    %63 = arith.truncf %62 : vector<6x32xf32> to vector<6x32xbf16>
    %c0_29 = arith.constant 0 : index
    %c0_30 = arith.constant 0 : index
    %64 = vector.load %arg3[%c0_29, %c0_30] : memref<32x128xbf16, #tpu.memory_space<vmem>>, vector<32x128xbf16>
    %cst_31 = arith.constant dense<0.000000e+00> : vector<6x128xf32>
    %65 = tpu.matmul %63, %64, %cst_31 {dimension_numbers = #tpu.dot_dimension_numbers<[1], [0], [0], [1], [0, 0, 1, 1], [], []>} : vector<6x32xbf16>, vector<32x128xbf16>, vector<6x128xf32> -> vector<6x128xf32>
    %c0_32 = arith.constant 0 : index
    %c0_33 = arith.constant 0 : index
    %66 = vector.load %arg4[%c0_32, %c0_33] : memref<1x128xf32, #tpu.memory_space<vmem>>, vector<1x128xf32>
    %67 = vector.broadcast %66 : vector<1x128xf32> to vector<6x128xf32>
    %68 = arith.addf %65, %67 : vector<6x128xf32>
    %c0_34 = arith.constant 0 : index
    %c1_35 = arith.constant 1 : index
    %c0_36 = arith.constant 0 : index
    %69 = vector.load %arg5[%c0_34, %c1_35, %c0_36] : memref<6x2x128xf32, #tpu.memory_space<vmem>>, vector<6x1x128xf32>
    %70 = vector.shape_cast %69 : vector<6x1x128xf32> to vector<6x128xf32>
    %71 = vector.shape_cast %68 : vector<6x128xf32> to vector<6x1x128xf32>
    tpu.vector_store %arg5[%c0_34, %c1_35, %c0_36], %71 {strides = array<i32>} : memref<6x2x128xf32, #tpu.memory_space<vmem>>, vector<6x1x128xf32>,
    return
  }
}

module attributes {stable_mosaic.version = 11 : i64} {
  func.func @_decoder_layer_kernel(%arg0: i32, %arg1: memref<1x6x32xbf16, #tpu.memory_space<vmem>>, %arg2: memref<1x8x32xbf16, #tpu.memory_space<vmem>>, %arg3: memref<1x1x6xf32, #tpu.memory_space<vmem>>, %arg4: memref<1x1x8xf32, #tpu.memory_space<vmem>>, %arg5: memref<4x32x8xbf16, #tpu.memory_space<vmem>>, %arg6: memref<4x1x8xf32, #tpu.memory_space<vmem>>, %arg7: memref<4x32x8xbf16, #tpu.memory_space<vmem>>, %arg8: memref<4x1x8xf32, #tpu.memory_space<vmem>>, %arg9: memref<4x32x8xbf16, #tpu.memory_space<vmem>>, %arg10: memref<4x1x8xf32, #tpu.memory_space<vmem>>, %arg11: memref<4x8x32xbf16, #tpu.memory_space<vmem>>, %arg12: memref<1x32xf32, #tpu.memory_space<vmem>>, %arg13: memref<1x32xf32, #tpu.memory_space<vmem>>, %arg14: memref<1x32xf32, #tpu.memory_space<vmem>>, %arg15: memref<4x32x8xbf16, #tpu.memory_space<vmem>>, %arg16: memref<4x1x8xf32, #tpu.memory_space<vmem>>, %arg17: memref<4x32x8xbf16, #tpu.memory_space<vmem>>, %arg18: memref<4x1x8xf32, #tpu.memory_space<vmem>>, %arg19: memref<4x32x8xbf16, #tpu.memory_space<vmem>>, %arg20: memref<4x1x8xf32, #tpu.memory_space<vmem>>, %arg21: memref<4x8x32xbf16, #tpu.memory_space<vmem>>, %arg22: memref<1x32xf32, #tpu.memory_space<vmem>>, %arg23: memref<1x32xf32, #tpu.memory_space<vmem>>, %arg24: memref<1x32xf32, #tpu.memory_space<vmem>>, %arg25: memref<32x64xbf16, #tpu.memory_space<vmem>>, %arg26: memref<1x64xf32, #tpu.memory_space<vmem>>, %arg27: memref<64x32xbf16, #tpu.memory_space<vmem>>, %arg28: memref<1x32xf32, #tpu.memory_space<vmem>>, %arg29: memref<1x32xf32, #tpu.memory_space<vmem>>, %arg30: memref<1x32xf32, #tpu.memory_space<vmem>>, %arg31: memref<1x6x32xbf16, #tpu.memory_space<vmem>>) attributes {dimension_semantics = [#tpu.dimension_semantics<parallel>], iteration_bounds = array<i64: 2>, scalar_prefetch = 0 : i64, scratch_operands = 0 : i64, tpu.core_type = #tpu.core_type<tc>, window_params = [{transform_indices = @transform_0, window_bounds = array<i64: 1, 6, 32>}, {transform_indices = @transform_1, window_bounds = array<i64: 1, 8, 32>}, {transform_indices = @transform_2, window_bounds = array<i64: 1, 1, 6>}, {transform_indices = @transform_3, window_bounds = array<i64: 1, 1, 8>}, {pipeline_mode = #tpu.pipeline_mode<synchronous>, transform_indices = @transform_4, window_bounds = array<i64: 4, 32, 8>}, {pipeline_mode = #tpu.pipeline_mode<synchronous>, transform_indices = @transform_5, window_bounds = array<i64: 4, 1, 8>}, {pipeline_mode = #tpu.pipeline_mode<synchronous>, transform_indices = @transform_6, window_bounds = array<i64: 4, 32, 8>}, {pipeline_mode = #tpu.pipeline_mode<synchronous>, transform_indices = @transform_7, window_bounds = array<i64: 4, 1, 8>}, {pipeline_mode = #tpu.pipeline_mode<synchronous>, transform_indices = @transform_8, window_bounds = array<i64: 4, 32, 8>}, {pipeline_mode = #tpu.pipeline_mode<synchronous>, transform_indices = @transform_9, window_bounds = array<i64: 4, 1, 8>}, {pipeline_mode = #tpu.pipeline_mode<synchronous>, transform_indices = @transform_10, window_bounds = array<i64: 4, 8, 32>}, {pipeline_mode = #tpu.pipeline_mode<synchronous>, transform_indices = @transform_11, window_bounds = array<i64: 1, 32>}, {pipeline_mode = #tpu.pipeline_mode<synchronous>, transform_indices = @transform_12, window_bounds = array<i64: 1, 32>}, {pipeline_mode = #tpu.pipeline_mode<synchronous>, transform_indices = @transform_13, window_bounds = array<i64: 1, 32>}, {pipeline_mode = #tpu.pipeline_mode<synchronous>, transform_indices = @transform_14, window_bounds = array<i64: 4, 32, 8>}, {pipeline_mode = #tpu.pipeline_mode<synchronous>, transform_indices = @transform_15, window_bounds = array<i64: 4, 1, 8>}, {pipeline_mode = #tpu.pipeline_mode<synchronous>, transform_indices = @transform_16, window_bounds = array<i64: 4, 32, 8>}, {pipeline_mode = #tpu.pipeline_mode<synchronous>, transform_indices = @transform_17, window_bounds = array<i64: 4, 1, 8>}, {pipeline_mode = #tpu.pipeline_mode<synchronous>, transform_indices = @transform_18, window_bounds = array<i64: 4, 32, 8>}, {pipeline_mode = #tpu.pipeline_mode<synchronous>, transform_indices = @transform_19, window_bounds = array<i64: 4, 1, 8>}, {pipeline_mode = #tpu.pipeline_mode<synchronous>, transform_indices = @transform_20, window_bounds = array<i64: 4, 8, 32>}, {pipeline_mode = #tpu.pipeline_mode<synchronous>, transform_indices = @transform_21, window_bounds = array<i64: 1, 32>}, {pipeline_mode = #tpu.pipeline_mode<synchronous>, transform_indices = @transform_22, window_bounds = array<i64: 1, 32>}, {pipeline_mode = #tpu.pipeline_mode<synchronous>, transform_indices = @transform_23, window_bounds = array<i64: 1, 32>}, {pipeline_mode = #tpu.pipeline_mode<synchronous>, transform_indices = @transform_24, window_bounds = array<i64: 32, 64>}, {pipeline_mode = #tpu.pipeline_mode<synchronous>, transform_indices = @transform_25, window_bounds = array<i64: 1, 64>}, {pipeline_mode = #tpu.pipeline_mode<synchronous>, transform_indices = @transform_26, window_bounds = array<i64: 64, 32>}, {pipeline_mode = #tpu.pipeline_mode<synchronous>, transform_indices = @transform_27, window_bounds = array<i64: 1, 32>}, {pipeline_mode = #tpu.pipeline_mode<synchronous>, transform_indices = @transform_28, window_bounds = array<i64: 1, 32>}, {pipeline_mode = #tpu.pipeline_mode<synchronous>, transform_indices = @transform_29, window_bounds = array<i64: 1, 32>}, {transform_indices = @transform_30, window_bounds = array<i64: 1, 6, 32>}]} {
    %c0 = arith.constant 0 : index
    %c0_0 = arith.constant 0 : index
    %c0_1 = arith.constant 0 : index
    %0 = vector.load %arg1[%c0, %c0_0, %c0_1] : memref<1x6x32xbf16, #tpu.memory_space<vmem>>, vector<1x6x32xbf16>
    %1 = vector.shape_cast %0 : vector<1x6x32xbf16> to vector<6x32xbf16>
    %2 = arith.extf %1 : vector<6x32xbf16> to vector<6x32xf32>
    %c0_2 = arith.constant 0 : index
    %c0_3 = arith.constant 0 : index
    %c0_4 = arith.constant 0 : index
    %3 = vector.load %arg2[%c0_2, %c0_3, %c0_4] : memref<1x8x32xbf16, #tpu.memory_space<vmem>>, vector<1x8x32xbf16>
    %4 = vector.shape_cast %3 : vector<1x8x32xbf16> to vector<8x32xbf16>
    %5 = arith.extf %4 : vector<8x32xbf16> to vector<8x32xf32>
    %6 = tpu.iota {dimensions = array<i32: 0>} : vector<6x6xi32>
    %7 = tpu.iota {dimensions = array<i32: 1>} : vector<6x6xi32>
    %8 = arith.cmpi sge, %6, %7 : vector<6x6xi32>
    %cst = arith.constant 0.000000e+00 : f32
    %cst_5 = arith.constant -1.000000e+30 : f32
    %9 = vector.broadcast %cst : f32 to vector<6x6xf32>
    %10 = vector.broadcast %cst_5 : f32 to vector<6x6xf32>
    %11 = arith.select %8, %9, %10 : vector<6x6xi1>, vector<6x6xf32>
    %c0_6 = arith.constant 0 : index
    %c0_7 = arith.constant 0 : index
    %c0_8 = arith.constant 0 : index
    %12 = vector.load %arg3[%c0_6, %c0_7, %c0_8] : memref<1x1x6xf32, #tpu.memory_space<vmem>>, vector<1x1x6xf32>
    %13 = vector.shape_cast %12 : vector<1x1x6xf32> to vector<1x6xf32>
    %14 = vector.shape_cast %13 : vector<1x6xf32> to vector<1x6xf32>
    %15 = vector.broadcast %14 : vector<1x6xf32> to vector<6x6xf32>
    %16 = arith.addf %11, %15 : vector<6x6xf32>
    %c0_9 = arith.constant 0 : index
    %c0_10 = arith.constant 0 : index
    %c0_11 = arith.constant 0 : index
    %17 = vector.load %arg4[%c0_9, %c0_10, %c0_11] : memref<1x1x8xf32, #tpu.memory_space<vmem>>, vector<1x1x8xf32>
    %18 = vector.shape_cast %17 : vector<1x1x8xf32> to vector<1x8xf32>
    %19 = vector.shape_cast %18 : vector<1x8xf32> to vector<1x8xf32>
    %20 = vector.broadcast %19 : vector<1x8xf32> to vector<6x8xf32>
    %c0_12 = arith.constant 0 : index
    %c0_13 = arith.constant 0 : index
    %c0_14 = arith.constant 0 : index
    %21 = vector.load %arg5[%c0_12, %c0_13, %c0_14] : memref<4x32x8xbf16, #tpu.memory_space<vmem>>, vector<4x32x8xbf16>
    %c0_15 = arith.constant 0 : index
    %c0_16 = arith.constant 0 : index
    %c0_17 = arith.constant 0 : index
    %22 = vector.load %arg6[%c0_15, %c0_16, %c0_17] : memref<4x1x8xf32, #tpu.memory_space<vmem>>, vector<4x1x8xf32>
    %c0_18 = arith.constant 0 : index
    %c0_19 = arith.constant 0 : index
    %c0_20 = arith.constant 0 : index
    %23 = vector.load %arg7[%c0_18, %c0_19, %c0_20] : memref<4x32x8xbf16, #tpu.memory_space<vmem>>, vector<4x32x8xbf16>
    %c0_21 = arith.constant 0 : index
    %c0_22 = arith.constant 0 : index
    %c0_23 = arith.constant 0 : index
    %24 = vector.load %arg8[%c0_21, %c0_22, %c0_23] : memref<4x1x8xf32, #tpu.memory_space<vmem>>, vector<4x1x8xf32>
    %c0_24 = arith.constant 0 : index
    %c0_25 = arith.constant 0 : index
    %c0_26 = arith.constant 0 : index
    %25 = vector.load %arg9[%c0_24, %c0_25, %c0_26] : memref<4x32x8xbf16, #tpu.memory_space<vmem>>, vector<4x32x8xbf16>
    %c0_27 = arith.constant 0 : index
    %c0_28 = arith.constant 0 : index
    %c0_29 = arith.constant 0 : index
    %26 = vector.load %arg10[%c0_27, %c0_28, %c0_29] : memref<4x1x8xf32, #tpu.memory_space<vmem>>, vector<4x1x8xf32>
    %c0_30 = arith.constant 0 : index
    %c0_31 = arith.constant 0 : index
    %c0_32 = arith.constant 0 : index
    %27 = vector.load %arg11[%c0_30, %c0_31, %c0_32] : memref<4x8x32xbf16, #tpu.memory_space<vmem>>, vector<4x8x32xbf16>
    %28 = arith.truncf %2 : vector<6x32xf32> to vector<6x32xbf16>
    %29 = vector.shape_cast %28 : vector<6x32xbf16> to vector<1x6x32xbf16>
    %30 = vector.broadcast %29 : vector<1x6x32xbf16> to vector<4x6x32xbf16>
    "tpu.trace_start"() <{level = 10 : i32, message = "hle,hed->hld"}> : () -> ()
    %cst_33 = arith.constant dense<0.000000e+00> : vector<4x6x8xf32>
    %31 = tpu.matmul %30, %21, %cst_33 {dimension_numbers = #tpu.dot_dimension_numbers<[2], [1], [1], [2], [0, 0, 0, 1, 1, 2], [0], [0]>} : vector<4x6x32xbf16>, vector<4x32x8xbf16>, vector<4x6x8xf32> -> vector<4x6x8xf32>
    "tpu.trace_stop"() : () -> ()
    %32 = vector.broadcast %22 : vector<4x1x8xf32> to vector<4x6x8xf32>
    %33 = arith.addf %31, %32 : vector<4x6x8xf32>
    "tpu.trace_start"() <{level = 10 : i32, message = "hle,hed->hld"}> : () -> ()
    %cst_34 = arith.constant dense<0.000000e+00> : vector<4x6x8xf32>
    %34 = tpu.matmul %30, %23, %cst_34 {dimension_numbers = #tpu.dot_dimension_numbers<[2], [1], [1], [2], [0, 0, 0, 1, 1, 2], [0], [0]>} : vector<4x6x32xbf16>, vector<4x32x8xbf16>, vector<4x6x8xf32> -> vector<4x6x8xf32>
    "tpu.trace_stop"() : () -> ()
    %35 = vector.broadcast %24 : vector<4x1x8xf32> to vector<4x6x8xf32>
    %36 = arith.addf %34, %35 : vector<4x6x8xf32>
    "tpu.trace_start"() <{level = 10 : i32, message = "hle,hed->hld"}> : () -> ()
    %cst_35 = arith.constant dense<0.000000e+00> : vector<4x6x8xf32>
    %37 = tpu.matmul %30, %25, %cst_35 {dimension_numbers = #tpu.dot_dimension_numbers<[2], [1], [1], [2], [0, 0, 0, 1, 1, 2], [0], [0]>} : vector<4x6x32xbf16>, vector<4x32x8xbf16>, vector<4x6x8xf32> -> vector<4x6x8xf32>
    "tpu.trace_stop"() : () -> ()
    %38 = vector.broadcast %26 : vector<4x1x8xf32> to vector<4x6x8xf32>
    %39 = arith.addf %37, %38 : vector<4x6x8xf32>
    %40 = arith.truncf %33 : vector<4x6x8xf32> to vector<4x6x8xbf16>
    %41 = arith.truncf %36 : vector<4x6x8xf32> to vector<4x6x8xbf16>
    "tpu.trace_start"() <{level = 10 : i32, message = "hqd,hkd->hqk"}> : () -> ()
    %cst_36 = arith.constant dense<0.000000e+00> : vector<4x6x6xf32>
    %42 = tpu.matmul %40, %41, %cst_36 {dimension_numbers = #tpu.dot_dimension_numbers<[2], [2], [1], [1], [0, 0, 0, 1, 1, 1], [0], [0]>} : vector<4x6x8xbf16>, vector<4x6x8xbf16>, vector<4x6x6xf32> -> vector<4x6x6xf32>
    "tpu.trace_stop"() : () -> ()
    %cst_37 = arith.constant 0.353553385 : f32
    %43 = vector.broadcast %cst_37 : f32 to vector<4x6x6xf32>
    %44 = arith.mulf %42, %43 : vector<4x6x6xf32>
    %45 = vector.shape_cast %16 : vector<6x6xf32> to vector<1x6x6xf32>
    %46 = vector.broadcast %45 : vector<1x6x6xf32> to vector<4x6x6xf32>
    %47 = arith.addf %44, %46 : vector<4x6x6xf32>
    %cst_38 = arith.constant dense<0xFF800000> : vector<4x6xf32>
    %48 = vector.multi_reduction <maximumf>, %47, %cst_38 [2] : vector<4x6x6xf32> to vector<4x6xf32>
    %49 = vector.shape_cast %48 : vector<4x6xf32> to vector<4x6x1xf32>
    %50 = vector.broadcast %49 : vector<4x6x1xf32> to vector<4x6x6xf32>
    %51 = arith.subf %47, %50 : vector<4x6x6xf32>
    %52 = math.exp %51 : vector<4x6x6xf32>
    %cst_39 = arith.constant dense<0.000000e+00> : vector<4x6xf32>
    %53 = vector.multi_reduction <add>, %52, %cst_39 [2] : vector<4x6x6xf32> to vector<4x6xf32>
    %54 = vector.shape_cast %53 : vector<4x6xf32> to vector<4x6x1xf32>
    %55 = tpu.reciprocal %54 {approx = true} : vector<4x6x1xf32> -> vector<4x6x1xf32>
    %56 = vector.broadcast %55 : vector<4x6x1xf32> to vector<4x6x6xf32>
    %57 = arith.mulf %52, %56 : vector<4x6x6xf32>
    %58 = arith.truncf %57 : vector<4x6x6xf32> to vector<4x6x6xbf16>
    %59 = arith.truncf %39 : vector<4x6x8xf32> to vector<4x6x8xbf16>
    "tpu.trace_start"() <{level = 10 : i32, message = "hqk,hkd->hqd"}> : () -> ()
    %cst_40 = arith.constant dense<0.000000e+00> : vector<4x6x8xf32>
    %60 = tpu.matmul %58, %59, %cst_40 {dimension_numbers = #tpu.dot_dimension_numbers<[2], [1], [1], [2], [0, 0, 0, 1, 1, 2], [0], [0]>} : vector<4x6x6xbf16>, vector<4x6x8xbf16>, vector<4x6x8xf32> -> vector<4x6x8xf32>
    "tpu.trace_stop"() : () -> ()
    %61 = arith.truncf %60 : vector<4x6x8xf32> to vector<4x6x8xbf16>
    "tpu.trace_start"() <{level = 10 : i32, message = "hqd,hde->hqe"}> : () -> ()
    %cst_41 = arith.constant dense<0.000000e+00> : vector<4x6x32xf32>
    %62 = tpu.matmul %61, %27, %cst_41 {dimension_numbers = #tpu.dot_dimension_numbers<[2], [1], [1], [2], [0, 0, 0, 1, 1, 2], [0], [0]>} : vector<4x6x8xbf16>, vector<4x8x32xbf16>, vector<4x6x32xf32> -> vector<4x6x32xf32>
    "tpu.trace_stop"() : () -> ()
    %cst_42 = arith.constant dense<0.000000e+00> : vector<6x32xf32>
    %63 = vector.multi_reduction <add>, %62, %cst_42 [0] : vector<4x6x32xf32> to vector<6x32xf32>
    %c0_43 = arith.constant 0 : index
    %c0_44 = arith.constant 0 : index
    %64 = vector.load %arg12[%c0_43, %c0_44] : memref<1x32xf32, #tpu.memory_space<vmem>>, vector<1x32xf32>
    %65 = vector.broadcast %64 : vector<1x32xf32> to vector<6x32xf32>
    %66 = arith.addf %63, %65 : vector<6x32xf32>
    %67 = arith.addf %2, %66 : vector<6x32xf32>
    %c0_45 = arith.constant 0 : index
    %c0_46 = arith.constant 0 : index
    %68 = vector.load %arg13[%c0_45, %c0_46] : memref<1x32xf32, #tpu.memory_space<vmem>>, vector<1x32xf32>
    %c0_47 = arith.constant 0 : index
    %c0_48 = arith.constant 0 : index
    %69 = vector.load %arg14[%c0_47, %c0_48] : memref<1x32xf32, #tpu.memory_space<vmem>>, vector<1x32xf32>
    %cst_49 = arith.constant dense<0.000000e+00> : vector<6xf32>
    %70 = vector.multi_reduction <add>, %67, %cst_49 [1] : vector<6x32xf32> to vector<6xf32>
    %71 = vector.shape_cast %70 : vector<6xf32> to vector<6x1xf32>
    %cst_50 = arith.constant 3.200000e+01 : f32
    %72 = vector.broadcast %cst_50 : f32 to vector<6x1xf32>
    %73 = arith.divf %71, %72 : vector<6x1xf32>
    %74 = vector.broadcast %73 : vector<6x1xf32> to vector<6x32xf32>
    %75 = arith.subf %67, %74 : vector<6x32xf32>
    %76 = arith.mulf %75, %75 : vector<6x32xf32>
    %cst_51 = arith.constant dense<0.000000e+00> : vector<6xf32>
    %77 = vector.multi_reduction <add>, %76, %cst_51 [1] : vector<6x32xf32> to vector<6xf32>
    %78 = vector.shape_cast %77 : vector<6xf32> to vector<6x1xf32>
    %cst_52 = arith.constant 3.200000e+01 : f32
    %79 = vector.broadcast %cst_52 : f32 to vector<6x1xf32>
    %80 = arith.divf %78, %79 : vector<6x1xf32>
    %81 = vector.broadcast %73 : vector<6x1xf32> to vector<6x32xf32>
    %82 = arith.subf %67, %81 : vector<6x32xf32>
    %cst_53 = arith.constant 9.99999974E-6 : f32
    %83 = vector.broadcast %cst_53 : f32 to vector<6x1xf32>
    %84 = arith.addf %80, %83 : vector<6x1xf32>
    %85 = math.rsqrt %84 : vector<6x1xf32>
    %86 = vector.broadcast %85 : vector<6x1xf32> to vector<6x32xf32>
    %87 = arith.mulf %82, %86 : vector<6x32xf32>
    %88 = vector.broadcast %68 : vector<1x32xf32> to vector<6x32xf32>
    %89 = arith.mulf %87, %88 : vector<6x32xf32>
    %90 = vector.broadcast %69 : vector<1x32xf32> to vector<6x32xf32>
    %91 = arith.addf %89, %90 : vector<6x32xf32>
    %c0_54 = arith.constant 0 : index
    %c0_55 = arith.constant 0 : index
    %c0_56 = arith.constant 0 : index
    %92 = vector.load %arg15[%c0_54, %c0_55, %c0_56] : memref<4x32x8xbf16, #tpu.memory_space<vmem>>, vector<4x32x8xbf16>
    %c0_57 = arith.constant 0 : index
    %c0_58 = arith.constant 0 : index
    %c0_59 = arith.constant 0 : index
    %93 = vector.load %arg16[%c0_57, %c0_58, %c0_59] : memref<4x1x8xf32, #tpu.memory_space<vmem>>, vector<4x1x8xf32>
    %c0_60 = arith.constant 0 : index
    %c0_61 = arith.constant 0 : index
    %c0_62 = arith.constant 0 : index
    %94 = vector.load %arg17[%c0_60, %c0_61, %c0_62] : memref<4x32x8xbf16, #tpu.memory_space<vmem>>, vector<4x32x8xbf16>
    %c0_63 = arith.constant 0 : index
    %c0_64 = arith.constant 0 : index
    %c0_65 = arith.constant 0 : index
    %95 = vector.load %arg18[%c0_63, %c0_64, %c0_65] : memref<4x1x8xf32, #tpu.memory_space<vmem>>, vector<4x1x8xf32>
    %c0_66 = arith.constant 0 : index
    %c0_67 = arith.constant 0 : index
    %c0_68 = arith.constant 0 : index
    %96 = vector.load %arg19[%c0_66, %c0_67, %c0_68] : memref<4x32x8xbf16, #tpu.memory_space<vmem>>, vector<4x32x8xbf16>
    %c0_69 = arith.constant 0 : index
    %c0_70 = arith.constant 0 : index
    %c0_71 = arith.constant 0 : index
    %97 = vector.load %arg20[%c0_69, %c0_70, %c0_71] : memref<4x1x8xf32, #tpu.memory_space<vmem>>, vector<4x1x8xf32>
    %c0_72 = arith.constant 0 : index
    %c0_73 = arith.constant 0 : index
    %c0_74 = arith.constant 0 : index
    %98 = vector.load %arg21[%c0_72, %c0_73, %c0_74] : memref<4x8x32xbf16, #tpu.memory_space<vmem>>, vector<4x8x32xbf16>
    %99 = arith.truncf %91 : vector<6x32xf32> to vector<6x32xbf16>
    %100 = vector.shape_cast %99 : vector<6x32xbf16> to vector<1x6x32xbf16>
    %101 = vector.broadcast %100 : vector<1x6x32xbf16> to vector<4x6x32xbf16>
    %102 = arith.truncf %5 : vector<8x32xf32> to vector<8x32xbf16>
    %103 = vector.shape_cast %102 : vector<8x32xbf16> to vector<1x8x32xbf16>
    %104 = vector.broadcast %103 : vector<1x8x32xbf16> to vector<4x8x32xbf16>
    "tpu.trace_start"() <{level = 10 : i32, message = "hle,hed->hld"}> : () -> ()
    %cst_75 = arith.constant dense<0.000000e+00> : vector<4x6x8xf32>
    %105 = tpu.matmul %101, %92, %cst_75 {dimension_numbers = #tpu.dot_dimension_numbers<[2], [1], [1], [2], [0, 0, 0, 1, 1, 2], [0], [0]>} : vector<4x6x32xbf16>, vector<4x32x8xbf16>, vector<4x6x8xf32> -> vector<4x6x8xf32>
    "tpu.trace_stop"() : () -> ()
    %106 = vector.broadcast %93 : vector<4x1x8xf32> to vector<4x6x8xf32>
    %107 = arith.addf %105, %106 : vector<4x6x8xf32>
    "tpu.trace_start"() <{level = 10 : i32, message = "hle,hed->hld"}> : () -> ()
    %cst_76 = arith.constant dense<0.000000e+00> : vector<4x8x8xf32>
    %108 = tpu.matmul %104, %94, %cst_76 {dimension_numbers = #tpu.dot_dimension_numbers<[2], [1], [1], [2], [0, 0, 0, 1, 1, 2], [0], [0]>} : vector<4x8x32xbf16>, vector<4x32x8xbf16>, vector<4x8x8xf32> -> vector<4x8x8xf32>
    "tpu.trace_stop"() : () -> ()
    %109 = vector.broadcast %95 : vector<4x1x8xf32> to vector<4x8x8xf32>
    %110 = arith.addf %108, %109 : vector<4x8x8xf32>
    "tpu.trace_start"() <{level = 10 : i32, message = "hle,hed->hld"}> : () -> ()
    %cst_77 = arith.constant dense<0.000000e+00> : vector<4x8x8xf32>
    %111 = tpu.matmul %104, %96, %cst_77 {dimension_numbers = #tpu.dot_dimension_numbers<[2], [1], [1], [2], [0, 0, 0, 1, 1, 2], [0], [0]>} : vector<4x8x32xbf16>, vector<4x32x8xbf16>, vector<4x8x8xf32> -> vector<4x8x8xf32>
    "tpu.trace_stop"() : () -> ()
    %112 = vector.broadcast %97 : vector<4x1x8xf32> to vector<4x8x8xf32>
    %113 = arith.addf %111, %112 : vector<4x8x8xf32>
    %114 = arith.truncf %107 : vector<4x6x8xf32> to vector<4x6x8xbf16>
    %115 = arith.truncf %110 : vector<4x8x8xf32> to vector<4x8x8xbf16>
    "tpu.trace_start"() <{level = 10 : i32, message = "hqd,hkd->hqk"}> : () -> ()
    %cst_78 = arith.constant dense<0.000000e+00> : vector<4x6x8xf32>
    %116 = tpu.matmul %114, %115, %cst_78 {dimension_numbers = #tpu.dot_dimension_numbers<[2], [2], [1], [1], [0, 0, 0, 1, 1, 1], [0], [0]>} : vector<4x6x8xbf16>, vector<4x8x8xbf16>, vector<4x6x8xf32> -> vector<4x6x8xf32>
    "tpu.trace_stop"() : () -> ()
    %cst_79 = arith.constant 0.353553385 : f32
    %117 = vector.broadcast %cst_79 : f32 to vector<4x6x8xf32>
    %118 = arith.mulf %116, %117 : vector<4x6x8xf32>
    %119 = vector.shape_cast %20 : vector<6x8xf32> to vector<1x6x8xf32>
    %120 = vector.broadcast %119 : vector<1x6x8xf32> to vector<4x6x8xf32>
    %121 = arith.addf %118, %120 : vector<4x6x8xf32>
    %cst_80 = arith.constant dense<0xFF800000> : vector<4x6xf32>
    %122 = vector.multi_reduction <maximumf>, %121, %cst_80 [2] : vector<4x6x8xf32> to vector<4x6xf32>
    %123 = vector.shape_cast %122 : vector<4x6xf32> to vector<4x6x1xf32>
    %124 = vector.broadcast %123 : vector<4x6x1xf32> to vector<4x6x8xf32>
    %125 = arith.subf %121, %124 : vector<4x6x8xf32>
    %126 = math.exp %125 : vector<4x6x8xf32>
    %cst_81 = arith.constant dense<0.000000e+00> : vector<4x6xf32>
    %127 = vector.multi_reduction <add>, %126, %cst_81 [2] : vector<4x6x8xf32> to vector<4x6xf32>
    %128 = vector.shape_cast %127 : vector<4x6xf32> to vector<4x6x1xf32>
    %129 = tpu.reciprocal %128 {approx = true} : vector<4x6x1xf32> -> vector<4x6x1xf32>
    %130 = vector.broadcast %129 : vector<4x6x1xf32> to vector<4x6x8xf32>
    %131 = arith.mulf %126, %130 : vector<4x6x8xf32>
    %132 = arith.truncf %131 : vector<4x6x8xf32> to vector<4x6x8xbf16>
    %133 = arith.truncf %113 : vector<4x8x8xf32> to vector<4x8x8xbf16>
    "tpu.trace_start"() <{level = 10 : i32, message = "hqk,hkd->hqd"}> : () -> ()
    %cst_82 = arith.constant dense<0.000000e+00> : vector<4x6x8xf32>
    %134 = tpu.matmul %132, %133, %cst_82 {dimension_numbers = #tpu.dot_dimension_numbers<[2], [1], [1], [2], [0, 0, 0, 1, 1, 2], [0], [0]>} : vector<4x6x8xbf16>, vector<4x8x8xbf16>, vector<4x6x8xf32> -> vector<4x6x8xf32>
    "tpu.trace_stop"() : () -> ()
    %135 = arith.truncf %134 : vector<4x6x8xf32> to vector<4x6x8xbf16>
    "tpu.trace_start"() <{level = 10 : i32, message = "hqd,hde->hqe"}> : () -> ()
    %cst_83 = arith.constant dense<0.000000e+00> : vector<4x6x32xf32>
    %136 = tpu.matmul %135, %98, %cst_83 {dimension_numbers = #tpu.dot_dimension_numbers<[2], [1], [1], [2], [0, 0, 0, 1, 1, 2], [0], [0]>} : vector<4x6x8xbf16>, vector<4x8x32xbf16>, vector<4x6x32xf32> -> vector<4x6x32xf32>
    "tpu.trace_stop"() : () -> ()
    %cst_84 = arith.constant dense<0.000000e+00> : vector<6x32xf32>
    %137 = vector.multi_reduction <add>, %136, %cst_84 [0] : vector<4x6x32xf32> to vector<6x32xf32>
    %c0_85 = arith.constant 0 : index
    %c0_86 = arith.constant 0 : index
    %138 = vector.load %arg22[%c0_85, %c0_86] : memref<1x32xf32, #tpu.memory_space<vmem>>, vector<1x32xf32>
    %139 = vector.broadcast %138 : vector<1x32xf32> to vector<6x32xf32>
    %140 = arith.addf %137, %139 : vector<6x32xf32>
    %141 = arith.addf %91, %140 : vector<6x32xf32>
    %c0_87 = arith.constant 0 : index
    %c0_88 = arith.constant 0 : index
    %142 = vector.load %arg23[%c0_87, %c0_88] : memref<1x32xf32, #tpu.memory_space<vmem>>, vector<1x32xf32>
    %c0_89 = arith.constant 0 : index
    %c0_90 = arith.constant 0 : index
    %143 = vector.load %arg24[%c0_89, %c0_90] : memref<1x32xf32, #tpu.memory_space<vmem>>, vector<1x32xf32>
    %cst_91 = arith.constant dense<0.000000e+00> : vector<6xf32>
    %144 = vector.multi_reduction <add>, %141, %cst_91 [1] : vector<6x32xf32> to vector<6xf32>
    %145 = vector.shape_cast %144 : vector<6xf32> to vector<6x1xf32>
    %cst_92 = arith.constant 3.200000e+01 : f32
    %146 = vector.broadcast %cst_92 : f32 to vector<6x1xf32>
    %147 = arith.divf %145, %146 : vector<6x1xf32>
    %148 = vector.broadcast %147 : vector<6x1xf32> to vector<6x32xf32>
    %149 = arith.subf %141, %148 : vector<6x32xf32>
    %150 = arith.mulf %149, %149 : vector<6x32xf32>
    %cst_93 = arith.constant dense<0.000000e+00> : vector<6xf32>
    %151 = vector.multi_reduction <add>, %150, %cst_93 [1] : vector<6x32xf32> to vector<6xf32>
    %152 = vector.shape_cast %151 : vector<6xf32> to vector<6x1xf32>
    %cst_94 = arith.constant 3.200000e+01 : f32
    %153 = vector.broadcast %cst_94 : f32 to vector<6x1xf32>
    %154 = arith.divf %152, %153 : vector<6x1xf32>
    %155 = vector.broadcast %147 : vector<6x1xf32> to vector<6x32xf32>
    %156 = arith.subf %141, %155 : vector<6x32xf32>
    %cst_95 = arith.constant 9.99999974E-6 : f32
    %157 = vector.broadcast %cst_95 : f32 to vector<6x1xf32>
    %158 = arith.addf %154, %157 : vector<6x1xf32>
    %159 = math.rsqrt %158 : vector<6x1xf32>
    %160 = vector.broadcast %159 : vector<6x1xf32> to vector<6x32xf32>
    %161 = arith.mulf %156, %160 : vector<6x32xf32>
    %162 = vector.broadcast %142 : vector<1x32xf32> to vector<6x32xf32>
    %163 = arith.mulf %161, %162 : vector<6x32xf32>
    %164 = vector.broadcast %143 : vector<1x32xf32> to vector<6x32xf32>
    %165 = arith.addf %163, %164 : vector<6x32xf32>
    %c0_96 = arith.constant 0 : index
    %c0_97 = arith.constant 0 : index
    %166 = vector.load %arg25[%c0_96, %c0_97] : memref<32x64xbf16, #tpu.memory_space<vmem>>, vector<32x64xbf16>
    %c0_98 = arith.constant 0 : index
    %c0_99 = arith.constant 0 : index
    %167 = vector.load %arg26[%c0_98, %c0_99] : memref<1x64xf32, #tpu.memory_space<vmem>>, vector<1x64xf32>
    %c0_100 = arith.constant 0 : index
    %c0_101 = arith.constant 0 : index
    %168 = vector.load %arg27[%c0_100, %c0_101] : memref<64x32xbf16, #tpu.memory_space<vmem>>, vector<64x32xbf16>
    %c0_102 = arith.constant 0 : index
    %c0_103 = arith.constant 0 : index
    %169 = vector.load %arg28[%c0_102, %c0_103] : memref<1x32xf32, #tpu.memory_space<vmem>>, vector<1x32xf32>
    %170 = arith.truncf %165 : vector<6x32xf32> to vector<6x32xbf16>
    %cst_104 = arith.constant dense<0.000000e+00> : vector<6x64xf32>
    %171 = tpu.matmul %170, %166, %cst_104 {dimension_numbers = #tpu.dot_dimension_numbers<[1], [0], [0], [1], [0, 0, 1, 1], [], []>} : vector<6x32xbf16>, vector<32x64xbf16>, vector<6x64xf32> -> vector<6x64xf32>
    %172 = vector.broadcast %167 : vector<1x64xf32> to vector<6x64xf32>
    %173 = arith.addf %171, %172 : vector<6x64xf32>
    %cst_105 = arith.constant 0.000000e+00 : f32
    %174 = vector.broadcast %cst_105 : f32 to vector<6x64xf32>
    %175 = arith.maximumf %173, %174 : vector<6x64xf32>
    %176 = arith.truncf %175 : vector<6x64xf32> to vector<6x64xbf16>
    %cst_106 = arith.constant dense<0.000000e+00> : vector<6x32xf32>
    %177 = tpu.matmul %176, %168, %cst_106 {dimension_numbers = #tpu.dot_dimension_numbers<[1], [0], [0], [1], [0, 0, 1, 1], [], []>} : vector<6x64xbf16>, vector<64x32xbf16>, vector<6x32xf32> -> vector<6x32xf32>
    %178 = vector.broadcast %169 : vector<1x32xf32> to vector<6x32xf32>
    %179 = arith.addf %177, %178 : vector<6x32xf32>
    %180 = arith.addf %165, %179 : vector<6x32xf32>
    %c0_107 = arith.constant 0 : index
    %c0_108 = arith.constant 0 : index
    %181 = vector.load %arg29[%c0_107, %c0_108] : memref<1x32xf32, #tpu.memory_space<vmem>>, vector<1x32xf32>
    %c0_109 = arith.constant 0 : index
    %c0_110 = arith.constant 0 : index
    %182 = vector.load %arg30[%c0_109, %c0_110] : memref<1x32xf32, #tpu.memory_space<vmem>>, vector<1x32xf32>
    %cst_111 = arith.constant dense<0.000000e+00> : vector<6xf32>
    %183 = vector.multi_reduction <add>, %180, %cst_111 [1] : vector<6x32xf32> to vector<6xf32>
    %184 = vector.shape_cast %183 : vector<6xf32> to vector<6x1xf32>
    %cst_112 = arith.constant 3.200000e+01 : f32
    %185 = vector.broadcast %cst_112 : f32 to vector<6x1xf32>
    %186 = arith.divf %184, %185 : vector<6x1xf32>
    %187 = vector.broadcast %186 : vector<6x1xf32> to vector<6x32xf32>
    %188 = arith.subf %180, %187 : vector<6x32xf32>
    %189 = arith.mulf %188, %188 : vector<6x32xf32>
    %cst_113 = arith.constant dense<0.000000e+00> : vector<6xf32>
    %190 = vector.multi_reduction <add>, %189, %cst_113 [1] : vector<6x32xf32> to vector<6xf32>
    %191 = vector.shape_cast %190 : vector<6xf32> to vector<6x1xf32>
    %cst_114 = arith.constant 3.200000e+01 : f32
    %192 = vector.broadcast %cst_114 : f32 to vector<6x1xf32>
    %193 = arith.divf %191, %192 : vector<6x1xf32>
    %194 = vector.broadcast %186 : vector<6x1xf32> to vector<6x32xf32>
    %195 = arith.subf %180, %194 : vector<6x32xf32>
    %cst_115 = arith.constant 9.99999974E-6 : f32
    %196 = vector.broadcast %cst_115 : f32 to vector<6x1xf32>
    %197 = arith.addf %193, %196 : vector<6x1xf32>
    %198 = math.rsqrt %197 : vector<6x1xf32>
    %199 = vector.broadcast %198 : vector<6x1xf32> to vector<6x32xf32>
    %200 = arith.mulf %195, %199 : vector<6x32xf32>
    %201 = vector.broadcast %181 : vector<1x32xf32> to vector<6x32xf32>
    %202 = arith.mulf %200, %201 : vector<6x32xf32>
    %203 = vector.broadcast %182 : vector<1x32xf32> to vector<6x32xf32>
    %204 = arith.addf %202, %203 : vector<6x32xf32>
    %205 = arith.truncf %204 : vector<6x32xf32> to vector<6x32xbf16>
    %c0_116 = arith.constant 0 : index
    %c0_117 = arith.constant 0 : index
    %c0_118 = arith.constant 0 : index
    %206 = vector.load %arg31[%c0_116, %c0_117, %c0_118] : memref<1x6x32xbf16, #tpu.memory_space<vmem>>, vector<1x6x32xbf16>
    %207 = vector.shape_cast %206 : vector<1x6x32xbf16> to vector<6x32xbf16>
    %208 = vector.shape_cast %205 : vector<6x32xbf16> to vector<1x6x32xbf16>
    tpu.vector_store %arg31[%c0_116, %c0_117, %c0_118], %208 {strides = array<i32>} : memref<1x6x32xbf16, #tpu.memory_space<vmem>>, vector<1x6x32xbf16>,
    return
  }
  func.func @transform_0(%arg0: i32) -> (i32, i32, i32) {
    %c0_i32 = arith.constant 0 : i32
    %c0_i32_0 = arith.constant 0 : i32
    %c0_i32_1 = arith.constant 0 : i32
    return %arg0, %c0_i32, %c0_i32_0 : i32, i32, i32
  }
  func.func @transform_1(%arg0: i32) -> (i32, i32, i32) {
    %c0_i32 = arith.constant 0 : i32
    %c0_i32_0 = arith.constant 0 : i32
    %c0_i32_1 = arith.constant 0 : i32
    return %arg0, %c0_i32, %c0_i32_0 : i32, i32, i32
  }
  func.func @transform_2(%arg0: i32) -> (i32, i32, i32) {
    %c0_i32 = arith.constant 0 : i32
    %c0_i32_0 = arith.constant 0 : i32
    %c0_i32_1 = arith.constant 0 : i32
    return %arg0, %c0_i32, %c0_i32_0 : i32, i32, i32
  }
  func.func @transform_3(%arg0: i32) -> (i32, i32, i32) {
    %c0_i32 = arith.constant 0 : i32
    %c0_i32_0 = arith.constant 0 : i32
    %c0_i32_1 = arith.constant 0 : i32
    return %arg0, %c0_i32, %c0_i32_0 : i32, i32, i32
  }
  func.func @transform_4(%arg0: i32) -> (i32, i32, i32) {
    %c0_i32 = arith.constant 0 : i32
    %c0_i32_0 = arith.constant 0 : i32
    %c0_i32_1 = arith.constant 0 : i32
    %c0_i32_2 = arith.constant 0 : i32
    return %c0_i32, %c0_i32_0, %c0_i32_1 : i32, i32, i32
  }
  func.func @transform_5(%arg0: i32) -> (i32, i32, i32) {
    %c0_i32 = arith.constant 0 : i32
    %c0_i32_0 = arith.constant 0 : i32
    %c0_i32_1 = arith.constant 0 : i32
    %c0_i32_2 = arith.constant 0 : i32
    return %c0_i32, %c0_i32_0, %c0_i32_1 : i32, i32, i32
  }
  func.func @transform_6(%arg0: i32) -> (i32, i32, i32) {
    %c0_i32 = arith.constant 0 : i32
    %c0_i32_0 = arith.constant 0 : i32
    %c0_i32_1 = arith.constant 0 : i32
    %c0_i32_2 = arith.constant 0 : i32
    return %c0_i32, %c0_i32_0, %c0_i32_1 : i32, i32, i32
  }
  func.func @transform_7(%arg0: i32) -> (i32, i32, i32) {
    %c0_i32 = arith.constant 0 : i32
    %c0_i32_0 = arith.constant 0 : i32
    %c0_i32_1 = arith.constant 0 : i32
    %c0_i32_2 = arith.constant 0 : i32
    return %c0_i32, %c0_i32_0, %c0_i32_1 : i32, i32, i32
  }
  func.func @transform_8(%arg0: i32) -> (i32, i32, i32) {
    %c0_i32 = arith.constant 0 : i32
    %c0_i32_0 = arith.constant 0 : i32
    %c0_i32_1 = arith.constant 0 : i32
    %c0_i32_2 = arith.constant 0 : i32
    return %c0_i32, %c0_i32_0, %c0_i32_1 : i32, i32, i32
  }
  func.func @transform_9(%arg0: i32) -> (i32, i32, i32) {
    %c0_i32 = arith.constant 0 : i32
    %c0_i32_0 = arith.constant 0 : i32
    %c0_i32_1 = arith.constant 0 : i32
    %c0_i32_2 = arith.constant 0 : i32
    return %c0_i32, %c0_i32_0, %c0_i32_1 : i32, i32, i32
  }
  func.func @transform_10(%arg0: i32) -> (i32, i32, i32) {
    %c0_i32 = arith.constant 0 : i32
    %c0_i32_0 = arith.constant 0 : i32
    %c0_i32_1 = arith.constant 0 : i32
    %c0_i32_2 = arith.constant 0 : i32
    return %c0_i32, %c0_i32_0, %c0_i32_1 : i32, i32, i32
  }
  func.func @transform_11(%arg0: i32) -> (i32, i32) {
    %c0_i32 = arith.constant 0 : i32
    %c0_i32_0 = arith.constant 0 : i32
    %c0_i32_1 = arith.constant 0 : i32
    return %c0_i32, %c0_i32_0 : i32, i32
  }
  func.func @transform_12(%arg0: i32) -> (i32, i32) {
    %c0_i32 = arith.constant 0 : i32
    %c0_i32_0 = arith.constant 0 : i32
    %c0_i32_1 = arith.constant 0 : i32
    return %c0_i32, %c0_i32_0 : i32, i32
  }
  func.func @transform_13(%arg0: i32) -> (i32, i32) {
    %c0_i32 = arith.constant 0 : i32
    %c0_i32_0 = arith.constant 0 : i32
    %c0_i32_1 = arith.constant 0 : i32
    return %c0_i32, %c0_i32_0 : i32, i32
  }
  func.func @transform_14(%arg0: i32) -> (i32, i32, i32) {
    %c0_i32 = arith.constant 0 : i32
    %c0_i32_0 = arith.constant 0 : i32
    %c0_i32_1 = arith.constant 0 : i32
    %c0_i32_2 = arith.constant 0 : i32
    return %c0_i32, %c0_i32_0, %c0_i32_1 : i32, i32, i32
  }
  func.func @transform_15(%arg0: i32) -> (i32, i32, i32) {
    %c0_i32 = arith.constant 0 : i32
    %c0_i32_0 = arith.constant 0 : i32
    %c0_i32_1 = arith.constant 0 : i32
    %c0_i32_2 = arith.constant 0 : i32
    return %c0_i32, %c0_i32_0, %c0_i32_1 : i32, i32, i32
  }
  func.func @transform_16(%arg0: i32) -> (i32, i32, i32) {
    %c0_i32 = arith.constant 0 : i32
    %c0_i32_0 = arith.constant 0 : i32
    %c0_i32_1 = arith.constant 0 : i32
    %c0_i32_2 = arith.constant 0 : i32
    return %c0_i32, %c0_i32_0, %c0_i32_1 : i32, i32, i32
  }
  func.func @transform_17(%arg0: i32) -> (i32, i32, i32) {
    %c0_i32 = arith.constant 0 : i32
    %c0_i32_0 = arith.constant 0 : i32
    %c0_i32_1 = arith.constant 0 : i32
    %c0_i32_2 = arith.constant 0 : i32
    return %c0_i32, %c0_i32_0, %c0_i32_1 : i32, i32, i32
  }
  func.func @transform_18(%arg0: i32) -> (i32, i32, i32) {
    %c0_i32 = arith.constant 0 : i32
    %c0_i32_0 = arith.constant 0 : i32
    %c0_i32_1 = arith.constant 0 : i32
    %c0_i32_2 = arith.constant 0 : i32
    return %c0_i32, %c0_i32_0, %c0_i32_1 : i32, i32, i32
  }
  func.func @transform_19(%arg0: i32) -> (i32, i32, i32) {
    %c0_i32 = arith.constant 0 : i32
    %c0_i32_0 = arith.constant 0 : i32
    %c0_i32_1 = arith.constant 0 : i32
    %c0_i32_2 = arith.constant 0 : i32
    return %c0_i32, %c0_i32_0, %c0_i32_1 : i32, i32, i32
  }
  func.func @transform_20(%arg0: i32) -> (i32, i32, i32) {
    %c0_i32 = arith.constant 0 : i32
    %c0_i32_0 = arith.constant 0 : i32
    %c0_i32_1 = arith.constant 0 : i32
    %c0_i32_2 = arith.constant 0 : i32
    return %c0_i32, %c0_i32_0, %c0_i32_1 : i32, i32, i32
  }
  func.func @transform_21(%arg0: i32) -> (i32, i32) {
    %c0_i32 = arith.constant 0 : i32
    %c0_i32_0 = arith.constant 0 : i32
    %c0_i32_1 = arith.constant 0 : i32
    return %c0_i32, %c0_i32_0 : i32, i32
  }
  func.func @transform_22(%arg0: i32) -> (i32, i32) {
    %c0_i32 = arith.constant 0 : i32
    %c0_i32_0 = arith.constant 0 : i32
    %c0_i32_1 = arith.constant 0 : i32
    return %c0_i32, %c0_i32_0 : i32, i32
  }
  func.func @transform_23(%arg0: i32) -> (i32, i32) {
    %c0_i32 = arith.constant 0 : i32
    %c0_i32_0 = arith.constant 0 : i32
    %c0_i32_1 = arith.constant 0 : i32
    return %c0_i32, %c0_i32_0 : i32, i32
  }
  func.func @transform_24(%arg0: i32) -> (i32, i32) {
    %c0_i32 = arith.constant 0 : i32
    %c0_i32_0 = arith.constant 0 : i32
    %c0_i32_1 = arith.constant 0 : i32
    return %c0_i32, %c0_i32_0 : i32, i32
  }
  func.func @transform_25(%arg0: i32) -> (i32, i32) {
    %c0_i32 = arith.constant 0 : i32
    %c0_i32_0 = arith.constant 0 : i32
    %c0_i32_1 = arith.constant 0 : i32
    return %c0_i32, %c0_i32_0 : i32, i32
  }
  func.func @transform_26(%arg0: i32) -> (i32, i32) {
    %c0_i32 = arith.constant 0 : i32
    %c0_i32_0 = arith.constant 0 : i32
    %c0_i32_1 = arith.constant 0 : i32
    return %c0_i32, %c0_i32_0 : i32, i32
  }
  func.func @transform_27(%arg0: i32) -> (i32, i32) {
    %c0_i32 = arith.constant 0 : i32
    %c0_i32_0 = arith.constant 0 : i32
    %c0_i32_1 = arith.constant 0 : i32
    return %c0_i32, %c0_i32_0 : i32, i32
  }
  func.func @transform_28(%arg0: i32) -> (i32, i32) {
    %c0_i32 = arith.constant 0 : i32
    %c0_i32_0 = arith.constant 0 : i32
    %c0_i32_1 = arith.constant 0 : i32
    return %c0_i32, %c0_i32_0 : i32, i32
  }
  func.func @transform_29(%arg0: i32) -> (i32, i32) {
    %c0_i32 = arith.constant 0 : i32
    %c0_i32_0 = arith.constant 0 : i32
    %c0_i32_1 = arith.constant 0 : i32
    return %c0_i32, %c0_i32_0 : i32, i32
  }
  func.func @transform_30(%arg0: i32) -> (i32, i32, i32) {
    %c0_i32 = arith.constant 0 : i32
    %c0_i32_0 = arith.constant 0 : i32
    %c0_i32_1 = arith.constant 0 : i32
    return %arg0, %c0_i32, %c0_i32_0 : i32, i32, i32
  }
}

</mosaic_0001>

<bundles_post_ra>
// kernel: transformer_forward.9
= control target key start
LH: loop header
LB: loop body
LE: loop exit
PB: predicated region body
PF: predicated region fallthrough
CT: control target
= control target key end

     0   :  { %vm26_vm0 = vcmask 259072   ;;  %s368_s0 = inlined_call_operand.vmem [shape: bf16[2,6,32], index: 0, kind: input, shape index: {}]   ;;  %s369_s1 = inlined_call_operand.vmem [shape: f32[1,32], index: 1, kind: input, shape index: {}]   ;;  %s370_s2 = inlined_call_operand.vmem [shape: f32[1,32], index: 2, kind: input, shape index: {}]   ;;  %s371_s3 = inlined_call_operand.vmem [shape: bf16[32,128], index: 3, kind: input, shape index: {}]   ;;  %s372_s4 = inlined_call_operand.vmem [shape: f32[1,128], index: 4, kind: input, shape index: {}]   ;;  %s373_s5 = inlined_call_operand.hbm [shape: f32[6,2,128], index: 5, kind: output, shape index: {}]  }
   0x1   :  { %v22_v0 = vld [vmem:[%s368_s0] sm:$0x7]  ;;  %v235_v1 = vld [vmem:[%s368_s0 + $0x4] sm:$0x7] }
   0x2   :  { %v23_v2 = vunpack.c.l.bf16 %v22_v0 }
   0x4   :  { %v27_v3 = vsel %vm26_vm0, %v23_v2, 0.0 }
   0x5   :  { %10 = vsyncpa [#allocation3], 0  ;;  %28 = vadd.xlane.f32.xlu0 %v27_v3  ;;  %v121_v4 = vunpack.c.l.bf16 %v235_v1  ;;  %v291_v6 = vmov 32.0   ;;  %v246_v23 = vld [vmem:[%s371_s3 + $0x8] sm:$0xff]  ;;  %v245_v24 = vld [vmem:[%s371_s3] sm:$0xff]  ;;  %vm85_vm7 = vcmask 261120  }
   0x6   :  { %259 = vrcp.f32 %v291_v6  ;;  %95 = vmatpush.bf16.msra.mxu0 %v246_v23  ;;  %v248_v25 = vld [vmem:[%s371_s3 + $0x8] sm:$0xff]  ;;  %v247_v27 = vld [vmem:[%s371_s3] sm:$0xff]  ;;  %s214_s15 = sshll.u32 %s373_s5, 4  ;;  %s292_s16 = smov [#allocation2]   ;;  %s215_s15 = int_to_ptr.hbm [resolvable:$true] %s214_s15 }
   0x7   :  { %v124_v5 = vsel %vm26_vm0, %v121_v4, 0.0  ;;  %184 = vmatpush.bf16.msra.mxu1 %v248_v25  ;;  %v253_v41 = vld [vmem:[%s369_s1] ss:$0 sm:$0xff]  ;;  %s212_s17 = sshll.u32 %s292_s16, 4  ;;  %s294_s18 = smov 2   ;;  %s213_s17 = int_to_ptr.vmem [resolvable:$true] %s212_s17 }
   0x8   :  { %v254_v45 = vld [vmem:[%s370_s2] ss:$0 sm:$0xff] }
   0x9   :  { %v255_v52 = vld [vmem:[%s369_s1] ss:$0 sm:$0xff] }
   0xa   :  { %96 = vmatpush.bf16.msra.mxu0 %v245_v24  ;;  %v256_v55 = vld [vmem:[%s370_s2] ss:$0 sm:$0xff] }
   0xb   :  { %185 = vmatpush.bf16.msra.mxu1 %v247_v27  ;;  %v257_v59 = vld [vmem:[%s372_s4] ss:$0 sm:$0xff] }
   0xc   :  { %v260_v7 = vpop.eup %259  ;;  %v258_v3 = vld [vmem:[%s372_s4] ss:$0 sm:$0xff]  ;;  %s293_s4 = smov 32  }
   0xd   :  { %125 = vadd.xlane.f32.xlu0 %v124_v5  ;;  %v31_v8 = vmul.f32 32.0, %v260_v7  ;;  %vm35_vm1 = vweird.f32 %v260_v7 }
   0xf   :  { %v32_v9 = vsub.f32 1.0, %v31_v8 }
  0x11   :  { %v33_v10 = vmul.f32 %v260_v7, %v32_v9 }
  0x13   :  { %v34_v11 = vadd.f32 %v260_v7, %v33_v10 }
  0x15   :  { %v36_v12 = vsel %vm35_vm1, %v260_v7, %v34_v11 }
  0x78   :  { %v29_v13 = vpop.xlane.xlu0 %28 }
  0x79   :  { %v37_v14 = vmul.f32 %v36_v12, %v29_v13 }
  0x7b   :  { %v38_v15 = vsub.f32 %v23_v2, %v37_v14 }
  0x7d   :  { %v39_v16 = vmul.f32 %v38_v15, %v38_v15 }
  0x7f   :  { %v40_v17 = vsel %vm26_vm0, %v39_v16, 0.0 }
  0x80   :  { %41 = vadd.xlane.f32.xlu1 %v40_v17  ;;  %v126_v18 = vpop.xlane.xlu0 %125 }
  0x81   :  { %v127_v19 = vmul.f32 %v126_v18, %v36_v12 }
  0x83   :  { %v128_v20 = vsub.f32 %v121_v4, %v127_v19 }
  0x85   :  { %v129_v21 = vmul.f32 %v128_v20, %v128_v20 }
  0x87   :  { %v130_v22 = vsel %vm26_vm0, %v129_v21, 0.0 }
  0x88   :  { %131 = vadd.xlane.f32.xlu1 %v130_v22 }
  0xf3   :  { %v42_v26 = vpop.xlane.xlu1 %41 }
  0xf4   :  { %v43_v28 = vmul.f32 %v42_v26, %v36_v12 }
  0xf6   :  { %v44_v29 = vadd.f32 1e-05, %v43_v28 }
  0xf8   :  { %261 = vrsqrt.f32 %v44_v29  ;;  %vm51_vm3 = vweird.f32 %v44_v29 }
  0xfb   :  { %v132_v30 = vpop.xlane.xlu1 %131 }
  0xfc   :  { %v133_v31 = vmul.f32 %v132_v30, %v36_v12 }
  0xfe   :  { %v262_v32 = vpop.eup %261  ;;  %v134_v33 = vadd.f32 1e-05, %v133_v31 }
  0xff   :  { %v46_v34 = vmul.f32 %v262_v32, %v44_v29  ;;  %vm52_vm2 = vweird.f32 %v262_v32 }
 0x100   :  { %263 = vrsqrt.f32 %v134_v33  ;;  %vm53_vm4 = vmor %vm51_vm3, %vm52_vm2  ;;  %vm141_vm6 = vweird.f32 %v134_v33 }
 0x101   :  { %v47_v35 = vmul.f32 %v262_v32, %v46_v34 }
 0x103   :  { %v48_v36 = vmul.f32 0.5, %v47_v35 }
 0x105   :  { %v49_v37 = vsub.f32 1.5, %v48_v36 }
 0x106   :  { %v264_v38 = vpop.eup %263 }
 0x107   :  { %v50_v39 = vmul.f32 %v262_v32, %v49_v37  ;;  %v136_v40 = vmul.f32 %v264_v38, %v134_v33  ;;  %vm142_vm5 = vweird.f32 %v264_v38 }
 0x108   :  { %vm143_vm8 = vmor %vm141_vm6, %vm142_vm5 }
 0x109   :  { %v54_v42 = vsel %vm53_vm4, %v262_v32, %v50_v39  ;;  %v137_v43 = vmul.f32 %v264_v38, %v136_v40 }
 0x10a   :  { %v55_v44 = vmul.f32 %v54_v42, %v38_v15 }
 0x10b   :  { %v138_v46 = vmul.f32 0.5, %v137_v43 }
 0x10c   :  { %v59_v47 = vmul.f32 %v253_v41, %v55_v44 }
 0x10d   :  { %v139_v48 = vsub.f32 1.5, %v138_v46 }
 0x10e   :  { %v63_v49 = vadd.f32 %v254_v45, %v59_v47 }
 0x10f   :  { %v140_v50 = vmul.f32 %v264_v38, %v139_v48 }
 0x110   :  { %v64_v51 = vpack.c.bf16 %v63_v49, %v63_v49 }
 0x111   :  { %v144_v53 = vsel %vm143_vm8, %v264_v38, %v140_v50 }
 0x112   :  { %234 = vmatmul.msk.bf16.vlgmr.msra.gmra.mxu0 %vm85_vm7, %v64_v51  ;;  %v145_v54 = vmul.f32 %v144_v53, %v128_v20 }
 0x114   :  { %v149_v56 = vmul.f32 %v255_v52, %v145_v54 }
 0x116   :  { %v153_v57 = vadd.f32 %v256_v55, %v149_v56 }
 0x118   :  { %v154_v58 = vpack.c.bf16 %v153_v57, %v153_v57 }
 0x11a   :  { %244 = vmatmul.msk.bf16.vlgmr.msra.gmra.mxu1 %vm85_vm7, %v154_v58 }
 0x18f   :  { %v98_v60 = vpop.f32.mrf.mxu0 }
 0x190   :  { %v99_v61 = vadd.f32 %v257_v59, %v98_v60 }
 0x192   :  { %v103_v62 = vrot.slane %v99_v61, 1  ;;  %v104_v63 = vrot.slane %v99_v61, 2  ;;  %v105_v0 = vrot.slane %v99_v61, 3  ;;  %113 = vst [vmem:[#allocation2] sm:$0x1] %v99_v61  ;;  %v106_v1 = vrot.slane %v99_v61, 4 }
 0x193   :  { %v107_v2 = vrot.slane %v99_v61, 5 }
 0x194   :  { %114 = vst [vmem:[#allocation2 + $0x2] sm:$0x1] %v103_v62 }
 0x195   :  { %115 = vst [vmem:[#allocation2 + $0x4] sm:$0x1] %v104_v63 }
 0x196   :  { %116 = vst [vmem:[#allocation2 + $0x6] sm:$0x1] %v105_v0 }
 0x197   :  { %117 = vst [vmem:[#allocation2 + $0x8] sm:$0x1] %v106_v1  ;;  %v100_v4 = vpop.f32.mrf.mxu0  ;;  %v187_v5 = vpop.f32.mrf.mxu1 }
 0x198   :  { %118 = vst [vmem:[#allocation2 + $0xa] sm:$0x1] %v107_v2  ;;  %v188_v6 = vadd.f32 %v258_v3, %v187_v5 }
 0x19a   :  { %v192_v7 = vrot.slane %v188_v6, 1  ;;  %v193_v8 = vrot.slane %v188_v6, 2  ;;  %v194_v9 = vrot.slane %v188_v6, 3  ;;  %202 = vst [vmem:[#allocation2 + $0x1] sm:$0x1] %v188_v6  ;;  %v195_v10 = vrot.slane %v188_v6, 4 }
 0x19b   :  { %v196_v11 = vrot.slane %v188_v6, 5 }
 0x19c   :  { %203 = vst [vmem:[#allocation2 + $0x3] sm:$0x1] %v192_v7 }
 0x19d   :  { %204 = vst [vmem:[#allocation2 + $0x5] sm:$0x1] %v193_v8 }
 0x19e   :  { %205 = vst [vmem:[#allocation2 + $0x7] sm:$0x1] %v194_v9 }
 0x19f   :  { %206 = vst [vmem:[#allocation2 + $0x9] sm:$0x1] %v195_v10  ;;  %v189_v12 = vpop.f32.mrf.mxu1 }
 0x1a0   :  { %207 = vst [vmem:[#allocation2 + $0xb] sm:$0x1] %v196_v11 }
 0x1a1   :  { %220 = dma.vmem_to_hbm [thread:$0]  %s213_s17, 192, %s215_s15, [#allocation3], %s293_s4, %s293_s4, %s294_s18  }
 0x1a2   :  { %289 = dma.done.wait [#allocation3], 192  }
 0x1a3   :  { %290 = vsyncadd [#allocation3], 4294967104 }
 0x1a4   :  { %225 = vsyncpa [#allocation3], 1 }

// kernel: transformer_forward.5
= control target key start
LH: loop header
LB: loop body
LE: loop exit
PB: predicated region body
PF: predicated region fallthrough
CT: control target
= control target key end

     0   :  { %s2204_s0 = inlined_call_operand.vmem [shape: bf16[2,8,32], index: 0, kind: input, shape index: {}]   ;;  %s2205_s1 = inlined_call_operand.vmem [shape: f32[2,1,8], index: 1, kind: input, shape index: {}]   ;;  %s2206_s2 = inlined_call_operand.vmem [shape: bf16[4,32,8], index: 2, kind: input, shape index: {}]   ;;  %s2207_s3 = inlined_call_operand.vmem [shape: f32[4,1,8], index: 3, kind: input, shape index: {}]   ;;  %s2208_s4 = inlined_call_operand.vmem [shape: bf16[4,32,8], index: 4, kind: input, shape index: {}]   ;;  %s2209_s5 = inlined_call_operand.vmem [shape: f32[4,1,8], index: 5, kind: input, shape index: {}]   ;;  %s2210_s6 = inlined_call_operand.vmem [shape: bf16[4,32,8], index: 6, kind: input, shape index: {}]   ;;  %s2211_s7 = inlined_call_operand.vmem [shape: f32[4,1,8], index: 7, kind: input, shape index: {}]   ;;  %s2212_s8 = inlined_call_operand.vmem [shape: bf16[4,8,32], index: 8, kind: input, shape index: {}]   ;;  %s2213_s9 = inlined_call_operand.vmem [shape: f32[1,32], index: 9, kind: input, shape index: {}]   ;;  %s2214_s10 = inlined_call_operand.vmem [shape: f32[1,32], index: 10, kind: input, shape index: {}]   ;;  %s2215_s11 = inlined_call_operand.vmem [shape: f32[1,32], index: 11, kind: input, shape index: {}]   ;;  %s2216_s12 = inlined_call_operand.vmem [shape: bf16[32,64], index: 12, kind: input, shape index: {}]   ;;  %s2217_s13 = inlined_call_operand.vmem [shape: f32[1,64], index: 13, kind: input, shape index: {}]   ;;  %s2218_s14 = inlined_call_operand.vmem [shape: bf16[64,32], index: 14, kind: input, shape index: {}]   ;;  %s2219_s15 = inlined_call_operand.vmem [shape: f32[1,32], index: 15, kind: input, shape index: {}]   ;;  %s2220_s16 = inlined_call_operand.vmem [shape: f32[1,32], index: 16, kind: input, shape index: {}]   ;;  %s2221_s17 = inlined_call_operand.vmem [shape: f32[1,32], index: 17, kind: input, shape index: {}]   ;;  %s2222_s18 = inlined_call_operand.vmem [shape: f32[1,32], index: 18, kind: input, shape index: {}]   ;;  %s2223_s19 = inlined_call_operand.vmem [shape: f32[1,32], index: 19, kind: input, shape index: {}]   ;;  %s2224_s20 = inlined_call_operand.vmem [shape: bf16[2,8,32], index: 20, kind: output, shape index: {}]  }
   0x1   :  { %2229 = sst [smem:[#allocation2_spill]] %s2204_s0 }
   0x2   :  { %2230 = sst [smem:[#allocation3_spill]] %s2205_s1  ;;  %s1944_s1 = smov 0  }
   0x3   :  { %2231 = sst [smem:[#allocation4_spill]] %s2206_s2 }
   0x4   :  { %2232 = sst [smem:[#allocation5_spill]] %s2207_s3 }
   0x5   :  { %2233 = sst [smem:[#allocation6_spill]] %s2208_s4 }
   0x6 LB: > { %s1594_s22 = sadd.s32 4294967295, %s1836_s1   ;;  %p1598_p0 = scmp.ge.s32.totalorder %s1836_s1, 1  ;;  %s1836_s1 = sphi %s1944_s1, %s30_s1  }
   0x7   : > { %p569_p1 = scmp.lt.s32.totalorder %s1836_s1, 3 }
   0x9   : > { %p570_p2 = pnand %p1598_p0, %p569_p1 }
   0xa   : > { %s2234_s23 = sld [smem:[#allocation4_spill]] (!%p570_p2)  ;;  %p628_p3 = scmp.lt.s32.totalorder (!%p570_p2), %s1594_s22, 1 }
   0xb   : > { %573 = sbr.rel (%p570_p2) target bundleno = 1662 (0x67e), region = 100  ;;  %s2235_s3 = sld [smem:[#allocation6_spill]] (!%p570_p2) }
   0xc   : > { %s2236_s29 = sld [smem:[#allocation2_spill]] (!%p570_p2) }
   0xd   : > { %s2238_s0 = sld [smem:[#allocation3_spill]] (!%p570_p2) }
  0x10   : > { %v1750_v0 = vld [vmem:[%s2234_s23 + $0x8] sm:$0xff]  ;;  %v1752_v1 = vld [vmem:[%s2234_s23 + $0x18] sm:$0xff]  ;;  %v1749_v4 = vld [vmem:[%s2234_s23] sm:$0xff]  ;;  %s2240_s22 = smov (!%p628_p3, %s1594_s22), 1  ;;  %vm731_vm0 = vcmask 261120   ;;  %vm1055_vm1 = vcmask 64512  }
  0x11   : > { %v1754_v2 = vld [vmem:[%s2234_s23 + $0x28] sm:$0xff]  ;;  %v1756_v3 = vld [vmem:[%s2234_s23 + $0x38] sm:$0xff]  ;;  %741 = vmatpush.bf16.msra.mxu0 %v1750_v0  ;;  %766 = vmatpush.bf16.msra.mxu1 %v1752_v1  ;;  %v1751_v5 = vld [vmem:[%s2234_s23 + $0x10] sm:$0xff]  ;;  %s1599_s24 = sshll.u32 %s2240_s22, 2  ;;  %vm1198_vm2 = vcmask 1043456   ;;  %vm1479_vm7 = vcmask 523264  }
  0x12   : > { %791 = vmatpush.bf16.msra.mxu2 %v1754_v2  ;;  %816 = vmatpush.bf16.msra.mxu3 %v1756_v3  ;;  %v1753_v6 = vld [vmem:[%s2234_s23 + $0x20] sm:$0xff]  ;;  %v1755_v7 = vld [vmem:[%s2234_s23 + $0x30] sm:$0xff]  ;;  %v1758_v8 = vld [vmem:[%s2235_s3 + $0x8] sm:$0xff]  ;;  %s631_s30 = scalar_lea.vmem %s2236_s29, %s1599_s24  ;;  %s2237_s29 = sld [smem:[#allocation5_spill]]  ;;  %vm1530_vm11 = vcmask 257024  }
  0x13   : > { %v1760_v9 = vld [vmem:[%s2235_s3 + $0x18] sm:$0xff]  ;;  %v1762_v10 = vld [vmem:[%s2235_s3 + $0x28] sm:$0xff]  ;;  %v1996_v12 = vld [vmem:[%s631_s30] sm:$0xf]  ;;  %s634_s21 = scalar_lea.vmem %s2238_s0, %s2240_s22  ;;  %s638_s28 = scalar_lea.vmem %s2224_s20, %s1599_s24 }
  0x14   : > { %v1764_v11 = vld [vmem:[%s2235_s3 + $0x38] sm:$0xff]  ;;  %v1757_v13 = vld [vmem:[%s2235_s3] sm:$0xff]  ;;  %v1759_v14 = vld [vmem:[%s2235_s3 + $0x10] sm:$0xff] }
  0x15   : > { %742 = vmatpush.bf16.msra.mxu0 %v1749_v4  ;;  %767 = vmatpush.bf16.msra.mxu1 %v1751_v5  ;;  %v1761_v15 = vld [vmem:[%s2235_s3 + $0x20] sm:$0xff]  ;;  %v1763_v16 = vld [vmem:[%s2235_s3 + $0x30] sm:$0xff]  ;;  %v1770_v17 = vld [vmem:[%s2210_s6 + $0x28] sm:$0xff] }
  0x16   : > { %792 = vmatpush.bf16.msra.mxu2 %v1753_v6  ;;  %817 = vmatpush.bf16.msra.mxu3 %v1755_v7  ;;  %v1766_v18 = vld [vmem:[%s2210_s6 + $0x8] sm:$0xff]  ;;  %v1768_v19 = vld [vmem:[%s2210_s6 + $0x18] sm:$0xff]  ;;  %v1769_v20 = vld [vmem:[%s2210_s6 + $0x20] sm:$0xff] }
  0x17   : > { %v1765_v21 = vld [vmem:[%s2210_s6] sm:$0xff]  ;;  %v1767_v22 = vld [vmem:[%s2210_s6 + $0x10] sm:$0xff]  ;;  %v1772_v23 = vld [vmem:[%s2210_s6 + $0x38] sm:$0xff] }
  0x18   : > { %1609 = vmatmul.msk.bf16.vlgmr.msra.gmra.mxu0 %vm731_vm0, %v1996_v12  ;;  %1618 = vmatmul.msk.bf16.vlgmr.msra.gmra.mxu1 %vm731_vm0, %v1996_v12  ;;  %v1771_v24 = vld [vmem:[%s2210_s6 + $0x30] sm:$0xff]  ;;  %v1792_v31 = vld [vmem:[%s2209_s5] ss:$0 sm:$0xff]  ;;  %v1793_v32 = vld [vmem:[%s2209_s5 + $0x1] ss:$0 sm:$0xff] }
  0x19   : > { %853 = vmatpush.bf16.msrb.mxu0 %v1758_v8  ;;  %878 = vmatpush.bf16.msrb.mxu1 %v1760_v9  ;;  %v1789_v39 = vld [vmem:[%s2237_s29 + $0x1] ss:$0 sm:$0xff]  ;;  %v1788_v42 = vld [vmem:[%s2237_s29] ss:$0 sm:$0xff]  ;;  %v1794_v43 = vld [vmem:[%s2209_s5 + $0x2] ss:$0 sm:$0xff] }
  0x1a   : > { %1627 = vmatmul.msk.bf16.vlgmr.msra.gmra.mxu2 %vm731_vm0, %v1996_v12  ;;  %1636 = vmatmul.msk.bf16.vlgmr.msra.gmra.mxu3 %vm731_vm0, %v1996_v12  ;;  %v1795_v44 = vld [vmem:[%s2209_s5 + $0x3] ss:$0 sm:$0xff]  ;;  %v1790_v56 = vld [vmem:[%s2237_s29 + $0x2] ss:$0 sm:$0xff]  ;;  %v1796_v5 = vld [vmem:[%s2211_s7] ss:$0 sm:$0xff] }
  0x1b   : > { %903 = vmatpush.bf16.msrb.mxu2 %v1762_v10  ;;  %928 = vmatpush.bf16.msrb.mxu3 %v1764_v11  ;;  %v1791_v57 = vld [vmem:[%s2237_s29 + $0x3] ss:$0 sm:$0xff]  ;;  %v1797_v6 = vld [vmem:[%s2211_s7 + $0x1] ss:$0 sm:$0xff]  ;;  %v1798_v11 = vld [vmem:[%s2211_s7 + $0x2] ss:$0 sm:$0xff] }
  0x1d   : > { %854 = vmatpush.bf16.msrb.mxu0 %v1757_v13  ;;  %879 = vmatpush.bf16.msrb.mxu1 %v1759_v14 }
  0x1f   : > { %904 = vmatpush.bf16.msrb.mxu2 %v1761_v15  ;;  %929 = vmatpush.bf16.msrb.mxu3 %v1763_v16 }
  0x21   : > { %965 = vmatpush.bf16.msra.mxu0 %v1766_v18  ;;  %990 = vmatpush.bf16.msra.mxu1 %v1768_v19 }
  0x23   : > { %1015 = vmatpush.bf16.msra.mxu2 %v1770_v17  ;;  %1040 = vmatpush.bf16.msra.mxu3 %v1772_v23  ;;  %v1799_v23 = vld [vmem:[%s2211_s7 + $0x3] ss:$0 sm:$0xff] }
  0x25   : > { %966 = vmatpush.bf16.msra.mxu0 %v1765_v21  ;;  %991 = vmatpush.bf16.msra.mxu1 %v1767_v22 }
  0x27   : > { %1016 = vmatpush.bf16.msra.mxu2 %v1769_v20  ;;  %1041 = vmatpush.bf16.msra.mxu3 %v1771_v24 }
  0x28   : > { %1645 = vmatmul.msk.bf16.vlgmr.msrb.gmra.mxu0 %vm731_vm0, %v1996_v12  ;;  %1654 = vmatmul.msk.bf16.vlgmr.msrb.gmra.mxu1 %vm731_vm0, %v1996_v12 }
  0x2a   : > { %1663 = vmatmul.msk.bf16.vlgmr.msrb.gmra.mxu2 %vm731_vm0, %v1996_v12  ;;  %1672 = vmatmul.msk.bf16.vlgmr.msrb.gmra.mxu3 %vm731_vm0, %v1996_v12 }
  0x38   : > { %1681 = vmatmul.msk.bf16.vlgmr.msra.gmra.mxu0 %vm731_vm0, %v1996_v12  ;;  %1690 = vmatmul.msk.bf16.vlgmr.msra.gmra.mxu1 %vm731_vm0, %v1996_v12 }
  0x3a   : > { %1699 = vmatmul.msk.bf16.vlgmr.msra.gmra.mxu2 %vm731_vm0, %v1996_v12  ;;  %1708 = vmatmul.msk.bf16.vlgmr.msra.gmra.mxu3 %vm731_vm0, %v1996_v12 }
  0x95   : > { %v744_v25 = vpop.f32.mrf.mxu0  ;;  %v769_v26 = vpop.f32.mrf.mxu1 }
  0x96   : > { %v770_v47 = vadd.f32 %v1789_v39, %v769_v26  ;;  %v745_v50 = vadd.f32 %v1788_v42, %v744_v25 }
  0x98   : > { %v1048_v55 = vpack.c.bf16 %v770_v47, %v770_v47  ;;  %v1047_v60 = vpack.c.bf16 %v745_v50, %v745_v50 }
  0x9d   : > { %v794_v27 = vpop.f32.mrf.mxu2  ;;  %v819_v28 = vpop.f32.mrf.mxu3 }
  0x9e   : > { %v746_v29 = vpop.f32.mrf.mxu0  ;;  %v771_v30 = vpop.f32.mrf.mxu1  ;;  %v795_v63 = vadd.f32 %v1790_v56, %v794_v27  ;;  %v820_v0 = vadd.f32 %v1791_v57, %v819_v28 }
  0x9f   : > { %v1800_v30 = vld [vmem:[%s634_s21] ss:$0 sm:$0xff] }
  0xa0   : > { %v1049_v3 = vpack.c.bf16 %v795_v63, %v795_v63  ;;  %v1050_v4 = vpack.c.bf16 %v820_v0, %v820_v0 }
  0xa5   : > { %v796_v33 = vpop.f32.mrf.mxu2  ;;  %v821_v34 = vpop.f32.mrf.mxu3 }
  0xa6   : > { %v856_v35 = vpop.f32.mrf.mxu0  ;;  %v881_v36 = vpop.f32.mrf.mxu1 }
  0xa7   : > { %v857_v37 = vadd.f32 %v1792_v31, %v856_v35  ;;  %v882_v38 = vadd.f32 %v1793_v32, %v881_v36 }
  0xa9   : > { %v1051_v40 = vpack.c.bf16 %v857_v37, %v857_v37  ;;  %v1052_v41 = vpack.c.bf16 %v882_v38, %v882_v38 }
  0xab   : > { %v1060_v45 = vsel %vm1055_vm1, %v1051_v40, 0  ;;  %v1079_v46 = vsel %vm1055_vm1, %v1052_v41, 0 }
  0xac   : > { %1069 = vmatpush.bf16.xpose.msrb.mxu0 %v1060_v45  ;;  %1088 = vmatpush.bf16.xpose.msrb.mxu1 %v1079_v46 }
  0xad   : > { %v906_v48 = vpop.f32.mrf.mxu2  ;;  %v931_v49 = vpop.f32.mrf.mxu3 }
  0xae   : > { %v907_v51 = vadd.f32 %v1794_v43, %v906_v48  ;;  %v932_v52 = vadd.f32 %v1795_v44, %v931_v49  ;;  %v858_v53 = vpop.f32.mrf.mxu0  ;;  %v883_v54 = vpop.f32.mrf.mxu1 }
  0xb0   : > { %v1053_v58 = vpack.c.bf16 %v907_v51, %v907_v51  ;;  %v1054_v59 = vpack.c.bf16 %v932_v52, %v932_v52 }
  0xb2   : > { %v1098_v61 = vsel %vm1055_vm1, %v1053_v58, 0  ;;  %v1117_v62 = vsel %vm1055_vm1, %v1054_v59, 0 }
  0xb3   : > { %1107 = vmatpush.bf16.xpose.msrb.mxu2 %v1098_v61  ;;  %1126 = vmatpush.bf16.xpose.msrb.mxu3 %v1117_v62 }
  0xb4   : > { %1709 = vmatmul.msk.bf16.vlgmr.msrb.gmra.mxu0 %vm1055_vm1, %v1047_v60  ;;  %1710 = vmatmul.msk.bf16.vlgmr.msrb.gmra.mxu1 %vm1055_vm1, %v1048_v55 }
  0xb5   : > { %v908_v1 = vpop.f32.mrf.mxu2  ;;  %v933_v2 = vpop.f32.mrf.mxu3 }
  0xb6   : > { %v968_v7 = vpop.f32.mrf.mxu0  ;;  %v993_v8 = vpop.f32.mrf.mxu1 }
  0xb7   : > { %v969_v9 = vadd.f32 %v1796_v5, %v968_v7  ;;  %v994_v10 = vadd.f32 %v1797_v6, %v993_v8 }
  0xb9   : > { %v1191_v13 = vpack.c.bf16 %v969_v9, %v969_v9  ;;  %v1192_v14 = vpack.c.bf16 %v994_v10, %v994_v10 }
  0xba   : > { %1711 = vmatmul.msk.bf16.vlgmr.msrb.gmra.mxu2 %vm1055_vm1, %v1049_v3  ;;  %1712 = vmatmul.msk.bf16.vlgmr.msrb.gmra.mxu3 %vm1055_vm1, %v1050_v4 }
  0xbb   : > { %v1200_v16 = vsel %vm1198_vm2, %v1191_v13, 0  ;;  %v1219_v17 = vsel %vm1198_vm2, %v1192_v14, 0 }
  0xbc   : > { %1209 = vmatpush.bf16.msra.mxu0 %v1200_v16  ;;  %1228 = vmatpush.bf16.msra.mxu1 %v1219_v17 }
  0xbd   : > { %v1018_v15 = vpop.f32.mrf.mxu2  ;;  %v1043_v24 = vpop.f32.mrf.mxu3 }
  0xbe   : > { %v1019_v18 = vadd.f32 %v1798_v11, %v1018_v15  ;;  %v970_v20 = vpop.f32.mrf.mxu0  ;;  %v995_v21 = vpop.f32.mrf.mxu1  ;;  %v1044_v26 = vadd.f32 %v1799_v23, %v1043_v24  ;;  %v703_v24 = vld [vmem:[%s2212_s8] sm:$0xf] }
  0xc0   : > { %v1193_v19 = vpack.c.bf16 %v1019_v18, %v1019_v18  ;;  %v1194_v27 = vpack.c.bf16 %v1044_v26, %v1044_v26  ;;  %v704_v26 = vld [vmem:[%s2212_s8 + $0x4] sm:$0xf] }
  0xc2   : > { %v1238_v22 = vsel %vm1198_vm2, %v1193_v19, 0  ;;  %v1257_v28 = vsel %vm1198_vm2, %v1194_v27, 0  ;;  %v1299_v27 = vsel %vm1198_vm2, %v704_v26, 0 }
  0xc3   : > { %1247 = vmatpush.bf16.msra.mxu2 %v1238_v22  ;;  %1266 = vmatpush.bf16.msra.mxu3 %v1257_v28  ;;  %v705_v28 = vld [vmem:[%s2212_s8 + $0x8] sm:$0xf] }
  0xc4   : > { %1308 = vmatpush.bf16.msrb.mxu1 %v1299_v27  ;;  %v1803_v27 = vld [vmem:[%s2215_s11] ss:$0 sm:$0xff] }
  0xc5   : > { %v1020_v25 = vpop.f32.mrf.mxu2  ;;  %v1045_v29 = vpop.f32.mrf.mxu3 }
  0xc6   : > { %v1280_v25 = vsel %vm1198_vm2, %v703_v24, 0  ;;  %v1318_v29 = vsel %vm1198_vm2, %v705_v28, 0 }
  0xc7   : > { %1289 = vmatpush.bf16.msrb.mxu0 %v1280_v25  ;;  %1327 = vmatpush.bf16.msrb.mxu2 %v1318_v29  ;;  %v1802_v25 = vld [vmem:[%s2214_s10] ss:$0 sm:$0xff] }
 0x131   : > { %v1071_v31 = vpop.f32.mrf.mxu0  ;;  %v1090_v32 = vpop.f32.mrf.mxu1 }
 0x132   : > { %v1132_v33 = vmul.f32 0.35355338, %v1071_v31  ;;  %v1133_v35 = vmul.f32 0.35355338, %v1090_v32 }
 0x134   : > { %v1139_v34 = vadd.f32 %v1800_v30, %v1132_v33  ;;  %v1140_v39 = vadd.f32 %v1800_v30, %v1133_v35 }
 0x136   : > { %v1143_v36 = vsel %vm1055_vm1, %v1139_v34, -inf  ;;  %v1146_v43 = vsel %vm1055_vm1, %v1140_v39, -inf }
 0x137   : > { %1144 = vmax.xlane.f32.xlu1 %v1143_v36 }
 0x139   : > { %v1073_v37 = vpop.f32.mrf.mxu0  ;;  %v1092_v38 = vpop.f32.mrf.mxu1 }
 0x13d   : > { %v1109_v40 = vpop.f32.mrf.mxu2  ;;  %v1128_v41 = vpop.f32.mrf.mxu3 }
 0x13e   : > { %v1134_v42 = vmul.f32 0.35355338, %v1109_v40  ;;  %v1135_v45 = vmul.f32 0.35355338, %v1128_v41 }
 0x13f   : > { %1147 = vmax.xlane.f32.xlu1 %v1146_v43 }
 0x140   : > { %v1141_v44 = vadd.f32 %v1800_v30, %v1134_v42  ;;  %v1142_v49 = vadd.f32 %v1800_v30, %v1135_v45  ;;  %v706_v30 = vld [vmem:[%s2212_s8 + $0xc] sm:$0xf] }
 0x141   : > { %v1337_v31 = vsel %vm1198_vm2, %v706_v30, 0 }
 0x142   : > { %v1149_v46 = vsel %vm1055_vm1, %v1141_v44, -inf  ;;  %v1152_v50 = vsel %vm1055_vm1, %v1142_v49, -inf  ;;  %1346 = vmatpush.bf16.msrb.mxu3 %v1337_v31 }
 0x143   : > { %1150 = vmax.xlane.f32.xlu0 %v1149_v46 }
 0x145   : > { %v1111_v47 = vpop.f32.mrf.mxu2  ;;  %v1130_v48 = vpop.f32.mrf.mxu3 }
 0x14b   : > { %1153 = vmax.xlane.f32.xlu0 %v1152_v50 }
 0x1aa   : > { %v1145_v51 = vpop.xlane.xlu1 %1144 }
 0x1ab   : > { %v1155_v52 = vsub.f32 %v1139_v34, %v1145_v51 }
 0x1ad   : > { %v1159_v53 = vmul.f32 1.442695, %v1155_v52 }
 0x1af   : > { %1808 = vpow2.f32 %v1159_v53 }
 0x1b2   : > { %v1148_v54 = vpop.xlane.xlu1 %1147 }
 0x1b3   : > { %v1156_v55 = vsub.f32 %v1140_v39, %v1148_v54 }
 0x1b5   : > { %v1809_v56 = vpop.eup %1808  ;;  %v1161_v57 = vmul.f32 1.442695, %v1156_v55 }
 0x1b6   : > { %v1151_v58 = vpop.xlane.xlu0 %1150  ;;  %v1167_v59 = vsel %vm1055_vm1, %v1809_v56, 0.0 }
 0x1b7   : > { %1810 = vpow2.f32 %v1161_v57  ;;  %v1157_v60 = vsub.f32 %v1141_v44, %v1151_v58  ;;  %1168 = vadd.xlane.f32.xlu0 %v1167_v59  ;;  %v641_v59 = vunpack.c.l.bf16 %v1996_v12 }
 0x1b9   : > { %v1163_v61 = vmul.f32 1.442695, %v1157_v60 }
 0x1bb   : > { %1812 = vpow2.f32 %v1163_v61 }
 0x1bd   : > { %v1811_v62 = vpop.eup %1810 }
 0x1be   : > { %v1154_v63 = vpop.xlane.xlu0 %1153  ;;  %v1170_v0 = vsel %vm1055_vm1, %v1811_v62, 0.0 }
 0x1bf   : > { %v1158_v1 = vsub.f32 %v1142_v49, %v1154_v63  ;;  %1171 = vadd.xlane.f32.xlu1 %v1170_v0  ;;  %v1838_v0 = vmov 32.0  }
 0x1c1   : > { %v1813_v2 = vpop.eup %1812  ;;  %v1165_v3 = vmul.f32 1.442695, %v1158_v1 }
 0x1c2   : > { %v1173_v4 = vsel %vm1055_vm1, %v1813_v2, 0.0 }
 0x1c3   : > { %1814 = vpow2.f32 %v1165_v3  ;;  %1174 = vadd.xlane.f32.xlu2 %v1173_v4 }
 0x1c9   : > { %v1815_v5 = vpop.eup %1814 }
 0x1ca   : > { %v1176_v6 = vsel %vm1055_vm1, %v1815_v5, 0.0 }
 0x1cb   : > { %1177 = vadd.xlane.f32.xlu2 %v1176_v6 }
 0x22a   : > { %v1169_v7 = vpop.xlane.xlu0 %1168 }
 0x22b   : > { %1816 = vrcp.f32 %v1169_v7 }
 0x231   : > { %v1817_v8 = vpop.eup %1816 }
 0x232   : > { %v1183_v9 = vmul.f32 %v1817_v8, %v1809_v56  ;;  %v1172_v10 = vpop.xlane.xlu1 %1171  ;;  %v1801_v56 = vld [vmem:[%s2213_s9] ss:$0 sm:$0xff] }
 0x233   : > { %1818 = vrcp.f32 %v1172_v10 }
 0x234   : > { %v1187_v11 = vpack.c.bf16 %v1183_v9, %v1183_v9 }
 0x236   : > { %v1175_v13 = vpop.xlane.xlu2 %1174  ;;  %1713 = vmatmul.msk.bf16.vlgmr.msra.gmra.mxu0 %vm1055_vm1, %v1187_v11  ;;  %v1774_v11 = vld [vmem:[%s2216_s12 + $0x8] sm:$0xff] }
 0x237   : > { %1820 = vrcp.f32 %v1175_v13  ;;  %1443 = vmatpush.bf16.msra.mxu0 %v1774_v11  ;;  %v1773_v13 = vld [vmem:[%s2216_s12] sm:$0xff] }
 0x239   : > { %v1819_v14 = vpop.eup %1818 }
 0x23a   : > { %v1184_v15 = vmul.f32 %v1819_v14, %v1811_v62  ;;  %v1778_v14 = vld [vmem:[%s2218_s14 + $0x18] sm:$0xff] }
 0x23b   : > { %1444 = vmatpush.bf16.msra.mxu0 %v1773_v13 }
 0x23c   : > { %v1188_v16 = vpack.c.bf16 %v1184_v15, %v1184_v15 }
 0x23d   : > { %v1821_v17 = vpop.eup %1820 }
 0x23e   : > { %v1185_v18 = vmul.f32 %v1821_v17, %v1813_v2  ;;  %v1178_v19 = vpop.xlane.xlu2 %1177  ;;  %1714 = vmatmul.msk.bf16.vlgmr.msra.gmra.mxu1 %vm1055_vm1, %v1188_v16  ;;  %v1777_v17 = vld [vmem:[%s2218_s14 + $0x10] sm:$0xff] }
 0x23f   : > { %1822 = vrcp.f32 %v1178_v19  ;;  %1487 = vmatpush.bf16.msra.mxu1 %v1778_v14 }
 0x240   : > { %v1189_v20 = vpack.c.bf16 %v1185_v18, %v1185_v18  ;;  %1824 = vrcp.f32 %v1838_v0 }
 0x242   : > { %1715 = vmatmul.msk.bf16.vlgmr.msra.gmra.mxu2 %vm1055_vm1, %v1189_v20 }
 0x243   : > { %1488 = vmatpush.bf16.msra.mxu1 %v1777_v17 }
 0x245   : > { %v1823_v21 = vpop.eup %1822 }
 0x246   : > { %v1186_v22 = vmul.f32 %v1823_v21, %v1815_v5  ;;  %v1825_v1 = vpop.eup %1824 }
 0x247   : > { %v1371_v2 = vmul.f32 32.0, %v1825_v1  ;;  %vm1375_vm3 = vweird.f32 %v1825_v1 }
 0x248   : > { %v1190_v23 = vpack.c.bf16 %v1186_v22, %v1186_v22 }
 0x249   : > { %v1372_v3 = vsub.f32 1.0, %v1371_v2 }
 0x24a   : > { %1716 = vmatmul.msk.bf16.vlgmr.msra.gmra.mxu3 %vm1055_vm1, %v1190_v23 }
 0x24b   : > { %v1373_v4 = vmul.f32 %v1825_v1, %v1372_v3 }
 0x24d   : > { %v1374_v5 = vadd.f32 %v1825_v1, %v1373_v4 }
 0x24f   : > { %v1376_v6 = vsel %vm1375_vm3, %v1825_v1, %v1374_v5 }
 0x2b3   : > { %v1211_v32 = vpop.f32.mrf.mxu0 }
 0x2b4   : > { %v1272_v33 = vpack.c.bf16 %v1211_v32, %v1211_v32  ;;  %v1776_v32 = vld [vmem:[%s2218_s14 + $0x8] sm:$0xff] }
 0x2b5   : > { %1489 = vmatpush.bf16.msra.mxu1 %v1776_v32 }
 0x2b6   : > { %1717 = vmatmul.msk.bf16.vlgmr.msrb.gmra.mxu0 %vm1055_vm1, %v1272_v33  ;;  %v1775_v33 = vld [vmem:[%s2218_s14] sm:$0xff] }
 0x2b9   : > { %1490 = vmatpush.bf16.msra.mxu1 %v1775_v33 }
 0x2bb   : > { %v1213_v34 = vpop.f32.mrf.mxu0  ;;  %v1230_v35 = vpop.f32.mrf.mxu1 }
 0x2bc   : > { %v1273_v36 = vpack.c.bf16 %v1230_v35, %v1230_v35  ;;  %v1804_v34 = vld [vmem:[%s2217_s13] ss:$0 sm:$0xff] }
 0x2be   : > { %1718 = vmatmul.msk.bf16.vlgmr.msrb.gmra.mxu1 %vm1055_vm1, %v1273_v36 }
 0x2c3   : > { %v1232_v37 = vpop.f32.mrf.mxu1 }
 0x2c5   : > { %v1249_v38 = vpop.f32.mrf.mxu2 }
 0x2c6   : > { %v1274_v39 = vpack.c.bf16 %v1249_v38, %v1249_v38 }
 0x2c8   : > { %1719 = vmatmul.msk.bf16.vlgmr.msrb.gmra.mxu2 %vm1055_vm1, %v1274_v39 }
 0x2cd   : > { %v1251_v40 = vpop.f32.mrf.mxu2  ;;  %v1268_v41 = vpop.f32.mrf.mxu3 }
 0x2ce   : > { %v1275_v42 = vpack.c.bf16 %v1268_v41, %v1268_v41  ;;  %v1805_v40 = vld [vmem:[%s2219_s15] ss:$0 sm:$0xff] }
 0x2d0   : > { %1720 = vmatmul.msk.bf16.vlgmr.msrb.gmra.mxu3 %vm1055_vm1, %v1275_v42 }
 0x2d5   : > { %v1270_v43 = vpop.f32.mrf.mxu3 }
 0x333   : > { %v1291_v44 = vpop.f32.mrf.mxu0 }
 0x334   : > { %v1352_v50 = vsel %vm731_vm0, %v1291_v44, 0.0 }
 0x33b   : > { %v1293_v45 = vpop.f32.mrf.mxu0  ;;  %v1310_v46 = vpop.f32.mrf.mxu1 }
 0x33c   : > { %v1353_v49 = vsel %vm731_vm0, %v1310_v46, 0.0 }
 0x33d   : > { %v1354_v52 = vadd.f32 %v1353_v49, %v1352_v50 }
 0x343   : > { %v1312_v47 = vpop.f32.mrf.mxu1 }
 0x34b   : > { %v1329_v48 = vpop.f32.mrf.mxu2 }
 0x34c   : > { %v1355_v51 = vsel %vm731_vm0, %v1329_v48, 0.0 }
 0x34d   : > { %v1356_v53 = vadd.f32 %v1355_v51, %v1354_v52 }
 0x353   : > { %v1331_v54 = vpop.f32.mrf.mxu2  ;;  %v1348_v55 = vpop.f32.mrf.mxu3 }
 0x354   : > { %v1357_v57 = vsel %vm731_vm0, %v1348_v55, 0.0 }
 0x355   : > { %v1358_v58 = vadd.f32 %v1357_v57, %v1356_v53 }
 0x357   : > { %v1363_v60 = vadd.f32 %v1801_v56, %v1358_v58 }
 0x359   : > { %v1364_v61 = vadd.f32 %v1363_v60, %v641_v59  ;;  %v1806_v60 = vld [vmem:[%s2220_s16] ss:$0 sm:$0xff] }
 0x35b   : > { %v1350_v62 = vpop.f32.mrf.mxu3  ;;  %v1367_v63 = vsel %vm731_vm0, %v1364_v61, 0.0 }
 0x35c   : > { %1368 = vadd.xlane.f32.xlu2 %v1367_v63  ;;  %v1807_v62 = vld [vmem:[%s2221_s17] ss:$0 sm:$0xff] }
 0x3cf   : > { %v1369_v7 = vpop.xlane.xlu2 %1368 }
 0x3d0   : > { %v1377_v8 = vmul.f32 %v1376_v6, %v1369_v7 }
 0x3d2   : > { %v1378_v9 = vsub.f32 %v1364_v61, %v1377_v8 }
 0x3d4   : > { %v1379_v10 = vmul.f32 %v1378_v9, %v1378_v9 }
 0x3d6   : > { %v1380_v12 = vsel %vm731_vm0, %v1379_v10, 0.0 }
 0x3d7   : > { %1381 = vadd.xlane.f32.xlu0 %v1380_v12 }
 0x44a   : > { %v1382_v15 = vpop.xlane.xlu0 %1381 }
 0x44b   : > { %v1383_v16 = vmul.f32 %v1382_v15, %v1376_v6 }
 0x44d   : > { %v1384_v18 = vadd.f32 1e-05, %v1383_v16 }
 0x44f   : > { %1826 = vrsqrt.f32 %v1384_v18  ;;  %vm1391_vm5 = vweird.f32 %v1384_v18 }
 0x455   : > { %v1827_v19 = vpop.eup %1826 }
 0x456   : > { %v1386_v20 = vmul.f32 %v1827_v19, %v1384_v18  ;;  %vm1392_vm4 = vweird.f32 %v1827_v19 }
 0x457   : > { %vm1393_vm6 = vmor %vm1391_vm5, %vm1392_vm4 }
 0x458   : > { %v1387_v21 = vmul.f32 %v1827_v19, %v1386_v20 }
 0x45a   : > { %v1388_v22 = vmul.f32 0.5, %v1387_v21 }
 0x45c   : > { %v1389_v23 = vsub.f32 1.5, %v1388_v22 }
 0x45e   : > { %v1390_v24 = vmul.f32 %v1827_v19, %v1389_v23 }
 0x460   : > { %v1394_v26 = vsel %vm1393_vm6, %v1827_v19, %v1390_v24 }
 0x461   : > { %v1395_v28 = vmul.f32 %v1394_v26, %v1378_v9 }
 0x463   : > { %v1399_v29 = vmul.f32 %v1802_v25, %v1395_v28 }
 0x465   : > { %v1403_v30 = vadd.f32 %v1803_v27, %v1399_v29 }
 0x467   : > { %v1418_v31 = vpack.c.bf16 %v1403_v30, %v1403_v30 }
 0x469   : > { %1729 = vmatmul.msk.bf16.vlgmr.msra.gmra.mxu0 %vm731_vm0, %v1418_v31 }
 0x4e6   : > { %v1446_v35 = vpop.f32.mrf.mxu0 }
 0x4e7   : > { %v1447_v36 = vadd.f32 %v1804_v34, %v1446_v35 }
 0x4e9   : > { %v1450_v37 = vmax.f32 %v1447_v36, 0.0 }
 0x4eb   : > { %v1451_v38 = vpack.c.bf16 %v1450_v37, %v1450_v37 }
 0x4ed   : > { %1746 = vmatmul.msk.bf16.vlgmr.msra.gmra.mxu1 %vm1479_vm7, %v1451_v38 }
 0x4ee   : > { %v1448_v39 = vpop.f32.mrf.mxu0 }
 0x56a   : > { %v1492_v41 = vpop.f32.mrf.mxu1 }
 0x56b   : > { %v1493_v42 = vadd.f32 %v1805_v40, %v1492_v41 }
 0x56d   : > { %v1496_v43 = vadd.f32 %v1493_v42, %v1403_v30 }
 0x56f   : > { %v1499_v44 = vsel %vm731_vm0, %v1496_v43, 0.0 }
 0x570   : > { %1500 = vadd.xlane.f32.xlu1 %v1499_v44 }
 0x572   : > { %v1494_v45 = vpop.f32.mrf.mxu1 }
 0x5e3   : > { %v1501_v46 = vpop.xlane.xlu1 %1500 }
 0x5e4   : > { %v1502_v47 = vmul.f32 %v1501_v46, %v1376_v6 }
 0x5e6   : > { %v1503_v48 = vsub.f32 %v1496_v43, %v1502_v47 }
 0x5e8   : > { %v1504_v49 = vmul.f32 %v1503_v48, %v1503_v48 }
 0x5ea   : > { %v1505_v50 = vsel %vm731_vm0, %v1504_v49, 0.0 }
 0x5eb   : > { %1506 = vadd.xlane.f32.xlu2 %v1505_v50 }
 0x65e   : > { %v1507_v51 = vpop.xlane.xlu2 %1506 }
 0x65f   : > { %v1508_v52 = vmul.f32 %v1507_v51, %v1376_v6 }
 0x661   : > { %v1509_v53 = vadd.f32 1e-05, %v1508_v52 }
 0x663   : > { %1828 = vrsqrt.f32 %v1509_v53  ;;  %vm1516_vm9 = vweird.f32 %v1509_v53 }
 0x669   : > { %v1829_v54 = vpop.eup %1828 }
 0x66a   : > { %v1511_v55 = vmul.f32 %v1829_v54, %v1509_v53  ;;  %vm1517_vm8 = vweird.f32 %v1829_v54 }
 0x66b   : > { %vm1518_vm10 = vmor %vm1516_vm9, %vm1517_vm8 }
 0x66c   : > { %v1512_v56 = vmul.f32 %v1829_v54, %v1511_v55 }
 0x66e   : > { %v1513_v57 = vmul.f32 0.5, %v1512_v56 }
 0x670   : > { %v1514_v58 = vsub.f32 1.5, %v1513_v57 }
 0x672   : > { %v1515_v59 = vmul.f32 %v1829_v54, %v1514_v58 }
 0x674   : > { %v1519_v61 = vsel %vm1518_vm10, %v1829_v54, %v1515_v59 }
 0x675   : > { %v1520_v63 = vmul.f32 %v1519_v61, %v1503_v48 }
 0x677   : > { %v1524_v0 = vmul.f32 %v1806_v60, %v1520_v63 }
 0x679   : > { %v1528_v1 = vadd.f32 %v1807_v62, %v1524_v0 }
 0x67b   : > { %v1529_v2 = vpack.c.bf16 %v1528_v1, %v1528_v1 }
 0x67d   : > { %1531 = vst.msk [vmem:[%s638_s28] sm:$0xf] %vm1530_vm11, %v1529_v2 }
 0x67e PF: > { %s30_s1 = sadd.s32 1, %s1836_s1  }
 0x67f   : > { %p27_p4 = scmp.ge.s32.totalorder %s30_s1, 4  }
 0x681   :  { %29 = sbr.rel (!%p27_p4) target bundleno = 6 (0x6), region = 133 }

// kernel: transformer_forward.6
= control target key start
LH: loop header
LB: loop body
LE: loop exit
PB: predicated region body
PF: predicated region fallthrough
CT: control target
= control target key end

     0   :  { %s2256_s0 = inlined_call_operand.vmem [shape: bf16[2,8,32], index: 0, kind: input, shape index: {}]   ;;  %s2257_s1 = inlined_call_operand.vmem [shape: f32[2,1,8], index: 1, kind: input, shape index: {}]   ;;  %s2258_s2 = inlined_call_operand.vmem [shape: bf16[4,32,8], index: 2, kind: input, shape index: {}]   ;;  %s2259_s3 = inlined_call_operand.vmem [shape: f32[4,1,8], index: 3, kind: input, shape index: {}]   ;;  %s2260_s4 = inlined_call_operand.vmem [shape: bf16[4,32,8], index: 4, kind: input, shape index: {}]   ;;  %s2261_s5 = inlined_call_operand.vmem [shape: f32[4,1,8], index: 5, kind: input, shape index: {}]   ;;  %s2262_s6 = inlined_call_operand.vmem [shape: bf16[4,32,8], index: 6, kind: input, shape index: {}]   ;;  %s2263_s7 = inlined_call_operand.vmem [shape: f32[4,1,8], index: 7, kind: input, shape index: {}]   ;;  %s2264_s8 = inlined_call_operand.vmem [shape: bf16[4,8,32], index: 8, kind: input, shape index: {}]   ;;  %s2265_s9 = inlined_call_operand.vmem [shape: f32[1,32], index: 9, kind: input, shape index: {}]   ;;  %s2266_s10 = inlined_call_operand.vmem [shape: f32[1,32], index: 10, kind: input, shape index: {}]   ;;  %s2267_s11 = inlined_call_operand.vmem [shape: f32[1,32], index: 11, kind: input, shape index: {}]   ;;  %s2268_s12 = inlined_call_operand.vmem [shape: bf16[32,64], index: 12, kind: input, shape index: {}]   ;;  %s2269_s13 = inlined_call_operand.vmem [shape: f32[1,64], index: 13, kind: input, shape index: {}]   ;;  %s2270_s14 = inlined_call_operand.vmem [shape: bf16[64,32], index: 14, kind: input, shape index: {}]   ;;  %s2271_s15 = inlined_call_operand.vmem [shape: f32[1,32], index: 15, kind: input, shape index: {}]   ;;  %s2272_s16 = inlined_call_operand.vmem [shape: f32[1,32], index: 16, kind: input, shape index: {}]   ;;  %s2273_s17 = inlined_call_operand.vmem [shape: f32[1,32], index: 17, kind: input, shape index: {}]   ;;  %s2274_s18 = inlined_call_operand.vmem [shape: f32[1,32], index: 18, kind: input, shape index: {}]   ;;  %s2275_s19 = inlined_call_operand.vmem [shape: f32[1,32], index: 19, kind: input, shape index: {}]   ;;  %s2276_s20 = inlined_call_operand.vmem [shape: bf16[2,8,32], index: 20, kind: output, shape index: {}]  }
   0x1   :  { %2282 = sst [smem:[#allocation3_spill]] %s2256_s0 }
   0x2   :  { %2283 = sst [smem:[#allocation4_spill]] %s2257_s1  ;;  %s1980_s1 = smov 0  }
   0x3   :  { %2284 = sst [smem:[#allocation5_spill]] %s2258_s2 }
   0x4   :  { %2285 = sst [smem:[#allocation6_spill]] %s2259_s3 }
   0x5   :  { %2286 = sst [smem:[#allocation7_spill]] %s2260_s4 }
   0x6   :  { %2287 = sst [smem:[#allocation8_spill]] %s2276_s20 }
   0x7 LB: > { %2288 = sst [smem:[#allocation2_spill]] %s1872_s1  ;;  %s1626_s22 = sadd.s32 4294967295, %s1872_s1   ;;  %s1872_s1 = sphi %s1980_s1, %s30_s1  }
   0x8   : > { %p1630_p0 = scmp.ge.s32.totalorder %s1872_s1, 1  ;;  %p569_p1 = scmp.lt.s32.totalorder %s1872_s1, 3 }
   0xa   : > { %p570_p2 = pnand %p1630_p0, %p569_p1 }
   0xb   : > { %s2289_s2 = sld [smem:[#allocation5_spill]] (!%p570_p2)  ;;  %p628_p3 = scmp.lt.s32.totalorder (!%p570_p2), %s1626_s22, 1 }
   0xc   : > { %573 = sbr.rel (%p570_p2) target bundleno = 1931 (0x78b), region = 100  ;;  %s2290_s4 = sld [smem:[#allocation7_spill]] (!%p570_p2) }
   0xd   : > { %s2291_s1 = sld [smem:[#allocation3_spill]] (!%p570_p2) }
   0xe   : > { %s2292_s0 = sld [smem:[#allocation6_spill]] (!%p570_p2) }
   0xf   : > { %s2293_s23 = sld [smem:[#allocation4_spill]] (!%p570_p2) }
  0x11   : > { %v1782_v0 = vld [vmem:[%s2289_s2 + $0x8] sm:$0xff]  ;;  %v1784_v1 = vld [vmem:[%s2289_s2 + $0x18] sm:$0xff]  ;;  %v1781_v4 = vld [vmem:[%s2289_s2] sm:$0xff]  ;;  %s2297_s22 = smov (!%p628_p3, %s1626_s22), 1  ;;  %vm731_vm0 = vcmask 261120   ;;  %vm1055_vm1 = vcmask 64512  }
  0x12   : > { %v1786_v2 = vld [vmem:[%s2289_s2 + $0x28] sm:$0xff]  ;;  %v1788_v3 = vld [vmem:[%s2289_s2 + $0x38] sm:$0xff]  ;;  %741 = vmatpush.bf16.msra.mxu0 %v1782_v0  ;;  %766 = vmatpush.bf16.msra.mxu1 %v1784_v1  ;;  %v1783_v5 = vld [vmem:[%s2289_s2 + $0x10] sm:$0xff]  ;;  %s1631_s26 = sshll.u32 %s2297_s22, 2  ;;  %vm1198_vm2 = vcmask 1043456   ;;  %vm1479_vm7 = vcmask 523264  }
  0x13   : > { %791 = vmatpush.bf16.msra.mxu2 %v1786_v2  ;;  %816 = vmatpush.bf16.msra.mxu3 %v1788_v3  ;;  %v1785_v6 = vld [vmem:[%s2289_s2 + $0x20] sm:$0xff]  ;;  %v1787_v7 = vld [vmem:[%s2289_s2 + $0x30] sm:$0xff]  ;;  %v1790_v8 = vld [vmem:[%s2290_s4 + $0x8] sm:$0xff]  ;;  %s631_s20 = scalar_lea.vmem %s2291_s1, %s1631_s26  ;;  %vm1562_vm14 = vcmask 257024  }
  0x14   : > { %v1792_v9 = vld [vmem:[%s2290_s4 + $0x18] sm:$0xff]  ;;  %v1794_v10 = vld [vmem:[%s2290_s4 + $0x28] sm:$0xff]  ;;  %v2032_v12 = vld [vmem:[%s631_s20] sm:$0xf] }
  0x15   : > { %v1796_v11 = vld [vmem:[%s2290_s4 + $0x38] sm:$0xff]  ;;  %v1789_v13 = vld [vmem:[%s2290_s4] sm:$0xff]  ;;  %v1791_v14 = vld [vmem:[%s2290_s4 + $0x10] sm:$0xff]  ;;  %s634_s24 = scalar_lea.vmem %s2293_s23, %s2297_s22 }
  0x16   : > { %742 = vmatpush.bf16.msra.mxu0 %v1781_v4  ;;  %767 = vmatpush.bf16.msra.mxu1 %v1783_v5  ;;  %v1793_v15 = vld [vmem:[%s2290_s4 + $0x20] sm:$0xff]  ;;  %v1795_v16 = vld [vmem:[%s2290_s4 + $0x30] sm:$0xff]  ;;  %v1802_v17 = vld [vmem:[%s2262_s6 + $0x28] sm:$0xff] }
  0x17   : > { %792 = vmatpush.bf16.msra.mxu2 %v1785_v6  ;;  %817 = vmatpush.bf16.msra.mxu3 %v1787_v7  ;;  %v1798_v18 = vld [vmem:[%s2262_s6 + $0x8] sm:$0xff]  ;;  %v1800_v19 = vld [vmem:[%s2262_s6 + $0x18] sm:$0xff]  ;;  %v1801_v20 = vld [vmem:[%s2262_s6 + $0x20] sm:$0xff] }
  0x18   : > { %v1797_v21 = vld [vmem:[%s2262_s6] sm:$0xff]  ;;  %v1799_v22 = vld [vmem:[%s2262_s6 + $0x10] sm:$0xff]  ;;  %v1804_v23 = vld [vmem:[%s2262_s6 + $0x38] sm:$0xff] }
  0x19   : > { %1641 = vmatmul.msk.bf16.vlgmr.msra.gmra.mxu0 %vm731_vm0, %v2032_v12  ;;  %1650 = vmatmul.msk.bf16.vlgmr.msra.gmra.mxu1 %vm731_vm0, %v2032_v12  ;;  %v1803_v24 = vld [vmem:[%s2262_s6 + $0x30] sm:$0xff]  ;;  %v1824_v31 = vld [vmem:[%s2261_s5] ss:$0 sm:$0xff]  ;;  %v1825_v32 = vld [vmem:[%s2261_s5 + $0x1] ss:$0 sm:$0xff] }
  0x1a   : > { %853 = vmatpush.bf16.msrb.mxu0 %v1790_v8  ;;  %878 = vmatpush.bf16.msrb.mxu1 %v1792_v9  ;;  %v1821_v39 = vld [vmem:[%s2292_s0 + $0x1] ss:$0 sm:$0xff]  ;;  %v1820_v42 = vld [vmem:[%s2292_s0] ss:$0 sm:$0xff]  ;;  %v1826_v43 = vld [vmem:[%s2261_s5 + $0x2] ss:$0 sm:$0xff] }
  0x1b   : > { %1659 = vmatmul.msk.bf16.vlgmr.msra.gmra.mxu2 %vm731_vm0, %v2032_v12  ;;  %1668 = vmatmul.msk.bf16.vlgmr.msra.gmra.mxu3 %vm731_vm0, %v2032_v12  ;;  %v1827_v44 = vld [vmem:[%s2261_s5 + $0x3] ss:$0 sm:$0xff]  ;;  %v1822_v56 = vld [vmem:[%s2292_s0 + $0x2] ss:$0 sm:$0xff]  ;;  %v1828_v5 = vld [vmem:[%s2263_s7] ss:$0 sm:$0xff] }
  0x1c   : > { %903 = vmatpush.bf16.msrb.mxu2 %v1794_v10  ;;  %928 = vmatpush.bf16.msrb.mxu3 %v1796_v11  ;;  %v1823_v57 = vld [vmem:[%s2292_s0 + $0x3] ss:$0 sm:$0xff]  ;;  %v1829_v6 = vld [vmem:[%s2263_s7 + $0x1] ss:$0 sm:$0xff]  ;;  %v1830_v11 = vld [vmem:[%s2263_s7 + $0x2] ss:$0 sm:$0xff] }
  0x1e   : > { %854 = vmatpush.bf16.msrb.mxu0 %v1789_v13  ;;  %879 = vmatpush.bf16.msrb.mxu1 %v1791_v14 }
  0x20   : > { %904 = vmatpush.bf16.msrb.mxu2 %v1793_v15  ;;  %929 = vmatpush.bf16.msrb.mxu3 %v1795_v16 }
  0x22   : > { %965 = vmatpush.bf16.msra.mxu0 %v1798_v18  ;;  %990 = vmatpush.bf16.msra.mxu1 %v1800_v19 }
  0x24   : > { %1015 = vmatpush.bf16.msra.mxu2 %v1802_v17  ;;  %1040 = vmatpush.bf16.msra.mxu3 %v1804_v23  ;;  %v1831_v23 = vld [vmem:[%s2263_s7 + $0x3] ss:$0 sm:$0xff] }
  0x26   : > { %966 = vmatpush.bf16.msra.mxu0 %v1797_v21  ;;  %991 = vmatpush.bf16.msra.mxu1 %v1799_v22 }
  0x28   : > { %1016 = vmatpush.bf16.msra.mxu2 %v1801_v20  ;;  %1041 = vmatpush.bf16.msra.mxu3 %v1803_v24 }
  0x29   : > { %1677 = vmatmul.msk.bf16.vlgmr.msrb.gmra.mxu0 %vm731_vm0, %v2032_v12  ;;  %1686 = vmatmul.msk.bf16.vlgmr.msrb.gmra.mxu1 %vm731_vm0, %v2032_v12 }
  0x2b   : > { %1695 = vmatmul.msk.bf16.vlgmr.msrb.gmra.mxu2 %vm731_vm0, %v2032_v12  ;;  %1704 = vmatmul.msk.bf16.vlgmr.msrb.gmra.mxu3 %vm731_vm0, %v2032_v12 }
  0x39   : > { %1713 = vmatmul.msk.bf16.vlgmr.msra.gmra.mxu0 %vm731_vm0, %v2032_v12  ;;  %1722 = vmatmul.msk.bf16.vlgmr.msra.gmra.mxu1 %vm731_vm0, %v2032_v12 }
  0x3b   : > { %1731 = vmatmul.msk.bf16.vlgmr.msra.gmra.mxu2 %vm731_vm0, %v2032_v12  ;;  %1740 = vmatmul.msk.bf16.vlgmr.msra.gmra.mxu3 %vm731_vm0, %v2032_v12 }
  0x96   : > { %v744_v25 = vpop.f32.mrf.mxu0  ;;  %v769_v26 = vpop.f32.mrf.mxu1 }
  0x97   : > { %v770_v47 = vadd.f32 %v1821_v39, %v769_v26  ;;  %v745_v50 = vadd.f32 %v1820_v42, %v744_v25 }
  0x99   : > { %v1048_v55 = vpack.c.bf16 %v770_v47, %v770_v47  ;;  %v1047_v60 = vpack.c.bf16 %v745_v50, %v745_v50 }
  0x9e   : > { %v794_v27 = vpop.f32.mrf.mxu2  ;;  %v819_v28 = vpop.f32.mrf.mxu3 }
  0x9f   : > { %v746_v29 = vpop.f32.mrf.mxu0  ;;  %v771_v30 = vpop.f32.mrf.mxu1  ;;  %v795_v63 = vadd.f32 %v1822_v56, %v794_v27  ;;  %v820_v0 = vadd.f32 %v1823_v57, %v819_v28 }
  0xa0   : > { %v1832_v30 = vld [vmem:[%s634_s24] ss:$0 sm:$0xff]  ;;  %s2294_s24 = sld [smem:[#allocation8_spill]] }
  0xa1   : > { %v1049_v3 = vpack.c.bf16 %v795_v63, %v795_v63  ;;  %v1050_v4 = vpack.c.bf16 %v820_v0, %v820_v0 }
  0xa6   : > { %v796_v33 = vpop.f32.mrf.mxu2  ;;  %v821_v34 = vpop.f32.mrf.mxu3  ;;  %s638_s3 = scalar_lea.vmem %s2294_s24, %s1631_s26 }
  0xa7   : > { %v856_v35 = vpop.f32.mrf.mxu0  ;;  %v881_v36 = vpop.f32.mrf.mxu1 }
  0xa8   : > { %v857_v37 = vadd.f32 %v1824_v31, %v856_v35  ;;  %v882_v38 = vadd.f32 %v1825_v32, %v881_v36 }
  0xaa   : > { %v1051_v40 = vpack.c.bf16 %v857_v37, %v857_v37  ;;  %v1052_v41 = vpack.c.bf16 %v882_v38, %v882_v38 }
  0xac   : > { %v1060_v45 = vsel %vm1055_vm1, %v1051_v40, 0  ;;  %v1079_v46 = vsel %vm1055_vm1, %v1052_v41, 0 }
  0xad   : > { %1069 = vmatpush.bf16.xpose.msrb.mxu0 %v1060_v45  ;;  %1088 = vmatpush.bf16.xpose.msrb.mxu1 %v1079_v46 }
  0xae   : > { %v906_v48 = vpop.f32.mrf.mxu2  ;;  %v931_v49 = vpop.f32.mrf.mxu3 }
  0xaf   : > { %v907_v51 = vadd.f32 %v1826_v43, %v906_v48  ;;  %v932_v52 = vadd.f32 %v1827_v44, %v931_v49  ;;  %v858_v53 = vpop.f32.mrf.mxu0  ;;  %v883_v54 = vpop.f32.mrf.mxu1 }
  0xb1   : > { %v1053_v58 = vpack.c.bf16 %v907_v51, %v907_v51  ;;  %v1054_v59 = vpack.c.bf16 %v932_v52, %v932_v52 }
  0xb3   : > { %v1098_v61 = vsel %vm1055_vm1, %v1053_v58, 0  ;;  %v1117_v62 = vsel %vm1055_vm1, %v1054_v59, 0 }
  0xb4   : > { %1107 = vmatpush.bf16.xpose.msrb.mxu2 %v1098_v61  ;;  %1126 = vmatpush.bf16.xpose.msrb.mxu3 %v1117_v62 }
  0xb5   : > { %1741 = vmatmul.msk.bf16.vlgmr.msrb.gmra.mxu0 %vm1055_vm1, %v1047_v60  ;;  %1742 = vmatmul.msk.bf16.vlgmr.msrb.gmra.mxu1 %vm1055_vm1, %v1048_v55 }
  0xb6   : > { %v908_v1 = vpop.f32.mrf.mxu2  ;;  %v933_v2 = vpop.f32.mrf.mxu3 }
  0xb7   : > { %v968_v7 = vpop.f32.mrf.mxu0  ;;  %v993_v8 = vpop.f32.mrf.mxu1 }
  0xb8   : > { %v969_v9 = vadd.f32 %v1828_v5, %v968_v7  ;;  %v994_v10 = vadd.f32 %v1829_v6, %v993_v8 }
  0xba   : > { %v1191_v13 = vpack.c.bf16 %v969_v9, %v969_v9  ;;  %v1192_v14 = vpack.c.bf16 %v994_v10, %v994_v10 }
  0xbb   : > { %1743 = vmatmul.msk.bf16.vlgmr.msrb.gmra.mxu2 %vm1055_vm1, %v1049_v3  ;;  %1744 = vmatmul.msk.bf16.vlgmr.msrb.gmra.mxu3 %vm1055_vm1, %v1050_v4 }
  0xbc   : > { %v1200_v16 = vsel %vm1198_vm2, %v1191_v13, 0  ;;  %v1219_v17 = vsel %vm1198_vm2, %v1192_v14, 0 }
  0xbd   : > { %1209 = vmatpush.bf16.msra.mxu0 %v1200_v16  ;;  %1228 = vmatpush.bf16.msra.mxu1 %v1219_v17 }
  0xbe   : > { %v1018_v15 = vpop.f32.mrf.mxu2  ;;  %v1043_v24 = vpop.f32.mrf.mxu3 }
  0xbf   : > { %v1019_v18 = vadd.f32 %v1830_v11, %v1018_v15  ;;  %v970_v20 = vpop.f32.mrf.mxu0  ;;  %v995_v21 = vpop.f32.mrf.mxu1  ;;  %v1044_v26 = vadd.f32 %v1831_v23, %v1043_v24  ;;  %v703_v24 = vld [vmem:[%s2264_s8] sm:$0xf] }
  0xc1   : > { %v1193_v19 = vpack.c.bf16 %v1019_v18, %v1019_v18  ;;  %v1194_v27 = vpack.c.bf16 %v1044_v26, %v1044_v26  ;;  %v704_v26 = vld [vmem:[%s2264_s8 + $0x4] sm:$0xf] }
  0xc3   : > { %v1238_v22 = vsel %vm1198_vm2, %v1193_v19, 0  ;;  %v1257_v28 = vsel %vm1198_vm2, %v1194_v27, 0  ;;  %v1299_v27 = vsel %vm1198_vm2, %v704_v26, 0 }
  0xc4   : > { %1247 = vmatpush.bf16.msra.mxu2 %v1238_v22  ;;  %1266 = vmatpush.bf16.msra.mxu3 %v1257_v28  ;;  %v705_v28 = vld [vmem:[%s2264_s8 + $0x8] sm:$0xf] }
  0xc5   : > { %1308 = vmatpush.bf16.msrb.mxu1 %v1299_v27  ;;  %v1835_v27 = vld [vmem:[%s2267_s11] ss:$0 sm:$0xff] }
  0xc6   : > { %v1020_v25 = vpop.f32.mrf.mxu2  ;;  %v1045_v29 = vpop.f32.mrf.mxu3 }
  0xc7   : > { %v1280_v25 = vsel %vm1198_vm2, %v703_v24, 0  ;;  %v1318_v29 = vsel %vm1198_vm2, %v705_v28, 0 }
  0xc8   : > { %1289 = vmatpush.bf16.msrb.mxu0 %v1280_v25  ;;  %1327 = vmatpush.bf16.msrb.mxu2 %v1318_v29  ;;  %v1834_v25 = vld [vmem:[%s2266_s10] ss:$0 sm:$0xff] }
 0x132   : > { %v1071_v31 = vpop.f32.mrf.mxu0  ;;  %v1090_v32 = vpop.f32.mrf.mxu1 }
 0x133   : > { %v1132_v33 = vmul.f32 0.35355338, %v1071_v31  ;;  %v1133_v35 = vmul.f32 0.35355338, %v1090_v32 }
 0x135   : > { %v1139_v34 = vadd.f32 %v1832_v30, %v1132_v33  ;;  %v1140_v39 = vadd.f32 %v1832_v30, %v1133_v35 }
 0x137   : > { %v1143_v36 = vsel %vm1055_vm1, %v1139_v34, -inf  ;;  %v1146_v43 = vsel %vm1055_vm1, %v1140_v39, -inf }
 0x138   : > { %1144 = vmax.xlane.f32.xlu1 %v1143_v36 }
 0x13a   : > { %v1073_v37 = vpop.f32.mrf.mxu0  ;;  %v1092_v38 = vpop.f32.mrf.mxu1 }
 0x13e   : > { %v1109_v40 = vpop.f32.mrf.mxu2  ;;  %v1128_v41 = vpop.f32.mrf.mxu3 }
 0x13f   : > { %v1134_v42 = vmul.f32 0.35355338, %v1109_v40  ;;  %v1135_v45 = vmul.f32 0.35355338, %v1128_v41 }
 0x140   : > { %1147 = vmax.xlane.f32.xlu1 %v1146_v43 }
 0x141   : > { %v1141_v44 = vadd.f32 %v1832_v30, %v1134_v42  ;;  %v1142_v49 = vadd.f32 %v1832_v30, %v1135_v45  ;;  %v706_v30 = vld [vmem:[%s2264_s8 + $0xc] sm:$0xf] }
 0x142   : > { %v1337_v31 = vsel %vm1198_vm2, %v706_v30, 0 }
 0x143   : > { %v1149_v46 = vsel %vm1055_vm1, %v1141_v44, -inf  ;;  %v1152_v50 = vsel %vm1055_vm1, %v1142_v49, -inf  ;;  %1346 = vmatpush.bf16.msrb.mxu3 %v1337_v31 }
 0x144   : > { %1150 = vmax.xlane.f32.xlu0 %v1149_v46 }
 0x146   : > { %v1111_v47 = vpop.f32.mrf.mxu2  ;;  %v1130_v48 = vpop.f32.mrf.mxu3 }
 0x14c   : > { %1153 = vmax.xlane.f32.xlu0 %v1152_v50 }
 0x1ab   : > { %v1145_v51 = vpop.xlane.xlu1 %1144 }
 0x1ac   : > { %v1155_v52 = vsub.f32 %v1139_v34, %v1145_v51 }
 0x1ae   : > { %v1159_v53 = vmul.f32 1.442695, %v1155_v52 }
 0x1b0   : > { %1842 = vpow2.f32 %v1159_v53 }
 0x1b3   : > { %v1148_v54 = vpop.xlane.xlu1 %1147 }
 0x1b4   : > { %v1156_v55 = vsub.f32 %v1140_v39, %v1148_v54 }
 0x1b6   : > { %v1843_v56 = vpop.eup %1842  ;;  %v1161_v57 = vmul.f32 1.442695, %v1156_v55 }
 0x1b7   : > { %v1151_v58 = vpop.xlane.xlu0 %1150  ;;  %v1167_v59 = vsel %vm1055_vm1, %v1843_v56, 0.0 }
 0x1b8   : > { %1844 = vpow2.f32 %v1161_v57  ;;  %v1157_v60 = vsub.f32 %v1141_v44, %v1151_v58  ;;  %1168 = vadd.xlane.f32.xlu0 %v1167_v59  ;;  %v641_v59 = vunpack.c.l.bf16 %v2032_v12 }
 0x1ba   : > { %v1163_v61 = vmul.f32 1.442695, %v1157_v60 }
 0x1bc   : > { %1846 = vpow2.f32 %v1163_v61 }
 0x1be   : > { %v1845_v62 = vpop.eup %1844 }
 0x1bf   : > { %v1154_v63 = vpop.xlane.xlu0 %1153  ;;  %v1170_v0 = vsel %vm1055_vm1, %v1845_v62, 0.0 }
 0x1c0   : > { %v1158_v1 = vsub.f32 %v1142_v49, %v1154_v63  ;;  %1171 = vadd.xlane.f32.xlu1 %v1170_v0  ;;  %v1874_v0 = vmov 32.0  }
 0x1c2   : > { %v1847_v2 = vpop.eup %1846  ;;  %v1165_v3 = vmul.f32 1.442695, %v1158_v1 }
 0x1c3   : > { %v1173_v4 = vsel %vm1055_vm1, %v1847_v2, 0.0 }
 0x1c4   : > { %1848 = vpow2.f32 %v1165_v3  ;;  %1174 = vadd.xlane.f32.xlu2 %v1173_v4 }
 0x1ca   : > { %v1849_v5 = vpop.eup %1848 }
 0x1cb   : > { %v1176_v6 = vsel %vm1055_vm1, %v1849_v5, 0.0 }
 0x1cc   : > { %1177 = vadd.xlane.f32.xlu2 %v1176_v6 }
 0x22b   : > { %v1169_v7 = vpop.xlane.xlu0 %1168 }
 0x22c   : > { %1850 = vrcp.f32 %v1169_v7 }
 0x232   : > { %v1851_v8 = vpop.eup %1850 }
 0x233   : > { %v1183_v9 = vmul.f32 %v1851_v8, %v1843_v56  ;;  %v1172_v10 = vpop.xlane.xlu1 %1171  ;;  %v1833_v56 = vld [vmem:[%s2265_s9] ss:$0 sm:$0xff] }
 0x234   : > { %1852 = vrcp.f32 %v1172_v10 }
 0x235   : > { %v1187_v11 = vpack.c.bf16 %v1183_v9, %v1183_v9 }
 0x237   : > { %v1175_v13 = vpop.xlane.xlu2 %1174  ;;  %1745 = vmatmul.msk.bf16.vlgmr.msra.gmra.mxu0 %vm1055_vm1, %v1187_v11  ;;  %v1806_v11 = vld [vmem:[%s2268_s12 + $0x8] sm:$0xff] }
 0x238   : > { %1854 = vrcp.f32 %v1175_v13  ;;  %1443 = vmatpush.bf16.msra.mxu0 %v1806_v11  ;;  %v1805_v13 = vld [vmem:[%s2268_s12] sm:$0xff] }
 0x23a   : > { %v1853_v14 = vpop.eup %1852 }
 0x23b   : > { %v1184_v15 = vmul.f32 %v1853_v14, %v1845_v62  ;;  %v1810_v14 = vld [vmem:[%s2270_s14 + $0x18] sm:$0xff] }
 0x23c   : > { %1444 = vmatpush.bf16.msra.mxu0 %v1805_v13 }
 0x23d   : > { %v1188_v16 = vpack.c.bf16 %v1184_v15, %v1184_v15 }
 0x23e   : > { %v1855_v17 = vpop.eup %1854 }
 0x23f   : > { %v1185_v18 = vmul.f32 %v1855_v17, %v1847_v2  ;;  %v1178_v19 = vpop.xlane.xlu2 %1177  ;;  %1746 = vmatmul.msk.bf16.vlgmr.msra.gmra.mxu1 %vm1055_vm1, %v1188_v16  ;;  %v1809_v17 = vld [vmem:[%s2270_s14 + $0x10] sm:$0xff] }
 0x240   : > { %1856 = vrcp.f32 %v1178_v19  ;;  %1487 = vmatpush.bf16.msra.mxu1 %v1810_v14 }
 0x241   : > { %v1189_v20 = vpack.c.bf16 %v1185_v18, %v1185_v18  ;;  %1858 = vrcp.f32 %v1874_v0 }
 0x243   : > { %1747 = vmatmul.msk.bf16.vlgmr.msra.gmra.mxu2 %vm1055_vm1, %v1189_v20 }
 0x244   : > { %1488 = vmatpush.bf16.msra.mxu1 %v1809_v17 }
 0x246   : > { %v1857_v21 = vpop.eup %1856 }
 0x247   : > { %v1186_v22 = vmul.f32 %v1857_v21, %v1849_v5  ;;  %v1859_v1 = vpop.eup %1858 }
 0x248   : > { %v1371_v2 = vmul.f32 32.0, %v1859_v1  ;;  %vm1375_vm3 = vweird.f32 %v1859_v1 }
 0x249   : > { %v1190_v23 = vpack.c.bf16 %v1186_v22, %v1186_v22 }
 0x24a   : > { %v1372_v3 = vsub.f32 1.0, %v1371_v2 }
 0x24b   : > { %1748 = vmatmul.msk.bf16.vlgmr.msra.gmra.mxu3 %vm1055_vm1, %v1190_v23 }
 0x24c   : > { %v1373_v4 = vmul.f32 %v1859_v1, %v1372_v3 }
 0x24e   : > { %v1374_v5 = vadd.f32 %v1859_v1, %v1373_v4 }
 0x250   : > { %v2192_v6 = vsel %vm1375_vm3, %v1859_v1, %v1374_v5 }
 0x2b4   : > { %v1211_v32 = vpop.f32.mrf.mxu0 }
 0x2b5   : > { %v1272_v33 = vpack.c.bf16 %v1211_v32, %v1211_v32  ;;  %v1808_v32 = vld [vmem:[%s2270_s14 + $0x8] sm:$0xff] }
 0x2b6   : > { %1489 = vmatpush.bf16.msra.mxu1 %v1808_v32 }
 0x2b7   : > { %1749 = vmatmul.msk.bf16.vlgmr.msrb.gmra.mxu0 %vm1055_vm1, %v1272_v33  ;;  %v1807_v33 = vld [vmem:[%s2270_s14] sm:$0xff] }
 0x2ba   : > { %1490 = vmatpush.bf16.msra.mxu1 %v1807_v33 }
 0x2bc   : > { %v1213_v34 = vpop.f32.mrf.mxu0  ;;  %v1230_v35 = vpop.f32.mrf.mxu1 }
 0x2bd   : > { %v1273_v36 = vpack.c.bf16 %v1230_v35, %v1230_v35  ;;  %v1836_v34 = vld [vmem:[%s2269_s13] ss:$0 sm:$0xff] }
 0x2bf   : > { %1750 = vmatmul.msk.bf16.vlgmr.msrb.gmra.mxu1 %vm1055_vm1, %v1273_v36 }
 0x2c4   : > { %v1232_v37 = vpop.f32.mrf.mxu1 }
 0x2c6   : > { %v1249_v38 = vpop.f32.mrf.mxu2 }
 0x2c7   : > { %v1274_v39 = vpack.c.bf16 %v1249_v38, %v1249_v38 }
 0x2c9   : > { %1751 = vmatmul.msk.bf16.vlgmr.msrb.gmra.mxu2 %vm1055_vm1, %v1274_v39 }
 0x2ce   : > { %v1251_v40 = vpop.f32.mrf.mxu2  ;;  %v1268_v41 = vpop.f32.mrf.mxu3 }
 0x2cf   : > { %v1275_v42 = vpack.c.bf16 %v1268_v41, %v1268_v41  ;;  %v1837_v40 = vld [vmem:[%s2271_s15] ss:$0 sm:$0xff] }
 0x2d1   : > { %1752 = vmatmul.msk.bf16.vlgmr.msrb.gmra.mxu3 %vm1055_vm1, %v1275_v42 }
 0x2d6   : > { %v1270_v43 = vpop.f32.mrf.mxu3 }
 0x334   : > { %v1291_v44 = vpop.f32.mrf.mxu0 }
 0x335   : > { %v1352_v50 = vsel %vm731_vm0, %v1291_v44, 0.0 }
 0x33c   : > { %v1293_v45 = vpop.f32.mrf.mxu0  ;;  %v1310_v46 = vpop.f32.mrf.mxu1 }
 0x33d   : > { %v1353_v49 = vsel %vm731_vm0, %v1310_v46, 0.0 }
 0x33e   : > { %v1354_v52 = vadd.f32 %v1353_v49, %v1352_v50 }
 0x344   : > { %v1312_v47 = vpop.f32.mrf.mxu1 }
 0x34c   : > { %v1329_v48 = vpop.f32.mrf.mxu2 }
 0x34d   : > { %v1355_v51 = vsel %vm731_vm0, %v1329_v48, 0.0 }
 0x34e   : > { %v1356_v53 = vadd.f32 %v1355_v51, %v1354_v52 }
 0x354   : > { %v1331_v54 = vpop.f32.mrf.mxu2  ;;  %v1348_v55 = vpop.f32.mrf.mxu3 }
 0x355   : > { %v1357_v57 = vsel %vm731_vm0, %v1348_v55, 0.0 }
 0x356   : > { %v1358_v58 = vadd.f32 %v1357_v57, %v1356_v53 }
 0x358   : > { %v1363_v60 = vadd.f32 %v1833_v56, %v1358_v58 }
 0x35a   : > { %v1364_v61 = vadd.f32 %v1363_v60, %v641_v59  ;;  %v1838_v60 = vld [vmem:[%s2272_s16] ss:$0 sm:$0xff] }
 0x35c   : > { %v1350_v62 = vpop.f32.mrf.mxu3  ;;  %v1367_v63 = vsel %vm731_vm0, %v1364_v61, 0.0 }
 0x35d   : > { %1368 = vadd.xlane.f32.xlu2 %v1367_v63  ;;  %v1839_v63 = vld [vmem:[%s2273_s17] ss:$0 sm:$0xff] }
 0x3d0   : > { %v1369_v7 = vpop.xlane.xlu2 %1368 }
 0x3d1   : > { %v1377_v8 = vmul.f32 %v2192_v6, %v1369_v7 }
 0x3d3   : > { %v1378_v12 = vsub.f32 %v1364_v61, %v1377_v8 }
 0x3d5   : > { %v1379_v9 = vmul.f32 %v1378_v12, %v1378_v12 }
 0x3d7   : > { %v1380_v10 = vsel %vm731_vm0, %v1379_v9, 0.0 }
 0x3d8   : > { %1381 = vadd.xlane.f32.xlu0 %v1380_v10 }
 0x44b   : > { %v1382_v15 = vpop.xlane.xlu0 %1381 }
 0x44c   : > { %v1383_v16 = vmul.f32 %v1382_v15, %v2192_v6 }
 0x44e   : > { %v1384_v18 = vadd.f32 1e-05, %v1383_v16 }
 0x450   : > { %1860 = vrsqrt.f32 %v1384_v18  ;;  %vm1391_vm5 = vweird.f32 %v1384_v18 }
 0x456   : > { %v1861_v19 = vpop.eup %1860 }
 0x457   : > { %v1386_v20 = vmul.f32 %v1861_v19, %v1384_v18  ;;  %vm1392_vm4 = vweird.f32 %v1861_v19  ;;  %v1840_v18 = vld [vmem:[%s2274_s18] ss:$0 sm:$0xff] }
 0x458   : > { %vm1393_vm6 = vmor %vm1391_vm5, %vm1392_vm4 }
 0x459   : > { %v1387_v21 = vmul.f32 %v1861_v19, %v1386_v20 }
 0x45b   : > { %v1388_v22 = vmul.f32 0.5, %v1387_v21 }
 0x45d   : > { %v1389_v23 = vsub.f32 1.5, %v1388_v22 }
 0x45f   : > { %v1390_v24 = vmul.f32 %v1861_v19, %v1389_v23 }
 0x461   : > { %v1394_v26 = vsel %vm1393_vm6, %v1861_v19, %v1390_v24 }
 0x462   : > { %v1395_v28 = vmul.f32 %v1394_v26, %v1378_v12 }
 0x464   : > { %v1399_v29 = vmul.f32 %v1834_v25, %v1395_v28 }
 0x466   : > { %v1403_v30 = vadd.f32 %v1835_v27, %v1399_v29 }
 0x468   : > { %v1418_v31 = vpack.c.bf16 %v1403_v30, %v1403_v30 }
 0x46a   : > { %1761 = vmatmul.msk.bf16.vlgmr.msra.gmra.mxu0 %vm731_vm0, %v1418_v31 }
 0x4e7   : > { %v1446_v35 = vpop.f32.mrf.mxu0 }
 0x4e8   : > { %v1447_v36 = vadd.f32 %v1836_v34, %v1446_v35 }
 0x4ea   : > { %v1450_v37 = vmax.f32 %v1447_v36, 0.0 }
 0x4ec   : > { %v1451_v38 = vpack.c.bf16 %v1450_v37, %v1450_v37 }
 0x4ee   : > { %1778 = vmatmul.msk.bf16.vlgmr.msra.gmra.mxu1 %vm1479_vm7, %v1451_v38 }
 0x4ef   : > { %v1448_v39 = vpop.f32.mrf.mxu0 }
 0x56b   : > { %v1492_v41 = vpop.f32.mrf.mxu1 }
 0x56c   : > { %v1493_v42 = vadd.f32 %v1837_v40, %v1492_v41 }
 0x56e   : > { %v1496_v43 = vadd.f32 %v1493_v42, %v1403_v30 }
 0x570   : > { %v1499_v44 = vsel %vm731_vm0, %v1496_v43, 0.0 }
 0x571   : > { %1500 = vadd.xlane.f32.xlu1 %v1499_v44 }
 0x573   : > { %v1494_v45 = vpop.f32.mrf.mxu1 }
 0x5e4   : > { %v1501_v46 = vpop.xlane.xlu1 %1500 }
 0x5e5   : > { %v1502_v47 = vmul.f32 %v1501_v46, %v2192_v6 }
 0x5e7   : > { %v1503_v48 = vsub.f32 %v1496_v43, %v1502_v47 }
 0x5e9   : > { %v1504_v49 = vmul.f32 %v1503_v48, %v1503_v48 }
 0x5eb   : > { %v1505_v50 = vsel %vm731_vm0, %v1504_v49, 0.0 }
 0x5ec   : > { %1506 = vadd.xlane.f32.xlu2 %v1505_v50 }
 0x65f   : > { %v1507_v51 = vpop.xlane.xlu2 %1506 }
 0x660   : > { %v1508_v52 = vmul.f32 %v1507_v51, %v2192_v6 }
 0x662   : > { %v1509_v53 = vadd.f32 1e-05, %v1508_v52 }
 0x664   : > { %1862 = vrsqrt.f32 %v1509_v53  ;;  %vm1516_vm9 = vweird.f32 %v1509_v53 }
 0x66a   : > { %v1863_v54 = vpop.eup %1862 }
 0x66b   : > { %v1511_v55 = vmul.f32 %v1863_v54, %v1509_v53  ;;  %vm1517_vm8 = vweird.f32 %v1863_v54 }
 0x66c   : > { %vm1518_vm10 = vmor %vm1516_vm9, %vm1517_vm8 }
 0x66d   : > { %v1512_v56 = vmul.f32 %v1863_v54, %v1511_v55 }
 0x66f   : > { %v1513_v57 = vmul.f32 0.5, %v1512_v56 }
 0x671   : > { %v1514_v58 = vsub.f32 1.5, %v1513_v57 }
 0x673   : > { %v1515_v59 = vmul.f32 %v1863_v54, %v1514_v58 }
 0x675   : > { %v1519_v61 = vsel %vm1518_vm10, %v1863_v54, %v1515_v59 }
 0x676   : > { %v1520_v62 = vmul.f32 %v1519_v61, %v1503_v48 }
 0x678   : > { %v1524_v0 = vmul.f32 %v1838_v60, %v1520_v62 }
 0x67a   : > { %v1528_v1 = vadd.f32 %v1839_v63, %v1524_v0 }
 0x67c   : > { %v1531_v2 = vsel %vm731_vm0, %v1528_v1, 0.0 }
 0x67d   : > { %1532 = vadd.xlane.f32.xlu0 %v1531_v2 }
 0x6f0   : > { %v1533_v3 = vpop.xlane.xlu0 %1532 }
 0x6f1   : > { %v1534_v4 = vmul.f32 %v1533_v3, %v2192_v6 }
 0x6f3   : > { %v1535_v5 = vsub.f32 %v1528_v1, %v1534_v4 }
 0x6f5   : > { %v1536_v7 = vmul.f32 %v1535_v5, %v1535_v5 }
 0x6f7   : > { %v1537_v8 = vsel %vm731_vm0, %v1536_v7, 0.0 }
 0x6f8   : > { %1538 = vadd.xlane.f32.xlu1 %v1537_v8 }
 0x76b   : > { %v1539_v12 = vpop.xlane.xlu1 %1538 }
 0x76c   : > { %v1540_v9 = vmul.f32 %v1539_v12, %v2192_v6  ;;  %v1841_v6 = vld [vmem:[%s2275_s19] ss:$0 sm:$0xff] }
 0x76e   : > { %v1541_v10 = vadd.f32 1e-05, %v1540_v9 }
 0x770   : > { %1864 = vrsqrt.f32 %v1541_v10  ;;  %vm1548_vm12 = vweird.f32 %v1541_v10 }
 0x776   : > { %v1865_v11 = vpop.eup %1864 }
 0x777   : > { %v1543_v13 = vmul.f32 %v1865_v11, %v1541_v10  ;;  %vm1549_vm11 = vweird.f32 %v1865_v11 }
 0x778   : > { %vm1550_vm13 = vmor %vm1548_vm12, %vm1549_vm11 }
 0x779   : > { %v1544_v14 = vmul.f32 %v1865_v11, %v1543_v13 }
 0x77b   : > { %v1545_v15 = vmul.f32 0.5, %v1544_v14 }
 0x77d   : > { %v1546_v16 = vsub.f32 1.5, %v1545_v15 }
 0x77f   : > { %v1547_v17 = vmul.f32 %v1865_v11, %v1546_v16 }
 0x781   : > { %v1551_v19 = vsel %vm1550_vm13, %v1865_v11, %v1547_v17 }
 0x782   : > { %v1552_v20 = vmul.f32 %v1551_v19, %v1535_v5 }
 0x784   : > { %v1556_v21 = vmul.f32 %v1840_v18, %v1552_v20 }
 0x786   : > { %v1560_v22 = vadd.f32 %v1841_v6, %v1556_v21 }
 0x788   : > { %v1561_v23 = vpack.c.bf16 %v1560_v22, %v1560_v22 }
 0x78a   : > { %1563 = vst.msk [vmem:[%s638_s3] sm:$0xf] %vm1562_vm14, %v1561_v23 }
 0x78b PF: > { %s2295_s27 = sld [smem:[#allocation2_spill]] }
 0x791   : > { %s30_s1 = sadd.s32 1, %s2295_s27  }
 0x792   : > { %p27_p4 = scmp.ge.s32.totalorder %s30_s1, 4  }
 0x794   :  { %29 = sbr.rel (!%p27_p4) target bundleno = 7 (0x7), region = 133 }

// kernel: transformer_forward.7
= control target key start
LH: loop header
LB: loop body
LE: loop exit
PB: predicated region body
PF: predicated region fallthrough
CT: control target
= control target key end

     0   :  { %s3200_s6 = smov 1   ;;  %s3201_s10 = smov 2   ;;  %s3651_s0 = inlined_call_operand.smem [shape: u32[31], index: -1, kind: input, shape index: {}] }
   0x1   :  { %s3240_s5 = sld [smem:[%s3651_s0]]   ;;  %s3202_s14 = smov 3  }
   0x2   :  { %s3245_s9 = sld [smem:[%s3651_s0 + %s3200_s6]]   ;;  %s3203_s18 = smov 4  }
   0x3   :  { %s3250_s13 = sld [smem:[%s3651_s0 + %s3201_s10]]   ;;  %s3204_s22 = smov 5  }
   0x4   :  { %s3255_s17 = sld [smem:[%s3651_s0 + %s3202_s14]]   ;;  %s3205_s26 = smov 6  }
   0x5   :  { %s3260_s21 = sld [smem:[%s3651_s0 + %s3203_s18]]   ;;  %s3206_s30 = smov 7  }
   0x6   :  { %s3265_s25 = sld [smem:[%s3651_s0 + %s3204_s22]]   ;;  %s3207_s4 = smov 8  }
   0x7   :  { %s3270_s29 = sld [smem:[%s3651_s0 + %s3205_s26]]   ;;  %s3208_s10 = smov 9  }
   0x8   :  { %3660 = sst [smem:[#allocation2_spill]] %s3245_s9  ;;  %s3209_s15 = smov 10  }
   0x9   :  { %s3275_s3 = sld [smem:[%s3651_s0 + %s3206_s30]]   ;;  %s3210_s20 = smov 11  }
   0xa   :  { %3661 = sst [smem:[#allocation3_spill]] %s3255_s17  ;;  %s3211_s26 = smov 12  }
   0xb   :  { %s3280_s8 = sld [smem:[%s3651_s0 + %s3207_s4]]   ;;  %s3212_s1 = smov 13  }
   0xc   :  { %s3285_s14 = sld [smem:[%s3651_s0 + %s3208_s10]]   ;;  %s3213_s7 = smov 14  }
   0xd   :  { %s3290_s19 = sld [smem:[%s3651_s0 + %s3209_s15]]   ;;  %s3214_s15 = smov 15  }
   0xe   :  { %s3295_s24 = sld [smem:[%s3651_s0 + %s3210_s20]]   ;;  %s3215_s22 = smov 16  }
   0xf   :  { %s3300_s30 = sld [smem:[%s3651_s0 + %s3211_s26]]   ;;  %s3216_s28 = smov 17  }
  0x10   :  { %s3305_s6 = sld [smem:[%s3651_s0 + %s3212_s1]]  }
  0x11   :  { %s3310_s12 = sld [smem:[%s3651_s0 + %s3213_s7]]   ;;  %s3217_s7 = smov 18  }
  0x12   :  { %s3315_s20 = sld [smem:[%s3651_s0 + %s3214_s15]]   ;;  %s3218_s15 = smov 19  }
  0x13   :  { %s3320_s27 = sld [smem:[%s3651_s0 + %s3215_s22]]   ;;  %s3219_s22 = smov 20  }
  0x14   :  { %s3325_s4 = sld [smem:[%s3651_s0 + %s3216_s28]]   ;;  %s3220_s28 = smov 21  }
  0x15   :  { %s3330_s17 = sld [smem:[%s3651_s0 + %s3217_s7]]   ;;  %s3221_s7 = smov 22  }
  0x16   :  { %s3340_s9 = sld [smem:[%s3651_s0 + %s3219_s22]]   ;;  %s3223_s22 = smov 24  }
  0x18   :  { %3662 = sst [smem:[#allocation4_spill]] %s3315_s20 }
  0x19   :  { %s3335_s20 = sld [smem:[%s3651_s0 + %s3218_s15]]   ;;  %s3222_s15 = smov 23  }
  0x1a   :  { %3663 = sst [smem:[#allocation5_spill]] %s3325_s4 }
  0x1b   :  { %3664 = sst [smem:[#allocation6_spill]] %s3330_s17 }
  0x1c   :  { %3666 = sst [smem:[#allocation8_spill]] %s3340_s9 }
  0x1d   :  { %s3345_s4 = sld [smem:[%s3651_s0 + %s3220_s28]]   ;;  %s3224_s28 = smov 25  }
  0x1e   :  { %s3350_s17 = sld [smem:[%s3651_s0 + %s3221_s7]]   ;;  %s3225_s7 = smov 26  }
  0x1f   :  { %3665 = sst [smem:[#allocation7_spill]] %s3335_s20 }
  0x20   :  { %s3355_s20 = sld [smem:[%s3651_s0 + %s3222_s15]]   ;;  %s3226_s15 = smov 27  }
  0x21   :  { %s3360_s9 = sld [smem:[%s3651_s0 + %s3223_s22]]   ;;  %s3227_s22 = smov 28  }
  0x23   :  { %3667 = sst [smem:[#allocation9_spill]] %s3345_s4 }
  0x24   :  { %3668 = sst [smem:[#allocation10_spill]] %s3350_s17 }
  0x25   :  { %s3365_s4 = sld [smem:[%s3651_s0 + %s3224_s28]]   ;;  %s3228_s28 = smov 29  }
  0x26   :  { %3669 = sst [smem:[#allocation11_spill]] %s3355_s20 }
  0x27   :  { %3670 = sst [smem:[#allocation12_spill]] %s3360_s9 }
  0x28   :  { %s3370_s17 = sld [smem:[%s3651_s0 + %s3225_s7]]   ;;  %s3229_s7 = smov 30  }
  0x29   :  { %s3375_s20 = sld [smem:[%s3651_s0 + %s3226_s15]]   ;;  %s3392_s15 = smov 0  }
  0x2a   :  { %s3380_s9 = sld [smem:[%s3651_s0 + %s3227_s22]]  }
  0x2b   :  { %3671 = sst [smem:[#allocation13_spill]] %s3365_s4 }
  0x2c   :  { %s3385_s4 = sld [smem:[%s3651_s0 + %s3228_s28]]  }
  0x2e   :  { %3672 = sst [smem:[#allocation14_spill]] %s3370_s17 }
  0x2f   :  { %s3390_s17 = sld [smem:[%s3651_s0 + %s3229_s7]]  }
  0x30 LB: > { %s2746_s16 = sadd.s32 4294967295, %s3198_s15   ;;  %p2750_p0 = scmp.ge.s32.totalorder %s3198_s15, 1  ;;  %s3198_s15 = sphi %s3392_s15, %s71_s15  }
  0x31   : > { %p867_p1 = scmp.lt.s32.totalorder %s3198_s15, 3 }
  0x33   : > { %p868_p2 = pnand %p2750_p0, %p867_p1 }
  0x34   : > { %p953_p3 = scmp.lt.s32.totalorder (!%p868_p2), %s2746_s16, 1  ;;  %s3673_s23 = sld [smem:[#allocation2_spill]] (!%p868_p2) }
  0x35   : > { %871 = sbr.rel (%p868_p2) target bundleno = 2803 (0xaf3), region = 140  ;;  %s3674_s26 = sld [smem:[#allocation6_spill]] (!%p868_p2) }
  0x36   : > { %s3675_s1 = sld [smem:[#allocation5_spill]] (!%p868_p2) }
  0x37   : > { %s3676_s2 = sld [smem:[#allocation4_spill]] (!%p868_p2) }
  0x38   : > { %s3677_s7 = sld [smem:[#allocation3_spill]] (!%p868_p2) }
  0x39   : > { %s3678_s11 = sld [smem:[#allocation7_spill]] (!%p868_p2) }
  0x3a   : > { %v3023_v0 = vld [vmem:[%s3260_s21 + $0x8] sm:$0xff]  ;;  %v3025_v1 = vld [vmem:[%s3260_s21 + $0x18] sm:$0xff]  ;;  %v3022_v4 = vld [vmem:[%s3260_s21] sm:$0xff]  ;;  %s3687_s16 = smov (!%p953_p3, %s2746_s16), 1  ;;  %vm1075_vm0 = vcmask 261120   ;;  %vm1399_vm1 = vcmask 64512  }
  0x3b   : > { %v3027_v2 = vld [vmem:[%s3260_s21 + $0x28] sm:$0xff]  ;;  %v3029_v3 = vld [vmem:[%s3260_s21 + $0x38] sm:$0xff]  ;;  %1085 = vmatpush.bf16.msra.mxu0 %v3023_v0  ;;  %1110 = vmatpush.bf16.msra.mxu1 %v3025_v1  ;;  %v3024_v5 = vld [vmem:[%s3260_s21 + $0x10] sm:$0xff]  ;;  %s3411_s0 = sshll.u32 %s3687_s16, 2  ;;  %s963_s22 = scalar_lea.vmem %s3250_s13, %s3687_s16  ;;  %vm1541_vm2 = vcmask 1042432   ;;  %vm1484_vm4 = vcmask 46080  }
  0x3c   : > { %1135 = vmatpush.bf16.msra.mxu2 %v3027_v2  ;;  %1160 = vmatpush.bf16.msra.mxu3 %v3029_v3  ;;  %v3026_v6 = vld [vmem:[%s3260_s21 + $0x20] sm:$0xff]  ;;  %v3028_v7 = vld [vmem:[%s3260_s21 + $0x30] sm:$0xff]  ;;  %v3031_v8 = vld [vmem:[%s3270_s29 + $0x8] sm:$0xff]  ;;  %s956_s18 = scalar_lea.vmem %s3240_s5, %s3411_s0  ;;  %vm1537_vm5 = vcmask 48128   ;;  %vm1622_vm6 = vcmask 1043456   ;;  %vm1696_vm7 = vcmask 259072   ;;  %s960_s28 = scalar_lea.vmem %s3673_s23, %s3411_s0 }
  0x3d   : > { %v3033_v9 = vld [vmem:[%s3270_s29 + $0x18] sm:$0xff]  ;;  %v3035_v10 = vld [vmem:[%s3270_s29 + $0x28] sm:$0xff]  ;;  %v3419_v12 = vld [vmem:[%s956_s18] sm:$0x7]  ;;  %vm2251_vm12 = vcmask 62464   ;;  %s3680_s18 = sld [smem:[#allocation9_spill]] }
  0x3e   : > { %v3037_v11 = vld [vmem:[%s3270_s29 + $0x38] sm:$0xff]  ;;  %v3030_v13 = vld [vmem:[%s3270_s29] sm:$0xff]  ;;  %v3032_v14 = vld [vmem:[%s3270_s29 + $0x10] sm:$0xff]  ;;  %s966_s10 = scalar_lea.vmem %s3677_s7, %s3687_s16  ;;  %s3679_s16 = sld [smem:[#allocation8_spill]] }
  0x3f   : > { %1086 = vmatpush.bf16.msra.mxu0 %v3022_v4  ;;  %1111 = vmatpush.bf16.msra.mxu1 %v3024_v5  ;;  %v3034_v15 = vld [vmem:[%s3270_s29 + $0x20] sm:$0xff]  ;;  %v3036_v16 = vld [vmem:[%s3270_s29 + $0x30] sm:$0xff]  ;;  %v3043_v17 = vld [vmem:[%s3280_s8 + $0x28] sm:$0xff]  ;;  %s3682_s23 = sld [smem:[#allocation14_spill]] }
  0x40   : > { %1136 = vmatpush.bf16.msra.mxu2 %v3026_v6  ;;  %1161 = vmatpush.bf16.msra.mxu3 %v3028_v7  ;;  %v3039_v18 = vld [vmem:[%s3280_s8 + $0x8] sm:$0xff]  ;;  %v3041_v19 = vld [vmem:[%s3280_s8 + $0x18] sm:$0xff]  ;;  %v3042_v20 = vld [vmem:[%s3280_s8 + $0x20] sm:$0xff] }
  0x41   : > { %v3038_v21 = vld [vmem:[%s3280_s8] sm:$0xff]  ;;  %v3040_v22 = vld [vmem:[%s3280_s8 + $0x10] sm:$0xff]  ;;  %v3045_v23 = vld [vmem:[%s3280_s8 + $0x38] sm:$0xff] }
  0x42   : > { %2762 = vmatmul.msk.bf16.vlgmr.msra.gmra.mxu0 %vm1075_vm0, %v3419_v12  ;;  %2771 = vmatmul.msk.bf16.vlgmr.msra.gmra.mxu1 %vm1075_vm0, %v3419_v12  ;;  %v3044_v24 = vld [vmem:[%s3280_s8 + $0x30] sm:$0xff]  ;;  %v3120_v31 = vld [vmem:[%s3275_s3] ss:$0 sm:$0xff]  ;;  %v3121_v32 = vld [vmem:[%s3275_s3 + $0x1] ss:$0 sm:$0xff] }
  0x43   : > { %1197 = vmatpush.bf16.msrb.mxu0 %v3031_v8  ;;  %1222 = vmatpush.bf16.msrb.mxu1 %v3033_v9  ;;  %v3117_v39 = vld [vmem:[%s3265_s25 + $0x1] ss:$0 sm:$0xff]  ;;  %v3116_v42 = vld [vmem:[%s3265_s25] ss:$0 sm:$0xff]  ;;  %v3122_v43 = vld [vmem:[%s3275_s3 + $0x2] ss:$0 sm:$0xff] }
  0x44   : > { %2780 = vmatmul.msk.bf16.vlgmr.msra.gmra.mxu2 %vm1075_vm0, %v3419_v12  ;;  %2789 = vmatmul.msk.bf16.vlgmr.msra.gmra.mxu3 %vm1075_vm0, %v3419_v12  ;;  %v3123_v44 = vld [vmem:[%s3275_s3 + $0x3] ss:$0 sm:$0xff]  ;;  %v3118_v56 = vld [vmem:[%s3265_s25 + $0x2] ss:$0 sm:$0xff]  ;;  %v3124_v5 = vld [vmem:[%s3285_s14] ss:$0 sm:$0xff] }
  0x45   : > { %1247 = vmatpush.bf16.msrb.mxu2 %v3035_v10  ;;  %1272 = vmatpush.bf16.msrb.mxu3 %v3037_v11  ;;  %v3119_v57 = vld [vmem:[%s3265_s25 + $0x3] ss:$0 sm:$0xff]  ;;  %v3125_v6 = vld [vmem:[%s3285_s14 + $0x1] ss:$0 sm:$0xff]  ;;  %v3126_v11 = vld [vmem:[%s3285_s14 + $0x2] ss:$0 sm:$0xff] }
  0x47   : > { %1198 = vmatpush.bf16.msrb.mxu0 %v3030_v13  ;;  %1223 = vmatpush.bf16.msrb.mxu1 %v3032_v14 }
  0x49   : > { %1248 = vmatpush.bf16.msrb.mxu2 %v3034_v15  ;;  %1273 = vmatpush.bf16.msrb.mxu3 %v3036_v16 }
  0x4b   : > { %1309 = vmatpush.bf16.msra.mxu0 %v3039_v18  ;;  %1334 = vmatpush.bf16.msra.mxu1 %v3041_v19 }
  0x4d   : > { %1359 = vmatpush.bf16.msra.mxu2 %v3043_v17  ;;  %1384 = vmatpush.bf16.msra.mxu3 %v3045_v23  ;;  %v3127_v23 = vld [vmem:[%s3285_s14 + $0x3] ss:$0 sm:$0xff] }
  0x4f   : > { %1310 = vmatpush.bf16.msra.mxu0 %v3038_v21  ;;  %1335 = vmatpush.bf16.msra.mxu1 %v3040_v22 }
  0x51   : > { %1360 = vmatpush.bf16.msra.mxu2 %v3042_v20  ;;  %1385 = vmatpush.bf16.msra.mxu3 %v3044_v24 }
  0x52   : > { %2798 = vmatmul.msk.bf16.vlgmr.msrb.gmra.mxu0 %vm1075_vm0, %v3419_v12  ;;  %2807 = vmatmul.msk.bf16.vlgmr.msrb.gmra.mxu1 %vm1075_vm0, %v3419_v12 }
  0x54   : > { %2816 = vmatmul.msk.bf16.vlgmr.msrb.gmra.mxu2 %vm1075_vm0, %v3419_v12  ;;  %2825 = vmatmul.msk.bf16.vlgmr.msrb.gmra.mxu3 %vm1075_vm0, %v3419_v12 }
  0x62   : > { %2834 = vmatmul.msk.bf16.vlgmr.msra.gmra.mxu0 %vm1075_vm0, %v3419_v12  ;;  %2843 = vmatmul.msk.bf16.vlgmr.msra.gmra.mxu1 %vm1075_vm0, %v3419_v12 }
  0x64   : > { %2852 = vmatmul.msk.bf16.vlgmr.msra.gmra.mxu2 %vm1075_vm0, %v3419_v12  ;;  %2861 = vmatmul.msk.bf16.vlgmr.msra.gmra.mxu3 %vm1075_vm0, %v3419_v12 }
  0xbf   : > { %v1088_v25 = vpop.f32.mrf.mxu0  ;;  %v1113_v26 = vpop.f32.mrf.mxu1 }
  0xc0   : > { %v1114_v47 = vadd.f32 %v3117_v39, %v1113_v26  ;;  %v1089_v50 = vadd.f32 %v3116_v42, %v1088_v25 }
  0xc2   : > { %v1392_v55 = vpack.c.bf16 %v1114_v47, %v1114_v47  ;;  %v1391_v60 = vpack.c.bf16 %v1089_v50, %v1089_v50 }
  0xc7   : > { %v1138_v27 = vpop.f32.mrf.mxu2  ;;  %v1163_v28 = vpop.f32.mrf.mxu3 }
  0xc8   : > { %v1090_v29 = vpop.f32.mrf.mxu0  ;;  %v1115_v30 = vpop.f32.mrf.mxu1  ;;  %v1139_v63 = vadd.f32 %v3118_v56, %v1138_v27  ;;  %v1164_v0 = vadd.f32 %v3119_v57, %v1163_v28 }
  0xc9   : > { %v975_v30 = vlaneseq }
  0xca   : > { %v1393_v3 = vpack.c.bf16 %v1139_v63, %v1139_v63  ;;  %v1394_v4 = vpack.c.bf16 %v1164_v0, %v1164_v0 }
  0xcf   : > { %v1140_v33 = vpop.f32.mrf.mxu2  ;;  %v1165_v34 = vpop.f32.mrf.mxu3 }
  0xd0   : > { %v1200_v35 = vpop.f32.mrf.mxu0  ;;  %v1225_v36 = vpop.f32.mrf.mxu1  ;;  %v3128_v33 = vld [vmem:[%s963_s22] ss:$0 sm:$0xff]  ;;  %v3230_v34 = vmov -1e+30   ;;  %s3681_s22 = sld [smem:[#allocation12_spill]] }
  0xd1   : > { %v1201_v37 = vadd.f32 %v3120_v31, %v1200_v35  ;;  %v1226_v38 = vadd.f32 %v3121_v32, %v1225_v36  ;;  %v976_v31 = vshrl.u32 %v975_v30, 7  ;;  %v978_v32 = vand.u32 127, %v975_v30  ;;  %v1047_v30 = vld [vmem:[%s3290_s19] sm:$0xf] }
  0xd3   : > { %v1395_v40 = vpack.c.bf16 %v1201_v37, %v1201_v37  ;;  %v1396_v41 = vpack.c.bf16 %v1226_v38, %v1226_v38  ;;  %vm979_vm3 = vcmp.ge.s32.totalorder %v976_v31, %v978_v32  ;;  %v1624_v31 = vsel %vm1622_vm6, %v1047_v30, 0  ;;  %v1048_v32 = vld [vmem:[%s3290_s19 + $0x4] sm:$0xf] }
  0xd4   : > { %v980_v35 = vsel %vm979_vm3, 0.0, %v3230_v34  ;;  %v1049_v34 = vld [vmem:[%s3290_s19 + $0x8] sm:$0xf] }
  0xd5   : > { %v1404_v45 = vsel %vm1399_vm1, %v1395_v40, 0  ;;  %v1423_v46 = vsel %vm1399_vm1, %v1396_v41, 0  ;;  %v985_v36 = vadd.f32 %v3128_v33, %v980_v35  ;;  %v1643_v33 = vsel %vm1622_vm6, %v1048_v32, 0  ;;  %v3054_v32 = vld [vmem:[%s3320_s27] sm:$0xff] }
  0xd6   : > { %1413 = vmatpush.bf16.xpose.msrb.mxu0 %v1404_v45  ;;  %1432 = vmatpush.bf16.xpose.msrb.mxu1 %v1423_v46  ;;  %v1662_v35 = vsel %vm1622_vm6, %v1049_v34, 0 }
  0xd7   : > { %v1250_v48 = vpop.f32.mrf.mxu2  ;;  %v1275_v49 = vpop.f32.mrf.mxu3 }
  0xd8   : > { %v1251_v51 = vadd.f32 %v3122_v43, %v1250_v48  ;;  %v1276_v52 = vadd.f32 %v3123_v44, %v1275_v49  ;;  %v1202_v53 = vpop.f32.mrf.mxu0  ;;  %v1227_v54 = vpop.f32.mrf.mxu1 }
  0xda   : > { %v1397_v58 = vpack.c.bf16 %v1251_v51, %v1251_v51  ;;  %v1398_v59 = vpack.c.bf16 %v1276_v52, %v1276_v52 }
  0xdc   : > { %v1442_v61 = vsel %vm1399_vm1, %v1397_v58, 0  ;;  %v1461_v62 = vsel %vm1399_vm1, %v1398_v59, 0 }
  0xdd   : > { %1451 = vmatpush.bf16.xpose.msrb.mxu2 %v1442_v61  ;;  %1470 = vmatpush.bf16.xpose.msrb.mxu3 %v1461_v62 }
  0xde   : > { %2862 = vmatmul.msk.bf16.vlgmr.msrb.gmra.mxu0 %vm1399_vm1, %v1391_v60  ;;  %2863 = vmatmul.msk.bf16.vlgmr.msrb.gmra.mxu1 %vm1399_vm1, %v1392_v55 }
  0xdf   : > { %v1252_v1 = vpop.f32.mrf.mxu2  ;;  %v1277_v2 = vpop.f32.mrf.mxu3 }
  0xe0   : > { %v1312_v7 = vpop.f32.mrf.mxu0  ;;  %v1337_v8 = vpop.f32.mrf.mxu1 }
  0xe1   : > { %v1313_v9 = vadd.f32 %v3124_v5, %v1312_v7  ;;  %v1338_v10 = vadd.f32 %v3125_v6, %v1337_v8 }
  0xe3   : > { %v1533_v13 = vpack.c.bf16 %v1313_v9, %v1313_v9  ;;  %v1534_v14 = vpack.c.bf16 %v1338_v10, %v1338_v10 }
  0xe4   : > { %2864 = vmatmul.msk.bf16.vlgmr.msrb.gmra.mxu2 %vm1399_vm1, %v1393_v3  ;;  %2865 = vmatmul.msk.bf16.vlgmr.msrb.gmra.mxu3 %vm1399_vm1, %v1394_v4 }
  0xe5   : > { %v1543_v16 = vsel %vm1541_vm2, %v1533_v13, 0  ;;  %v1562_v17 = vsel %vm1541_vm2, %v1534_v14, 0 }
  0xe6   : > { %1552 = vmatpush.bf16.msra.mxu0 %v1543_v16  ;;  %1571 = vmatpush.bf16.msra.mxu1 %v1562_v17 }
  0xe7   : > { %v1362_v15 = vpop.f32.mrf.mxu2  ;;  %v1387_v25 = vpop.f32.mrf.mxu3 }
  0xe8   : > { %v1363_v18 = vadd.f32 %v3126_v11, %v1362_v15  ;;  %v1314_v20 = vpop.f32.mrf.mxu0  ;;  %v1339_v21 = vpop.f32.mrf.mxu1  ;;  %v1388_v26 = vadd.f32 %v3127_v23, %v1387_v25 }
  0xea   : > { %v1535_v19 = vpack.c.bf16 %v1363_v18, %v1363_v18  ;;  %v1536_v27 = vpack.c.bf16 %v1388_v26, %v1388_v26  ;;  %1633 = vmatpush.bf16.msrb.mxu0 %v1624_v31  ;;  %1652 = vmatpush.bf16.msrb.mxu1 %v1643_v33  ;;  %v3061_v31 = vld [vmem:[%s3320_s27 + $0x38] sm:$0xff]  ;;  %v3056_v33 = vld [vmem:[%s3320_s27 + $0x10] sm:$0xff] }
  0xec   : > { %v1581_v22 = vsel %vm1541_vm2, %v1535_v19, 0  ;;  %v1600_v28 = vsel %vm1541_vm2, %v1536_v27, 0 }
  0xed   : > { %1590 = vmatpush.bf16.msra.mxu2 %v1581_v22  ;;  %1609 = vmatpush.bf16.msra.mxu3 %v1600_v28 }
  0xef   : > { %v1364_v24 = vpop.f32.mrf.mxu2  ;;  %v1389_v29 = vpop.f32.mrf.mxu3 }
  0xf1   : > { %1671 = vmatpush.bf16.msrb.mxu2 %v1662_v35  ;;  %v3058_v35 = vld [vmem:[%s3320_s27 + $0x20] sm:$0xff] }
 0x15b   : > { %v1415_v37 = vpop.f32.mrf.mxu0  ;;  %v1434_v38 = vpop.f32.mrf.mxu1 }
 0x15c   : > { %v1476_v39 = vmul.f32 0.35355338, %v1415_v37  ;;  %v1477_v41 = vmul.f32 0.35355338, %v1434_v38 }
 0x15e   : > { %v1480_v40 = vadd.f32 %v1476_v39, %v985_v36  ;;  %v1481_v45 = vadd.f32 %v1477_v41, %v985_v36 }
 0x160   : > { %v1485_v42 = vsel %vm1484_vm4, %v1480_v40, -inf  ;;  %v1488_v49 = vsel %vm1484_vm4, %v1481_v45, -inf }
 0x161   : > { %1486 = vmax.xlane.f32.xlu1 %v1485_v42 }
 0x163   : > { %v1417_v43 = vpop.f32.mrf.mxu0  ;;  %v1436_v44 = vpop.f32.mrf.mxu1 }
 0x167   : > { %v1453_v46 = vpop.f32.mrf.mxu2  ;;  %v1472_v47 = vpop.f32.mrf.mxu3 }
 0x168   : > { %v1478_v48 = vmul.f32 0.35355338, %v1453_v46  ;;  %v1479_v51 = vmul.f32 0.35355338, %v1472_v47 }
 0x169   : > { %1489 = vmax.xlane.f32.xlu1 %v1488_v49 }
 0x16a   : > { %v1482_v50 = vadd.f32 %v1478_v48, %v985_v36  ;;  %v1483_v55 = vadd.f32 %v1479_v51, %v985_v36  ;;  %v1050_v36 = vld [vmem:[%s3290_s19 + $0xc] sm:$0xf] }
 0x16b   : > { %v1681_v37 = vsel %vm1622_vm6, %v1050_v36, 0  ;;  %v3060_v36 = vld [vmem:[%s3320_s27 + $0x30] sm:$0xff] }
 0x16c   : > { %v1491_v52 = vsel %vm1484_vm4, %v1482_v50, -inf  ;;  %v1494_v56 = vsel %vm1484_vm4, %v1483_v55, -inf  ;;  %1690 = vmatpush.bf16.msrb.mxu3 %v1681_v37 }
 0x16d   : > { %1492 = vmax.xlane.f32.xlu0 %v1491_v52 }
 0x16f   : > { %v1455_v53 = vpop.f32.mrf.mxu2  ;;  %v1474_v54 = vpop.f32.mrf.mxu3 }
 0x175   : > { %1495 = vmax.xlane.f32.xlu0 %v1494_v56 }
 0x1d4   : > { %v1487_v57 = vpop.xlane.xlu1 %1486 }
 0x1d5   : > { %v1497_v58 = vsub.f32 %v1480_v40, %v1487_v57 }
 0x1d7   : > { %v1501_v59 = vmul.f32 1.442695, %v1497_v58 }
 0x1d9   : > { %3152 = vpow2.f32 %v1501_v59 }
 0x1dc   : > { %v1490_v60 = vpop.xlane.xlu1 %1489 }
 0x1dd   : > { %v1498_v61 = vsub.f32 %v1481_v45, %v1490_v60 }
 0x1df   : > { %v3153_v62 = vpop.eup %3152  ;;  %v1503_v63 = vmul.f32 1.442695, %v1498_v61 }
 0x1e0   : > { %v1493_v0 = vpop.xlane.xlu0 %1492  ;;  %v1509_v1 = vsel %vm1484_vm4, %v3153_v62, 0.0 }
 0x1e1   : > { %3154 = vpow2.f32 %v1503_v63  ;;  %v1499_v2 = vsub.f32 %v1482_v50, %v1493_v0  ;;  %1510 = vadd.xlane.f32.xlu0 %v1509_v1  ;;  %v973_v1 = vunpack.c.l.bf16 %v3419_v12 }
 0x1e3   : > { %v1505_v3 = vmul.f32 1.442695, %v1499_v2 }
 0x1e5   : > { %3156 = vpow2.f32 %v1505_v3 }
 0x1e7   : > { %v3155_v4 = vpop.eup %3154 }
 0x1e8   : > { %v1496_v5 = vpop.xlane.xlu0 %1495  ;;  %v1512_v6 = vsel %vm1484_vm4, %v3155_v4, 0.0 }
 0x1e9   : > { %v1500_v7 = vsub.f32 %v1483_v55, %v1496_v5  ;;  %1513 = vadd.xlane.f32.xlu1 %v1512_v6  ;;  %v3231_v6 = vmov 32.0  }
 0x1eb   : > { %v3157_v8 = vpop.eup %3156  ;;  %v1507_v9 = vmul.f32 1.442695, %v1500_v7 }
 0x1ec   : > { %v1515_v10 = vsel %vm1484_vm4, %v3157_v8, 0.0 }
 0x1ed   : > { %3158 = vpow2.f32 %v1507_v9  ;;  %1516 = vadd.xlane.f32.xlu2 %v1515_v10 }
 0x1f3   : > { %v3159_v11 = vpop.eup %3158 }
 0x1f4   : > { %v1518_v13 = vsel %vm1484_vm4, %v3159_v11, 0.0  ;;  %vm2631_vm4 = vcmask 256000  }
 0x1f5   : > { %1519 = vadd.xlane.f32.xlu2 %v1518_v13 }
 0x254   : > { %v1511_v14 = vpop.xlane.xlu0 %1510 }
 0x255   : > { %3160 = vrcp.f32 %v1511_v14 }
 0x25b   : > { %v3161_v15 = vpop.eup %3160 }
 0x25c   : > { %v1525_v16 = vmul.f32 %v3161_v15, %v3153_v62  ;;  %v1514_v17 = vpop.xlane.xlu1 %1513  ;;  %v3129_v62 = vld [vmem:[%s3295_s24] ss:$0 sm:$0xff] }
 0x25d   : > { %3162 = vrcp.f32 %v1514_v17 }
 0x25e   : > { %v1529_v18 = vpack.c.bf16 %v1525_v16, %v1525_v16 }
 0x260   : > { %v1517_v19 = vpop.xlane.xlu2 %1516  ;;  %2866 = vmatmul.msk.bf16.vlgmr.msra.gmra.mxu0 %vm1537_vm5, %v1529_v18  ;;  %v3047_v18 = vld [vmem:[%s3310_s12 + $0x8] sm:$0xff] }
 0x261   : > { %3164 = vrcp.f32 %v1517_v19  ;;  %v3049_v19 = vld [vmem:[%s3310_s12 + $0x18] sm:$0xff]  ;;  %1847 = vmatpush.bf16.msra.mxu0 %v3047_v18 }
 0x263   : > { %v3163_v20 = vpop.eup %3162 }
 0x264   : > { %v1526_v21 = vmul.f32 %v3163_v20, %v3155_v4  ;;  %v3051_v20 = vld [vmem:[%s3310_s12 + $0x28] sm:$0xff] }
 0x266   : > { %v1530_v22 = vpack.c.bf16 %v1526_v21, %v1526_v21  ;;  %v3053_v21 = vld [vmem:[%s3310_s12 + $0x38] sm:$0xff] }
 0x267   : > { %v3165_v23 = vpop.eup %3164 }
 0x268   : > { %v1527_v24 = vmul.f32 %v3165_v23, %v3157_v8  ;;  %v1520_v25 = vpop.xlane.xlu2 %1519  ;;  %2867 = vmatmul.msk.bf16.vlgmr.msra.gmra.mxu1 %vm1537_vm5, %v1530_v22  ;;  %v3046_v22 = vld [vmem:[%s3310_s12] sm:$0xff]  ;;  %v3048_v23 = vld [vmem:[%s3310_s12 + $0x10] sm:$0xff] }
 0x269   : > { %3166 = vrcp.f32 %v1520_v25  ;;  %1872 = vmatpush.bf16.msra.mxu1 %v3049_v19  ;;  %v3052_v25 = vld [vmem:[%s3310_s12 + $0x30] sm:$0xff]  ;;  %1848 = vmatpush.bf16.msra.mxu0 %v3046_v22 }
 0x26a   : > { %v1531_v26 = vpack.c.bf16 %v1527_v24, %v1527_v24  ;;  %3168 = vrcp.f32 %v3231_v6  ;;  %v3050_v24 = vld [vmem:[%s3310_s12 + $0x20] sm:$0xff] }
 0x26c   : > { %2868 = vmatmul.msk.bf16.vlgmr.msra.gmra.mxu2 %vm1537_vm5, %v1531_v26 }
 0x26d   : > { %1897 = vmatpush.bf16.msra.mxu2 %v3051_v20  ;;  %1873 = vmatpush.bf16.msra.mxu1 %v3048_v23 }
 0x26f   : > { %v3167_v27 = vpop.eup %3166 }
 0x270   : > { %v1528_v28 = vmul.f32 %v3167_v27, %v3159_v11  ;;  %v3169_v7 = vpop.eup %3168  ;;  %v3055_v27 = vld [vmem:[%s3320_s27 + $0x8] sm:$0xff] }
 0x271   : > { %v1716_v8 = vmul.f32 32.0, %v3169_v7  ;;  %vm1720_vm8 = vweird.f32 %v3169_v7  ;;  %1898 = vmatpush.bf16.msra.mxu2 %v3050_v24 }
 0x272   : > { %v1532_v29 = vpack.c.bf16 %v1528_v28, %v1528_v28  ;;  %v3057_v28 = vld [vmem:[%s3320_s27 + $0x18] sm:$0xff] }
 0x273   : > { %v1717_v9 = vsub.f32 1.0, %v1716_v8 }
 0x274   : > { %2869 = vmatmul.msk.bf16.vlgmr.msra.gmra.mxu3 %vm1537_vm5, %v1532_v29  ;;  %v3059_v29 = vld [vmem:[%s3320_s27 + $0x28] sm:$0xff] }
 0x275   : > { %v1718_v10 = vmul.f32 %v3169_v7, %v1717_v9  ;;  %1922 = vmatpush.bf16.msra.mxu3 %v3053_v21  ;;  %v3132_v9 = vld [vmem:[%s3676_s2] ss:$0 sm:$0xff] }
 0x277   : > { %v1719_v11 = vadd.f32 %v3169_v7, %v1718_v10 }
 0x279   : > { %v3517_v12 = vsel %vm1720_vm8, %v3169_v7, %v1719_v11  ;;  %1923 = vmatpush.bf16.msra.mxu3 %v3052_v25 }
 0x2dd   : > { %v1554_v38 = vpop.f32.mrf.mxu0 }
 0x2de   : > { %v1615_v39 = vpack.c.bf16 %v1554_v38, %v1554_v38 }
 0x2e0   : > { %2870 = vmatmul.msk.bf16.vlgmr.msrb.gmra.mxu0 %vm1399_vm1, %v1615_v39 }
 0x2e1   : > { %1962 = vmatpush.bf16.msrb.mxu0 %v3055_v27  ;;  %v3135_v27 = vld [vmem:[%s3676_s2 + $0x3] ss:$0 sm:$0xff] }
 0x2e5   : > { %v1556_v40 = vpop.f32.mrf.mxu0  ;;  %v1573_v41 = vpop.f32.mrf.mxu1  ;;  %1963 = vmatpush.bf16.msrb.mxu0 %v3054_v32 }
 0x2e6   : > { %v1616_v42 = vpack.c.bf16 %v1573_v41, %v1573_v41 }
 0x2e8   : > { %2871 = vmatmul.msk.bf16.vlgmr.msrb.gmra.mxu1 %vm1399_vm1, %v1616_v42 }
 0x2e9   : > { %1987 = vmatpush.bf16.msrb.mxu1 %v3057_v28 }
 0x2ed   : > { %v1575_v43 = vpop.f32.mrf.mxu1  ;;  %1988 = vmatpush.bf16.msrb.mxu1 %v3056_v33 }
 0x2ee   : > { %v3130_v43 = vld [vmem:[%s3300_s30] ss:$0 sm:$0xff] }
 0x2ef   : > { %v1592_v44 = vpop.f32.mrf.mxu2 }
 0x2f0   : > { %v1617_v45 = vpack.c.bf16 %v1592_v44, %v1592_v44 }
 0x2f2   : > { %2872 = vmatmul.msk.bf16.vlgmr.msrb.gmra.mxu2 %vm1399_vm1, %v1617_v45  ;;  %v3131_v45 = vld [vmem:[%s3305_s6] ss:$0 sm:$0xff] }
 0x2f3   : > { %2012 = vmatpush.bf16.msrb.mxu2 %v3059_v29 }
 0x2f7   : > { %v1594_v46 = vpop.f32.mrf.mxu2  ;;  %v1611_v47 = vpop.f32.mrf.mxu3  ;;  %2013 = vmatpush.bf16.msrb.mxu2 %v3058_v35 }
 0x2f8   : > { %v1618_v48 = vpack.c.bf16 %v1611_v47, %v1611_v47 }
 0x2fa   : > { %2873 = vmatmul.msk.bf16.vlgmr.msrb.gmra.mxu3 %vm1399_vm1, %v1618_v48 }
 0x2fb   : > { %2037 = vmatpush.bf16.msrb.mxu3 %v3061_v31 }
 0x2ff   : > { %v1613_v49 = vpop.f32.mrf.mxu3  ;;  %2038 = vmatpush.bf16.msrb.mxu3 %v3060_v36 }
 0x35d   : > { %v1635_v50 = vpop.f32.mrf.mxu0 }
 0x35e   : > { %v1697_v56 = vsel %vm1696_vm7, %v1635_v50, 0.0  ;;  %v974_v50 = vld [vmem:[%s960_s28] sm:$0xf]  ;;  %s3683_s28 = sld [smem:[#allocation10_spill]] }
 0x365   : > { %v1637_v51 = vpop.f32.mrf.mxu0  ;;  %v1654_v52 = vpop.f32.mrf.mxu1 }
 0x366   : > { %v1698_v55 = vsel %vm1696_vm7, %v1654_v52, 0.0  ;;  %v3067_v51 = vld [vmem:[%s3674_s26 + $0x28] sm:$0xff] }
 0x367   : > { %v1699_v58 = vadd.f32 %v1698_v55, %v1697_v56  ;;  %v3063_v52 = vld [vmem:[%s3674_s26 + $0x8] sm:$0xff]  ;;  %v3066_v55 = vld [vmem:[%s3674_s26 + $0x20] sm:$0xff] }
 0x368   : > { %v3062_v56 = vld [vmem:[%s3674_s26] sm:$0xff] }
 0x36d   : > { %v1656_v53 = vpop.f32.mrf.mxu1 }
 0x36e   : > { %v3065_v53 = vld [vmem:[%s3674_s26 + $0x18] sm:$0xff] }
 0x375   : > { %v1673_v54 = vpop.f32.mrf.mxu2 }
 0x376   : > { %v1700_v57 = vsel %vm1696_vm7, %v1673_v54, 0.0  ;;  %v3069_v54 = vld [vmem:[%s3674_s26 + $0x38] sm:$0xff] }
 0x377   : > { %v1701_v59 = vadd.f32 %v1700_v57, %v1699_v58  ;;  %v3064_v57 = vld [vmem:[%s3674_s26 + $0x10] sm:$0xff] }
 0x378   : > { %v3068_v58 = vld [vmem:[%s3674_s26 + $0x30] sm:$0xff] }
 0x37d   : > { %v1675_v60 = vpop.f32.mrf.mxu2  ;;  %v1692_v61 = vpop.f32.mrf.mxu3 }
 0x37e   : > { %v1702_v63 = vsel %vm1696_vm7, %v1692_v61, 0.0 }
 0x37f   : > { %v1703_v0 = vadd.f32 %v1702_v63, %v1701_v59 }
 0x381   : > { %v1708_v2 = vadd.f32 %v3129_v62, %v1703_v0 }
 0x383   : > { %v1709_v3 = vadd.f32 %v1708_v2, %v973_v1  ;;  %v3136_v1 = vld [vmem:[%s3675_s1] ss:$0 sm:$0xff]  ;;  %v3137_v2 = vld [vmem:[%s3675_s1 + $0x1] ss:$0 sm:$0xff] }
 0x385   : > { %v1694_v4 = vpop.f32.mrf.mxu3  ;;  %v1712_v5 = vsel %vm1696_vm7, %v1709_v3, 0.0 }
 0x386   : > { %1713 = vadd.xlane.f32.xlu2 %v1712_v5 }
 0x3f9   : > { %v1714_v13 = vpop.xlane.xlu2 %1713 }
 0x3fa   : > { %v1722_v14 = vmul.f32 %v3517_v12, %v1714_v13  ;;  %v3133_v13 = vld [vmem:[%s3676_s2 + $0x1] ss:$0 sm:$0xff] }
 0x3fc   : > { %v1723_v15 = vsub.f32 %v1709_v3, %v1722_v14  ;;  %v3138_v14 = vld [vmem:[%s3675_s1 + $0x2] ss:$0 sm:$0xff] }
 0x3fe   : > { %v1724_v16 = vmul.f32 %v1723_v15, %v1723_v15 }
 0x400   : > { %v1725_v17 = vsel %vm1696_vm7, %v1724_v16, 0.0 }
 0x401   : > { %1726 = vadd.xlane.f32.xlu0 %v1725_v17 }
 0x474   : > { %v1727_v26 = vpop.xlane.xlu0 %1726 }
 0x475   : > { %v1728_v30 = vmul.f32 %v1727_v26, %v3517_v12  ;;  %v3134_v26 = vld [vmem:[%s3676_s2 + $0x2] ss:$0 sm:$0xff] }
 0x477   : > { %v1729_v34 = vadd.f32 1e-05, %v1728_v30 }
 0x479   : > { %3170 = vrsqrt.f32 %v1729_v34  ;;  %vm1736_vm10 = vweird.f32 %v1729_v34 }
 0x47f   : > { %v3171_v37 = vpop.eup %3170 }
 0x480   : > { %v1731_v38 = vmul.f32 %v3171_v37, %v1729_v34  ;;  %vm1737_vm9 = vweird.f32 %v3171_v37 }
 0x481   : > { %vm1738_vm11 = vmor %vm1736_vm10, %vm1737_vm9 }
 0x482   : > { %v1732_v39 = vmul.f32 %v3171_v37, %v1731_v38 }
 0x484   : > { %v1733_v40 = vmul.f32 0.5, %v1732_v39 }
 0x486   : > { %v1734_v41 = vsub.f32 1.5, %v1733_v40  ;;  %v3140_v40 = vld [vmem:[%s3678_s11] ss:$0 sm:$0xff] }
 0x488   : > { %v1735_v42 = vmul.f32 %v3171_v37, %v1734_v41  ;;  %v3141_v41 = vld [vmem:[%s3678_s11 + $0x1] ss:$0 sm:$0xff] }
 0x48a   : > { %v1739_v44 = vsel %vm1738_vm11, %v3171_v37, %v1735_v42 }
 0x48b   : > { %v1740_v46 = vmul.f32 %v1739_v44, %v1723_v15  ;;  %v3139_v15 = vld [vmem:[%s3675_s1 + $0x3] ss:$0 sm:$0xff] }
 0x48d   : > { %v1744_v47 = vmul.f32 %v3130_v43, %v1740_v46  ;;  %v3142_v46 = vld [vmem:[%s3678_s11 + $0x2] ss:$0 sm:$0xff] }
 0x48f   : > { %v3540_v48 = vadd.f32 %v3131_v45, %v1744_v47 }
 0x491   : > { %v1813_v49 = vpack.c.bf16 %v3540_v48, %v3540_v48 }
 0x493   : > { %2882 = vmatmul.msk.bf16.vlgmr.msra.gmra.mxu0 %vm1075_vm0, %v1813_v49  ;;  %2891 = vmatmul.msk.bf16.vlgmr.msra.gmra.mxu1 %vm1075_vm0, %v1813_v49 }
 0x494   : > { %2900 = vmatmul.msk.bf16.vlgmr.msra.gmra.mxu2 %vm1075_vm0, %v1813_v49  ;;  %2909 = vmatmul.msk.bf16.vlgmr.msra.gmra.mxu3 %vm1075_vm0, %v1813_v49 }
 0x495   : > { %2124 = vmatpush.bf16.msra.mxu2 %v3067_v51  ;;  %2074 = vmatpush.bf16.msra.mxu0 %v3063_v52  ;;  %v3143_v51 = vld [vmem:[%s3678_s11 + $0x3] ss:$0 sm:$0xff] }
 0x496   : > { %2099 = vmatpush.bf16.msra.mxu1 %v3065_v53  ;;  %2149 = vmatpush.bf16.msra.mxu3 %v3069_v54 }
 0x499   : > { %2125 = vmatpush.bf16.msra.mxu2 %v3066_v55  ;;  %2075 = vmatpush.bf16.msra.mxu0 %v3062_v56 }
 0x49a   : > { %2100 = vmatpush.bf16.msra.mxu1 %v3064_v57  ;;  %2150 = vmatpush.bf16.msra.mxu3 %v3068_v58 }
 0x4a3   : > { %2918 = vmatmul.msk.bf16.vlgmr.msrb.gmra.mxu0 %vm1075_vm0, %v974_v50  ;;  %2927 = vmatmul.msk.bf16.vlgmr.msrb.gmra.mxu1 %vm1075_vm0, %v974_v50 }
 0x4a4   : > { %2936 = vmatmul.msk.bf16.vlgmr.msrb.gmra.mxu2 %vm1075_vm0, %v974_v50  ;;  %2945 = vmatmul.msk.bf16.vlgmr.msrb.gmra.mxu3 %vm1075_vm0, %v974_v50 }
 0x4b3   : > { %2954 = vmatmul.msk.bf16.vlgmr.msra.gmra.mxu0 %vm1075_vm0, %v974_v50  ;;  %2963 = vmatmul.msk.bf16.vlgmr.msra.gmra.mxu1 %vm1075_vm0, %v974_v50 }
 0x4b4   : > { %2972 = vmatmul.msk.bf16.vlgmr.msra.gmra.mxu2 %vm1075_vm0, %v974_v50  ;;  %2981 = vmatmul.msk.bf16.vlgmr.msra.gmra.mxu3 %vm1075_vm0, %v974_v50 }
 0x510   : > { %v1850_v59 = vpop.f32.mrf.mxu0  ;;  %v1875_v60 = vpop.f32.mrf.mxu1 }
 0x511   : > { %v1851_v20 = vadd.f32 %v3132_v9, %v1850_v59  ;;  %v1876_v21 = vadd.f32 %v3133_v13, %v1875_v60 }
 0x513   : > { %v2156_v30 = vpack.c.bf16 %v1851_v20, %v1851_v20  ;;  %v2157_v31 = vpack.c.bf16 %v1876_v21, %v1876_v21 }
 0x517   : > { %v1900_v61 = vpop.f32.mrf.mxu2  ;;  %v1925_v62 = vpop.f32.mrf.mxu3 }
 0x518   : > { %v1852_v63 = vpop.f32.mrf.mxu0  ;;  %v1877_v0 = vpop.f32.mrf.mxu1  ;;  %v1901_v34 = vadd.f32 %v3134_v26, %v1900_v61  ;;  %v1926_v35 = vadd.f32 %v3135_v27, %v1925_v62 }
 0x51a   : > { %v2158_v38 = vpack.c.bf16 %v1901_v34, %v1901_v34  ;;  %v2159_v39 = vpack.c.bf16 %v1926_v35, %v1926_v35 }
 0x51f   : > { %v1902_v3 = vpop.f32.mrf.mxu2  ;;  %v1927_v4 = vpop.f32.mrf.mxu3 }
 0x520   : > { %v1965_v5 = vpop.f32.mrf.mxu0  ;;  %v1990_v6 = vpop.f32.mrf.mxu1 }
 0x521   : > { %v1966_v7 = vadd.f32 %v3136_v1, %v1965_v5  ;;  %v1991_v8 = vadd.f32 %v3137_v2, %v1990_v6  ;;  %v3144_v1 = vld [vmem:[%s966_s10] ss:$0 sm:$0xff]  ;;  %s3684_s10 = sld [smem:[#allocation11_spill]] }
 0x523   : > { %v2160_v10 = vpack.c.bf16 %v1966_v7, %v1966_v7  ;;  %v2161_v11 = vpack.c.bf16 %v1991_v8, %v1991_v8 }
 0x525   : > { %v2168_v16 = vsel %vm1399_vm1, %v2160_v10, 0  ;;  %v2187_v17 = vsel %vm1399_vm1, %v2161_v11, 0 }
 0x526   : > { %2177 = vmatpush.bf16.xpose.msrb.mxu0 %v2168_v16  ;;  %2196 = vmatpush.bf16.xpose.msrb.mxu1 %v2187_v17 }
 0x527   : > { %v2015_v18 = vpop.f32.mrf.mxu2  ;;  %v2040_v19 = vpop.f32.mrf.mxu3 }
 0x528   : > { %v2016_v22 = vadd.f32 %v3138_v14, %v2015_v18  ;;  %v2041_v23 = vadd.f32 %v3139_v15, %v2040_v19  ;;  %v1967_v24 = vpop.f32.mrf.mxu0  ;;  %v1992_v25 = vpop.f32.mrf.mxu1 }
 0x52a   : > { %v2162_v28 = vpack.c.bf16 %v2016_v22, %v2016_v22  ;;  %v2163_v29 = vpack.c.bf16 %v2041_v23, %v2041_v23 }
 0x52c   : > { %v2206_v32 = vsel %vm1399_vm1, %v2162_v28, 0  ;;  %v2225_v33 = vsel %vm1399_vm1, %v2163_v29, 0 }
 0x52d   : > { %2215 = vmatpush.bf16.xpose.msrb.mxu2 %v2206_v32  ;;  %2234 = vmatpush.bf16.xpose.msrb.mxu3 %v2225_v33 }
 0x52e   : > { %2982 = vmatmul.msk.bf16.vlgmr.msrb.gmra.mxu0 %vm1399_vm1, %v2156_v30  ;;  %2983 = vmatmul.msk.bf16.vlgmr.msrb.gmra.mxu1 %vm1399_vm1, %v2157_v31 }
 0x52f   : > { %v2017_v36 = vpop.f32.mrf.mxu2  ;;  %v2042_v37 = vpop.f32.mrf.mxu3 }
 0x530   : > { %v2077_v42 = vpop.f32.mrf.mxu0  ;;  %v2102_v43 = vpop.f32.mrf.mxu1 }
 0x531   : > { %v2078_v44 = vadd.f32 %v3140_v40, %v2077_v42  ;;  %v2103_v45 = vadd.f32 %v3141_v41, %v2102_v43 }
 0x533   : > { %v2300_v47 = vpack.c.bf16 %v2078_v44, %v2078_v44  ;;  %v2301_v49 = vpack.c.bf16 %v2103_v45, %v2103_v45 }
 0x534   : > { %2984 = vmatmul.msk.bf16.vlgmr.msrb.gmra.mxu2 %vm1399_vm1, %v2158_v38  ;;  %2985 = vmatmul.msk.bf16.vlgmr.msrb.gmra.mxu3 %vm1399_vm1, %v2159_v39 }
 0x535   : > { %v2308_v52 = vsel %vm1622_vm6, %v2300_v47, 0  ;;  %v2327_v53 = vsel %vm1622_vm6, %v2301_v49, 0 }
 0x536   : > { %2317 = vmatpush.bf16.msra.mxu0 %v2308_v52  ;;  %2336 = vmatpush.bf16.msra.mxu1 %v2327_v53 }
 0x537   : > { %v2127_v50 = vpop.f32.mrf.mxu2  ;;  %v2152_v56 = vpop.f32.mrf.mxu3 }
 0x538   : > { %v2128_v54 = vadd.f32 %v3142_v46, %v2127_v50  ;;  %v2079_v57 = vpop.f32.mrf.mxu0  ;;  %v2104_v58 = vpop.f32.mrf.mxu1  ;;  %v2153_v59 = vadd.f32 %v3143_v51, %v2152_v56 }
 0x53a   : > { %v2302_v55 = vpack.c.bf16 %v2128_v54, %v2128_v54  ;;  %v2303_v61 = vpack.c.bf16 %v2153_v59, %v2153_v59 }
 0x53c   : > { %v2346_v60 = vsel %vm1622_vm6, %v2302_v55, 0  ;;  %v2365_v62 = vsel %vm1622_vm6, %v2303_v61, 0 }
 0x53d   : > { %2355 = vmatpush.bf16.msra.mxu2 %v2346_v60  ;;  %2374 = vmatpush.bf16.msra.mxu3 %v2365_v62  ;;  %v1809_v60 = vld [vmem:[%s3679_s16] sm:$0xf]  ;;  %v1811_v62 = vld [vmem:[%s3679_s16 + $0x8] sm:$0xf] }
 0x53e   : > { %v2388_v61 = vsel %vm1622_vm6, %v1809_v60, 0 }
 0x53f   : > { %v2129_v63 = vpop.f32.mrf.mxu2  ;;  %v2154_v0 = vpop.f32.mrf.mxu3  ;;  %2397 = vmatpush.bf16.msrb.mxu0 %v2388_v61  ;;  %v3073_v61 = vld [vmem:[%s3682_s23 + $0x8] sm:$0xff] }
 0x540   : > { %v1812_v63 = vld [vmem:[%s3679_s16 + $0xc] sm:$0xf]  ;;  %v2426_v0 = vsel %vm1622_vm6, %v1811_v62, 0  ;;  %v3072_v62 = vld [vmem:[%s3682_s23] sm:$0xff] }
 0x541   : > { %2435 = vmatpush.bf16.msrb.mxu2 %v2426_v0 }
 0x5ab   : > { %v2179_v2 = vpop.f32.mrf.mxu0  ;;  %v2198_v3 = vpop.f32.mrf.mxu1 }
 0x5ac   : > { %v2240_v4 = vmul.f32 0.35355338, %v2179_v2  ;;  %v2241_v16 = vmul.f32 0.35355338, %v2198_v3  ;;  %v1810_v2 = vld [vmem:[%s3679_s16 + $0x4] sm:$0xf] }
 0x5ad   : > { %v2407_v3 = vsel %vm1622_vm6, %v1810_v2, 0 }
 0x5ae   : > { %v2247_v5 = vadd.f32 %v3144_v1, %v2240_v4  ;;  %v2248_v21 = vadd.f32 %v3144_v1, %v2241_v16  ;;  %2416 = vmatpush.bf16.msrb.mxu1 %v2407_v3 }
 0x5b0   : > { %v2252_v6 = vsel %vm2251_vm12, %v2247_v5, -inf  ;;  %v2255_v22 = vsel %vm2251_vm12, %v2248_v21, -inf }
 0x5b1   : > { %2253 = vmax.xlane.f32.xlu0 %v2252_v6 }
 0x5b3   : > { %v2181_v7 = vpop.f32.mrf.mxu0  ;;  %v2200_v8 = vpop.f32.mrf.mxu1 }
 0x5b7   : > { %v2217_v9 = vpop.f32.mrf.mxu2  ;;  %v2236_v10 = vpop.f32.mrf.mxu3 }
 0x5b8   : > { %v2242_v11 = vmul.f32 0.35355338, %v2217_v9  ;;  %v2243_v13 = vmul.f32 0.35355338, %v2236_v10 }
 0x5ba   : > { %v2250_v14 = vadd.f32 %v3144_v1, %v2243_v13  ;;  %v2249_v15 = vadd.f32 %v3144_v1, %v2242_v11  ;;  %v2445_v1 = vsel %vm1622_vm6, %v1812_v63, 0 }
 0x5bb   : > { %2454 = vmatpush.bf16.msrb.mxu3 %v2445_v1 }
 0x5bc   : > { %v2261_v17 = vsel %vm2251_vm12, %v2250_v14, -inf  ;;  %v2258_v18 = vsel %vm2251_vm12, %v2249_v15, -inf }
 0x5bd   : > { %2262 = vmax.xlane.f32.xlu2 %v2261_v17  ;;  %2259 = vmax.xlane.f32.xlu1 %v2258_v18 }
 0x5bf   : > { %v2219_v19 = vpop.f32.mrf.mxu2  ;;  %v2238_v20 = vpop.f32.mrf.mxu3 }
 0x5c5   : > { %2256 = vmax.xlane.f32.xlu1 %v2255_v22 }
 0x624   : > { %v2254_v23 = vpop.xlane.xlu0 %2253 }
 0x625   : > { %v2264_v24 = vsub.f32 %v2247_v5, %v2254_v23 }
 0x627   : > { %v2268_v25 = vmul.f32 1.442695, %v2264_v24 }
 0x629   : > { %3172 = vpow2.f32 %v2268_v25 }
 0x62f   : > { %v3173_v26 = vpop.eup %3172 }
 0x630   : > { %v2263_v27 = vpop.xlane.xlu2 %2262  ;;  %v2260_v28 = vpop.xlane.xlu1 %2259  ;;  %v2276_v29 = vsel %vm2251_vm12, %v3173_v26, 0.0 }
 0x631   : > { %v2267_v30 = vsub.f32 %v2250_v14, %v2263_v27  ;;  %v2266_v31 = vsub.f32 %v2249_v15, %v2260_v28  ;;  %2277 = vadd.xlane.f32.xlu1 %v2276_v29  ;;  %v3145_v27 = vld [vmem:[%s3680_s18] ss:$0 sm:$0xff]  ;;  %s3685_s18 = sld [smem:[#allocation13_spill]] }
 0x633   : > { %v2274_v32 = vmul.f32 1.442695, %v2267_v30  ;;  %v2272_v33 = vmul.f32 1.442695, %v2266_v31 }
 0x635   : > { %3174 = vpow2.f32 %v2274_v32 }
 0x636   : > { %3176 = vpow2.f32 %v2272_v33 }
 0x637   : > { %v3148_v63 = vld [vmem:[%s3685_s18] ss:$0 sm:$0xff] }
 0x638   : > { %v2257_v34 = vpop.xlane.xlu1 %2256 }
 0x639   : > { %v2265_v35 = vsub.f32 %v2248_v21, %v2257_v34 }
 0x63b   : > { %v3175_v36 = vpop.eup %3174  ;;  %v2270_v37 = vmul.f32 1.442695, %v2265_v35 }
 0x63c   : > { %v3177_v38 = vpop.eup %3176  ;;  %v2285_v39 = vsel %vm2251_vm12, %v3175_v36, 0.0 }
 0x63d   : > { %3178 = vpow2.f32 %v2270_v37  ;;  %v2282_v40 = vsel %vm2251_vm12, %v3177_v38, 0.0  ;;  %2286 = vadd.xlane.f32.xlu0 %v2285_v39 }
 0x63e   : > { %2283 = vadd.xlane.f32.xlu2 %v2282_v40 }
 0x643   : > { %v3179_v41 = vpop.eup %3178 }
 0x644   : > { %v2279_v42 = vsel %vm2251_vm12, %v3179_v41, 0.0 }
 0x646   : > { %2280 = vadd.xlane.f32.xlu2 %v2279_v42  ;;  %v3070_v42 = vld [vmem:[%s3681_s22] sm:$0xff] }
 0x6a4   : > { %v2278_v43 = vpop.xlane.xlu1 %2277 }
 0x6a5   : > { %3180 = vrcp.f32 %v2278_v43  ;;  %v3075_v43 = vld [vmem:[%s3682_s23 + $0x18] sm:$0xff] }
 0x6ab   : > { %v3181_v44 = vpop.eup %3180 }
 0x6ac   : > { %v2292_v45 = vmul.f32 %v3181_v44, %v3173_v26 }
 0x6ae   : > { %v2296_v46 = vpack.c.bf16 %v2292_v45, %v2292_v45  ;;  %v3074_v45 = vld [vmem:[%s3682_s23 + $0x10] sm:$0xff] }
 0x6b0   : > { %2986 = vmatmul.msk.bf16.vlgmr.msra.gmra.mxu0 %vm1399_vm1, %v2296_v46  ;;  %v2287_v47 = vpop.xlane.xlu0 %2286 }
 0x6b1   : > { %v2284_v49 = vpop.xlane.xlu2 %2283  ;;  %3182 = vrcp.f32 %v2287_v47 }
 0x6b2   : > { %3184 = vrcp.f32 %v2284_v49 }
 0x6b7   : > { %v3183_v50 = vpop.eup %3182 }
 0x6b8   : > { %v3185_v51 = vpop.eup %3184  ;;  %v2295_v52 = vmul.f32 %v3183_v50, %v3175_v36 }
 0x6b9   : > { %v2294_v53 = vmul.f32 %v3185_v51, %v3177_v38  ;;  %v2281_v54 = vpop.xlane.xlu2 %2280 }
 0x6ba   : > { %v2299_v55 = vpack.c.bf16 %v2295_v52, %v2295_v52  ;;  %3186 = vrcp.f32 %v2281_v54  ;;  %v3146_v54 = vld [vmem:[%s3683_s28] ss:$0 sm:$0xff]  ;;  %s970_s28 = scalar_lea.vmem %s3390_s17, %s3411_s0 }
 0x6bb   : > { %v2298_v56 = vpack.c.bf16 %v2294_v53, %v2294_v53 }
 0x6bc   : > { %2989 = vmatmul.msk.bf16.vlgmr.msra.gmra.mxu3 %vm1399_vm1, %v2299_v55 }
 0x6bd   : > { %2988 = vmatmul.msk.bf16.vlgmr.msra.gmra.mxu2 %vm1399_vm1, %v2298_v56  ;;  %v3147_v56 = vld [vmem:[%s3684_s10] ss:$0 sm:$0xff] }
 0x6c0   : > { %v3187_v57 = vpop.eup %3186 }
 0x6c1   : > { %v2293_v58 = vmul.f32 %v3187_v57, %v3179_v41  ;;  %v3071_v41 = vld [vmem:[%s3681_s22 + $0x8] sm:$0xff] }
 0x6c2   : > { %2544 = vmatpush.bf16.msra.mxu0 %v3071_v41 }
 0x6c3   : > { %v2297_v59 = vpack.c.bf16 %v2293_v58, %v2293_v58 }
 0x6c5   : > { %2987 = vmatmul.msk.bf16.vlgmr.msra.gmra.mxu1 %vm1399_vm1, %v2297_v59 }
 0x6c6   : > { %2545 = vmatpush.bf16.msra.mxu0 %v3070_v42  ;;  %2588 = vmatpush.bf16.msra.mxu1 %v3075_v43 }
 0x6ca   : > { %2589 = vmatpush.bf16.msra.mxu1 %v3074_v45 }
 0x6ce   : > { %2590 = vmatpush.bf16.msra.mxu1 %v3073_v61 }
 0x6d2   : > { %2591 = vmatpush.bf16.msra.mxu1 %v3072_v62 }
 0x72d   : > { %v2319_v4 = vpop.f32.mrf.mxu0 }
 0x72e   : > { %v2380_v5 = vpack.c.bf16 %v2319_v4, %v2319_v4 }
 0x730   : > { %2990 = vmatmul.msk.bf16.vlgmr.msrb.gmra.mxu0 %vm1399_vm1, %v2380_v5  ;;  %v3149_v5 = vld [vmem:[%s3375_s20] ss:$0 sm:$0xff] }
 0x735   : > { %v2321_v6 = vpop.f32.mrf.mxu0 }
 0x73f   : > { %v2376_v7 = vpop.f32.mrf.mxu3 }
 0x740   : > { %v2357_v8 = vpop.f32.mrf.mxu2  ;;  %v2383_v9 = vpack.c.bf16 %v2376_v7, %v2376_v7 }
 0x741   : > { %v2382_v10 = vpack.c.bf16 %v2357_v8, %v2357_v8 }
 0x742   : > { %v2338_v11 = vpop.f32.mrf.mxu1  ;;  %2993 = vmatmul.msk.bf16.vlgmr.msrb.gmra.mxu3 %vm1399_vm1, %v2383_v9 }
 0x743   : > { %v2381_v13 = vpack.c.bf16 %v2338_v11, %v2338_v11  ;;  %2992 = vmatmul.msk.bf16.vlgmr.msrb.gmra.mxu2 %vm1399_vm1, %v2382_v10 }
 0x745   : > { %2991 = vmatmul.msk.bf16.vlgmr.msrb.gmra.mxu1 %vm1399_vm1, %v2381_v13  ;;  %vm2580_vm1 = vcmask 523264  }
 0x747   : > { %v2378_v14 = vpop.f32.mrf.mxu3 }
 0x748   : > { %v2359_v15 = vpop.f32.mrf.mxu2 }
 0x74a   : > { %v2340_v16 = vpop.f32.mrf.mxu1 }
 0x7ad   : > { %v2399_v17 = vpop.f32.mrf.mxu0 }
 0x7ae   : > { %v2460_v21 = vsel %vm1696_vm7, %v2399_v17, 0.0 }
 0x7b5   : > { %v2401_v18 = vpop.f32.mrf.mxu0 }
 0x7c2   : > { %v2418_v19 = vpop.f32.mrf.mxu1 }
 0x7c3   : > { %v2461_v20 = vsel %vm1696_vm7, %v2418_v19, 0.0 }
 0x7c4   : > { %v2462_v23 = vadd.f32 %v2461_v20, %v2460_v21 }
 0x7c5   : > { %v2456_v22 = vpop.f32.mrf.mxu3 }
 0x7c6   : > { %v2437_v24 = vpop.f32.mrf.mxu2  ;;  %v2465_v28 = vsel %vm1696_vm7, %v2456_v22, 0.0 }
 0x7c7   : > { %v2463_v25 = vsel %vm1696_vm7, %v2437_v24, 0.0 }
 0x7c8   : > { %v2464_v26 = vadd.f32 %v2463_v25, %v2462_v23 }
 0x7ca   : > { %v2466_v29 = vadd.f32 %v2465_v28, %v2464_v26  ;;  %v2420_v30 = vpop.f32.mrf.mxu1  ;;  %v3150_v26 = vld [vmem:[%s3380_s9] ss:$0 sm:$0xff] }
 0x7cb   : > { %v3151_v28 = vld [vmem:[%s3385_s4] ss:$0 sm:$0xff] }
 0x7cc   : > { %v2471_v31 = vadd.f32 %v3145_v27, %v2466_v29 }
 0x7cd   : > { %v2458_v32 = vpop.f32.mrf.mxu3 }
 0x7ce   : > { %v2439_v33 = vpop.f32.mrf.mxu2  ;;  %v2472_v34 = vadd.f32 %v2471_v31, %v3540_v48 }
 0x7d0   : > { %v2475_v35 = vsel %vm1696_vm7, %v2472_v34, 0.0 }
 0x7d1   : > { %2476 = vadd.xlane.f32.xlu0 %v2475_v35 }
 0x844   : > { %v2477_v36 = vpop.xlane.xlu0 %2476 }
 0x845   : > { %v2478_v37 = vmul.f32 %v2477_v36, %v3517_v12 }
 0x847   : > { %v2479_v38 = vsub.f32 %v2472_v34, %v2478_v37 }
 0x849   : > { %v2480_v39 = vmul.f32 %v2479_v38, %v2479_v38 }
 0x84b   : > { %v2481_v40 = vsel %vm1696_vm7, %v2480_v39, 0.0 }
 0x84c   : > { %2482 = vadd.xlane.f32.xlu1 %v2481_v40 }
 0x8bf   : > { %v2483_v44 = vpop.xlane.xlu1 %2482 }
 0x8c0   : > { %v2484_v48 = vmul.f32 %v2483_v44, %v3517_v12 }
 0x8c2   : > { %v2485_v46 = vadd.f32 1e-05, %v2484_v48 }
 0x8c4   : > { %3188 = vrsqrt.f32 %v2485_v46  ;;  %vm2492_vm14 = vweird.f32 %v2485_v46 }
 0x8ca   : > { %v3189_v47 = vpop.eup %3188 }
 0x8cb   : > { %v2487_v49 = vmul.f32 %v3189_v47, %v2485_v46  ;;  %vm2493_vm13 = vweird.f32 %v3189_v47 }
 0x8cc   : > { %vm2494_vm15 = vmor %vm2492_vm14, %vm2493_vm13 }
 0x8cd   : > { %v2488_v50 = vmul.f32 %v3189_v47, %v2487_v49 }
 0x8cf   : > { %v2489_v51 = vmul.f32 0.5, %v2488_v50 }
 0x8d1   : > { %v2490_v52 = vsub.f32 1.5, %v2489_v51 }
 0x8d3   : > { %v2491_v53 = vmul.f32 %v3189_v47, %v2490_v52 }
 0x8d5   : > { %v2495_v55 = vsel %vm2494_vm15, %v3189_v47, %v2491_v53 }
 0x8d6   : > { %v2496_v57 = vmul.f32 %v2495_v55, %v2479_v38 }
 0x8d8   : > { %v2500_v58 = vmul.f32 %v3146_v54, %v2496_v57 }
 0x8da   : > { %v2504_v59 = vadd.f32 %v3147_v56, %v2500_v58 }
 0x8dc   : > { %v2519_v60 = vpack.c.bf16 %v2504_v59, %v2504_v59 }
 0x8de   : > { %3002 = vmatmul.msk.bf16.vlgmr.msra.gmra.mxu0 %vm1075_vm0, %v2519_v60 }
 0x95b   : > { %v2547_v0 = vpop.f32.mrf.mxu0 }
 0x95c   : > { %v2548_v1 = vadd.f32 %v3148_v63, %v2547_v0 }
 0x95e   : > { %v2551_v2 = vmax.f32 %v2548_v1, 0.0 }
 0x960   : > { %v2552_v3 = vpack.c.bf16 %v2551_v2, %v2551_v2 }
 0x962   : > { %3019 = vmatmul.msk.bf16.vlgmr.msra.gmra.mxu1 %vm2580_vm1, %v2552_v3 }
 0x963   : > { %v2549_v4 = vpop.f32.mrf.mxu0 }
 0x9df   : > { %v2593_v6 = vpop.f32.mrf.mxu1 }
 0x9e0   : > { %v2594_v7 = vadd.f32 %v3149_v5, %v2593_v6 }
 0x9e2   : > { %v2597_v8 = vadd.f32 %v2594_v7, %v2504_v59 }
 0x9e4   : > { %v2600_v9 = vsel %vm1696_vm7, %v2597_v8, 0.0 }
 0x9e5   : > { %2601 = vadd.xlane.f32.xlu2 %v2600_v9 }
 0x9e7   : > { %v2595_v10 = vpop.f32.mrf.mxu1 }
 0xa58   : > { %v2602_v11 = vpop.xlane.xlu2 %2601 }
 0xa59   : > { %v2603_v13 = vmul.f32 %v2602_v11, %v3517_v12 }
 0xa5b   : > { %v2604_v14 = vsub.f32 %v2597_v8, %v2603_v13 }
 0xa5d   : > { %v2605_v15 = vmul.f32 %v2604_v14, %v2604_v14 }
 0xa5f   : > { %v2606_v16 = vsel %vm1696_vm7, %v2605_v15, 0.0 }
 0xa60   : > { %2607 = vadd.xlane.f32.xlu0 %v2606_v16 }
 0xad3   : > { %v2608_v17 = vpop.xlane.xlu0 %2607 }
 0xad4   : > { %v2609_v18 = vmul.f32 %v2608_v17, %v3517_v12 }
 0xad6   : > { %v2610_v19 = vadd.f32 1e-05, %v2609_v18 }
 0xad8   : > { %3190 = vrsqrt.f32 %v2610_v19  ;;  %vm2617_vm2 = vweird.f32 %v2610_v19 }
 0xade   : > { %v3191_v20 = vpop.eup %3190 }
 0xadf   : > { %v2612_v21 = vmul.f32 %v3191_v20, %v2610_v19  ;;  %vm2618_vm0 = vweird.f32 %v3191_v20 }
 0xae0   : > { %vm2619_vm3 = vmor %vm2617_vm2, %vm2618_vm0 }
 0xae1   : > { %v2613_v22 = vmul.f32 %v3191_v20, %v2612_v21 }
 0xae3   : > { %v2614_v23 = vmul.f32 0.5, %v2613_v22 }
 0xae5   : > { %v2615_v24 = vsub.f32 1.5, %v2614_v23 }
 0xae7   : > { %v2616_v25 = vmul.f32 %v3191_v20, %v2615_v24 }
 0xae9   : > { %v2620_v27 = vsel %vm2619_vm3, %v3191_v20, %v2616_v25 }
 0xaea   : > { %v2621_v29 = vmul.f32 %v2620_v27, %v2604_v14 }
 0xaec   : > { %v2625_v30 = vmul.f32 %v3150_v26, %v2621_v29 }
 0xaee   : > { %v2629_v31 = vadd.f32 %v3151_v28, %v2625_v30 }
 0xaf0   : > { %v2630_v12 = vpack.c.bf16 %v2629_v31, %v2629_v31 }
 0xaf2   : > { %2632 = vst.msk [vmem:[%s970_s28] sm:$0x7] %vm2631_vm4, %v2630_v12 }
 0xaf3 PF: > { %s71_s15 = sadd.s32 1, %s3198_s15  }
 0xaf4   : > { %p68_p4 = scmp.ge.s32.totalorder %s71_s15, 4  }
 0xaf6   :  { %70 = sbr.rel (!%p68_p4) target bundleno = 48 (0x30), region = 209 }

</bundles_post_ra>
